<compile_context>
chip_gen: v7x
topology: tpu7x:2x2x1
jax: 0.10.0
libtpu: 0.0.40
codegen_flags: <defaults>
</compile_context>

<pallas_src>
import functools

import jax
import jax.numpy as jnp
from jax import lax
from jax.experimental import pallas as pl
from jax.experimental.pallas import tpu as pltpu

D_FF = 2048
LN_EPS = 1e-5  # nn.LayerNorm default


def _ffn_kernel(x_ref, w1_ref, b1_ref, w2_ref, b2_ref, gamma_ref, beta_ref,
                o_ref):
    # x_ref: (tile_m, d_model) tile of flattened positions (f32 in HBM).
    x = x_ref[...]
    x_f32 = x.astype(jnp.float32)     # residual / LayerNorm path
    x_bf16 = x.astype(jnp.bfloat16)   # MXU path

    # Hoist the (1, C) parameter reads once; keep VPU math in f32.
    b1 = b1_ref[...].astype(jnp.float32)
    b2 = b2_ref[...].astype(jnp.float32)
    gamma = gamma_ref[...].astype(jnp.float32)
    beta = beta_ref[...].astype(jnp.float32)

    # conv1 (kernel_size=1): bf16 MXU matmul, f32 accumulation, bias + ReLU.
    h = jnp.dot(x_bf16, w1_ref[...], preferred_element_type=jnp.float32)
    h = jnp.maximum(h + b1, 0.0)

    # conv2 (kernel_size=1): activations cast to bf16 for the MXU, f32 acc.
    y = jnp.dot(h.astype(jnp.bfloat16), w2_ref[...],
                preferred_element_type=jnp.float32)
    y = y + b2

    # residual + LayerNorm over d_model (last axis), all f32.
    z = y + x_f32
    mean = jnp.mean(z, axis=-1, keepdims=True)
    cz = z - mean
    var = jnp.mean(cz * cz, axis=-1, keepdims=True)
    zn = cz * lax.rsqrt(var + LN_EPS)
    o_ref[...] = (zn * gamma + beta).astype(o_ref.dtype)


def _round_up(n, m):
    return ((n + m - 1) // m) * m


@functools.partial(jax.jit, static_argnames=("tile_m", "single_buffer_weights"))
def poswise_ffn(x, w1, b1, w2, b2, gamma, beta, *, tile_m=256,
                single_buffer_weights=True):
    """x: (batch, seq, d_model) f32; w1: (d_model, d_ff); w2: (d_ff, d_model)."""
    B, S, D = x.shape
    N = B * S

    # Tile over the flattened (batch*seq) axis. Keep the tile a multiple of 8
    # (sublanes) and no larger than the padded row count. On v7x pick tile_m
    # so n_pad // tile >= 4 to keep both TensorCores busy; on v6e (128 MiB
    # VMEM) tile_m up to 1024-2048 is fine, on v7x (64 MiB) cap near 512-1024.
    tile = min(tile_m, _round_up(N, 8))
    tile = max(8, (tile // 8) * 8)
    n_pad = _round_up(N, tile)

    x2d = x.reshape(N, D).astype(jnp.float32)
    if n_pad != N:
        x2d = jnp.pad(x2d, ((0, n_pad - N), (0, 0)))

    # Weights DMA'd as bf16 (half the HBM traffic / VMEM; acc stays f32).
    w1_bf = w1.astype(jnp.bfloat16)
    w2_bf = w2.astype(jnp.bfloat16)
    # biases / ln params kept 2D (1, C) for TPU-friendly broadcasting.
    b1_2d = b1.reshape(1, D_FF).astype(jnp.float32)
    b2_2d = b2.reshape(1, D).astype(jnp.float32)
    g_2d = gamma.reshape(1, D).astype(jnp.float32)
    bt_2d = beta.reshape(1, D).astype(jnp.float32)

    # Grid-invariant operands: request a single pipeline buffer so they are
    # not double-buffered (pure VMEM savings; they're only DMA'd once anyway).
    use_single = single_buffer_weights and hasattr(pl, "Buffered")

    def const_spec(shape):
        if use_single:
            return pl.BlockSpec(shape, lambda i: (0, 0),
                                pipeline_mode=pl.Buffered(1))
        return pl.BlockSpec(shape, lambda i: (0, 0))

    # Explicit VMEM budget: weights (bf16, worst-case 2 bufs) + double-buffered
    # x/out tiles (f32) + the (tile, D_FF) f32 hidden intermediate + params,
    # with 1.5x + 8 MiB headroom, capped at 64 MiB (v7x physical VMEM).
    weights_b = 2 * (D * D_FF + D_FF * D) * 2
    io_b = 2 * 2 * tile * D * 4
    hidden_b = 2 * tile * D_FF * 4
    params_b = 2 * (2 * D_FF + 3 * D) * 4
    vmem_limit = min(int((weights_b + io_b + hidden_b + params_b) * 1.5)
                     + (8 << 20), 64 << 20)

    # Advisory cost estimate for XLA's scheduler around this custom call.
    flops = 4 * n_pad * D * D_FF + 12 * n_pad * D
    bytes_accessed = 2 * N * D * 4 + 2 * D * D_FF * 2 + (2 * D_FF + 3 * D) * 4

    grid = (n_pad // tile,)
    out = pl.pallas_call(
        _ffn_kernel,
        out_shape=jax.ShapeDtypeStruct((n_pad, D), jnp.float32),
        grid_spec=pltpu.PrefetchScalarGridSpec(
            num_scalar_prefetch=0,
            grid=grid,
            in_specs=[
                pl.BlockSpec((tile, D), lambda i: (i, 0)),   # x rows
                const_spec((D, D_FF)),                       # W1 (bf16)
                const_spec((1, D_FF)),                       # b1
                const_spec((D_FF, D)),                       # W2 (bf16)
                const_spec((1, D)),                          # b2
                const_spec((1, D)),                          # gamma
                const_spec((1, D)),                          # beta
            ],
            out_specs=pl.BlockSpec((tile, D), lambda i: (i, 0)),
        ),
        compiler_params=pltpu.CompilerParams(
            dimension_semantics=("parallel",),
            vmem_limit_bytes=vmem_limit),
        cost_estimate=pl.CostEstimate(
            flops=int(flops),
            transcendentals=int(n_pad),
            bytes_accessed=int(bytes_accessed)),
    )(x2d, w1_bf, b1_2d, w2_bf, b2_2d, g_2d, bt_2d)

    if n_pad != N:
        out = out[:N]
    return out.reshape(B, S, D)


def reference_ffn(x, w1, b1, w2, b2, gamma, beta, *, matmul_dtype=jnp.float32):
    """Pure-JAX reference matching the PyTorch forward.

    matmul_dtype=bf16 mirrors the kernel's MXU precision (f32 accumulation);
    matmul_dtype=f32 is the exact PyTorch-equivalent math.
    """
    h = jnp.einsum("bsd,df->bsf", x.astype(matmul_dtype),
                   w1.astype(matmul_dtype),
                   preferred_element_type=jnp.float32)
    h = jnp.maximum(h + b1, 0.0)
    y = jnp.einsum("bsf,fd->bsd", h.astype(matmul_dtype),
                   w2.astype(matmul_dtype),
                   preferred_element_type=jnp.float32)
    y = y + b2
    z = y + x
    mean = jnp.mean(z, axis=-1, keepdims=True)
    var = jnp.mean((z - mean) ** 2, axis=-1, keepdims=True)
    return (z - mean) * lax.rsqrt(var + LN_EPS) * gamma + beta


if __name__ == "__main__":
    # Small, deterministic configuration; d_model is a multiple of 128 so the
    # output stores are lane-dense and the MXU sees no padding waste.
    batch, seq, d_model = 2, 8, 128

    key = jax.random.PRNGKey(0)
    kx, k1, kb1, k2, kb2 = jax.random.split(key, 5)

    x = jax.random.normal(kx, (batch, seq, d_model), dtype=jnp.float32)

    # Conv1d(k=1) weights stored as (in, out) matrices for the matmul.
    # (PyTorch stores (out, in, 1); this is that weight transposed + squeezed.)
    w1 = jax.random.normal(k1, (d_model, D_FF), dtype=jnp.float32) * 0.05
    b1 = jax.random.normal(kb1, (D_FF,), dtype=jnp.float32) * 0.05
    w2 = jax.random.normal(k2, (D_FF, d_model), dtype=jnp.float32) * 0.05
    b2 = jax.random.normal(kb2, (d_model,), dtype=jnp.float32) * 0.05
    gamma = jnp.ones((d_model,), dtype=jnp.float32)   # LayerNorm default init
    beta = jnp.zeros((d_model,), dtype=jnp.float32)

    try:
        out = jax.block_until_ready(
            poswise_ffn(x, w1, b1, w2, b2, gamma, beta))
    except Exception:
        # Graceful fallback if this jax/libtpu build rejects pl.Buffered(1) on
        # the invariant-operand BlockSpecs: same kernel, default buffering.
        out = jax.block_until_ready(
            poswise_ffn(x, w1, b1, w2, b2, gamma, beta,
                        single_buffer_weights=False))

    assert out.shape == (batch, seq, d_model)

    # Tight check vs. a reference mirroring the kernel's bf16-MXU / f32-acc
    # precision, plus a looser sanity check vs. the pure-f32 math.
    ref_bf16 = reference_ffn(x, w1, b1, w2, b2, gamma, beta,
                             matmul_dtype=jnp.bfloat16)
    ref_f32 = reference_ffn(x, w1, b1, w2, b2, gamma, beta,
                            matmul_dtype=jnp.float32)
    assert jnp.allclose(out, ref_bf16, atol=2e-3, rtol=2e-3), \
        "mismatch vs bf16-precision reference"
    assert jnp.allclose(out, ref_f32, atol=5e-2, rtol=5e-2), \
        "mismatch vs f32 reference"

    print("KERNEL_OK")
</pallas_src>

<mosaic_0001>
module attributes {stable_mosaic.version = 11 : i64} {
  func.func @_ffn_kernel(%arg0: i32, %arg1: memref<16x128xf32, #tpu.memory_space<vmem>>, %arg2: memref<128x2048xbf16, #tpu.memory_space<vmem>>, %arg3: memref<1x2048xf32, #tpu.memory_space<vmem>>, %arg4: memref<2048x128xbf16, #tpu.memory_space<vmem>>, %arg5: memref<1x128xf32, #tpu.memory_space<vmem>>, %arg6: memref<1x128xf32, #tpu.memory_space<vmem>>, %arg7: memref<1x128xf32, #tpu.memory_space<vmem>>, %arg8: memref<16x128xf32, #tpu.memory_space<vmem>>) attributes {dimension_semantics = [#tpu.dimension_semantics<parallel>], iteration_bounds = array<i64: 1>, scalar_prefetch = 0 : i64, scratch_operands = 0 : i64, tpu.core_type = #tpu.core_type<tc>, window_params = [{transform_indices = @transform_0, window_bounds = array<i64: 16, 128>}, {pipeline_mode = #tpu.pipeline_mode<synchronous>, transform_indices = @transform_1, window_bounds = array<i64: 128, 2048>}, {pipeline_mode = #tpu.pipeline_mode<synchronous>, transform_indices = @transform_2, window_bounds = array<i64: 1, 2048>}, {pipeline_mode = #tpu.pipeline_mode<synchronous>, transform_indices = @transform_3, window_bounds = array<i64: 2048, 128>}, {pipeline_mode = #tpu.pipeline_mode<synchronous>, transform_indices = @transform_4, window_bounds = array<i64: 1, 128>}, {pipeline_mode = #tpu.pipeline_mode<synchronous>, transform_indices = @transform_5, window_bounds = array<i64: 1, 128>}, {pipeline_mode = #tpu.pipeline_mode<synchronous>, transform_indices = @transform_6, window_bounds = array<i64: 1, 128>}, {transform_indices = @transform_7, window_bounds = array<i64: 16, 128>}]} {
    %c0 = arith.constant 0 : index
    %c0_0 = arith.constant 0 : index
    %0 = vector.load %arg1[%c0, %c0_0] : memref<16x128xf32, #tpu.memory_space<vmem>>, vector<16x128xf32>
    %1 = arith.truncf %0 : vector<16x128xf32> to vector<16x128xbf16>
    %c0_1 = arith.constant 0 : index
    %c0_2 = arith.constant 0 : index
    %2 = vector.load %arg3[%c0_1, %c0_2] : memref<1x2048xf32, #tpu.memory_space<vmem>>, vector<1x2048xf32>
    %c0_3 = arith.constant 0 : index
    %c0_4 = arith.constant 0 : index
    %3 = vector.load %arg5[%c0_3, %c0_4] : memref<1x128xf32, #tpu.memory_space<vmem>>, vector<1x128xf32>
    %c0_5 = arith.constant 0 : index
    %c0_6 = arith.constant 0 : index
    %4 = vector.load %arg6[%c0_5, %c0_6] : memref<1x128xf32, #tpu.memory_space<vmem>>, vector<1x128xf32>
    %c0_7 = arith.constant 0 : index
    %c0_8 = arith.constant 0 : index
    %5 = vector.load %arg7[%c0_7, %c0_8] : memref<1x128xf32, #tpu.memory_space<vmem>>, vector<1x128xf32>
    %c0_9 = arith.constant 0 : index
    %c0_10 = arith.constant 0 : index
    %6 = vector.load %arg2[%c0_9, %c0_10] : memref<128x2048xbf16, #tpu.memory_space<vmem>>, vector<128x2048xbf16>
    %cst = arith.constant dense<0.000000e+00> : vector<16x2048xf32>
    %7 = tpu.matmul %1, %6, %cst {dimension_numbers = #tpu.dot_dimension_numbers<[1], [0], [0], [1], [0, 0, 1, 1], [], []>} : vector<16x128xbf16>, vector<128x2048xbf16>, vector<16x2048xf32> -> vector<16x2048xf32>
    %8 = vector.broadcast %2 : vector<1x2048xf32> to vector<16x2048xf32>
    %9 = arith.addf %7, %8 : vector<16x2048xf32>
    %cst_11 = arith.constant 0.000000e+00 : f32
    %10 = vector.broadcast %cst_11 : f32 to vector<16x2048xf32>
    %11 = arith.maximumf %9, %10 : vector<16x2048xf32>
    %12 = arith.truncf %11 : vector<16x2048xf32> to vector<16x2048xbf16>
    %c0_12 = arith.constant 0 : index
    %c0_13 = arith.constant 0 : index
    %13 = vector.load %arg4[%c0_12, %c0_13] : memref<2048x128xbf16, #tpu.memory_space<vmem>>, vector<2048x128xbf16>
    %cst_14 = arith.constant dense<0.000000e+00> : vector<16x128xf32>
    %14 = tpu.matmul %12, %13, %cst_14 {dimension_numbers = #tpu.dot_dimension_numbers<[1], [0], [0], [1], [0, 0, 1, 1], [], []>} : vector<16x2048xbf16>, vector<2048x128xbf16>, vector<16x128xf32> -> vector<16x128xf32>
    %15 = vector.broadcast %3 : vector<1x128xf32> to vector<16x128xf32>
    %16 = arith.addf %14, %15 : vector<16x128xf32>
    %17 = arith.addf %16, %0 : vector<16x128xf32>
    %cst_15 = arith.constant dense<0.000000e+00> : vector<16xf32>
    %18 = vector.multi_reduction <add>, %17, %cst_15 [1] : vector<16x128xf32> to vector<16xf32>
    %19 = vector.shape_cast %18 : vector<16xf32> to vector<16x1xf32>
    %cst_16 = arith.constant 1.280000e+02 : f32
    %20 = vector.broadcast %cst_16 : f32 to vector<16x1xf32>
    %21 = arith.divf %19, %20 : vector<16x1xf32>
    %22 = vector.broadcast %21 : vector<16x1xf32> to vector<16x128xf32>
    %23 = arith.subf %17, %22 : vector<16x128xf32>
    %24 = arith.mulf %23, %23 : vector<16x128xf32>
    %cst_17 = arith.constant dense<0.000000e+00> : vector<16xf32>
    %25 = vector.multi_reduction <add>, %24, %cst_17 [1] : vector<16x128xf32> to vector<16xf32>
    %26 = vector.shape_cast %25 : vector<16xf32> to vector<16x1xf32>
    %cst_18 = arith.constant 1.280000e+02 : f32
    %27 = vector.broadcast %cst_18 : f32 to vector<16x1xf32>
    %28 = arith.divf %26, %27 : vector<16x1xf32>
    %cst_19 = arith.constant 9.99999974E-6 : f32
    %29 = vector.broadcast %cst_19 : f32 to vector<16x1xf32>
    %30 = arith.addf %28, %29 : vector<16x1xf32>
    %31 = math.rsqrt %30 : vector<16x1xf32>
    %32 = vector.broadcast %31 : vector<16x1xf32> to vector<16x128xf32>
    %33 = arith.mulf %23, %32 : vector<16x128xf32>
    %34 = vector.broadcast %4 : vector<1x128xf32> to vector<16x128xf32>
    %35 = arith.mulf %33, %34 : vector<16x128xf32>
    %36 = vector.broadcast %5 : vector<1x128xf32> to vector<16x128xf32>
    %37 = arith.addf %35, %36 : vector<16x128xf32>
    %c0_20 = arith.constant 0 : index
    %c0_21 = arith.constant 0 : index
    %38 = vector.load %arg8[%c0_20, %c0_21] : memref<16x128xf32, #tpu.memory_space<vmem>>, vector<16x128xf32>
    tpu.vector_store %arg8[%c0_20, %c0_21], %37 {strides = array<i32>} : memref<16x128xf32, #tpu.memory_space<vmem>>, vector<16x128xf32>,
    return
  }
  func.func @transform_0(%arg0: i32) -> (i32, i32) {
    %c0_i32 = arith.constant 0 : i32
    %c0_i32_0 = arith.constant 0 : i32
    return %arg0, %c0_i32 : i32, i32
  }
  func.func @transform_1(%arg0: i32) -> (i32, i32) {
    %c0_i32 = arith.constant 0 : i32
    %c0_i32_0 = arith.constant 0 : i32
    %c0_i32_1 = arith.constant 0 : i32
    return %c0_i32, %c0_i32_0 : i32, i32
  }
  func.func @transform_2(%arg0: i32) -> (i32, i32) {
    %c0_i32 = arith.constant 0 : i32
    %c0_i32_0 = arith.constant 0 : i32
    %c0_i32_1 = arith.constant 0 : i32
    return %c0_i32, %c0_i32_0 : i32, i32
  }
  func.func @transform_3(%arg0: i32) -> (i32, i32) {
    %c0_i32 = arith.constant 0 : i32
    %c0_i32_0 = arith.constant 0 : i32
    %c0_i32_1 = arith.constant 0 : i32
    return %c0_i32, %c0_i32_0 : i32, i32
  }
  func.func @transform_4(%arg0: i32) -> (i32, i32) {
    %c0_i32 = arith.constant 0 : i32
    %c0_i32_0 = arith.constant 0 : i32
    %c0_i32_1 = arith.constant 0 : i32
    return %c0_i32, %c0_i32_0 : i32, i32
  }
  func.func @transform_5(%arg0: i32) -> (i32, i32) {
    %c0_i32 = arith.constant 0 : i32
    %c0_i32_0 = arith.constant 0 : i32
    %c0_i32_1 = arith.constant 0 : i32
    return %c0_i32, %c0_i32_0 : i32, i32
  }
  func.func @transform_6(%arg0: i32) -> (i32, i32) {
    %c0_i32 = arith.constant 0 : i32
    %c0_i32_0 = arith.constant 0 : i32
    %c0_i32_1 = arith.constant 0 : i32
    return %c0_i32, %c0_i32_0 : i32, i32
  }
  func.func @transform_7(%arg0: i32) -> (i32, i32) {
    %c0_i32 = arith.constant 0 : i32
    %c0_i32_0 = arith.constant 0 : i32
    return %arg0, %c0_i32 : i32, i32
  }
}

module attributes {stable_mosaic.version = 11 : i64} {
  func.func @_ffn_kernel(%arg0: i32, %arg1: memref<16x128xf32, #tpu.memory_space<vmem>>, %arg2: memref<128x2048xbf16, #tpu.memory_space<vmem>>, %arg3: memref<1x2048xf32, #tpu.memory_space<vmem>>, %arg4: memref<2048x128xbf16, #tpu.memory_space<vmem>>, %arg5: memref<1x128xf32, #tpu.memory_space<vmem>>, %arg6: memref<1x128xf32, #tpu.memory_space<vmem>>, %arg7: memref<1x128xf32, #tpu.memory_space<vmem>>, %arg8: memref<16x128xf32, #tpu.memory_space<vmem>>) attributes {dimension_semantics = [#tpu.dimension_semantics<parallel>], iteration_bounds = array<i64: 1>, scalar_prefetch = 0 : i64, scratch_operands = 0 : i64, tpu.core_type = #tpu.core_type<tc>, window_params = [{transform_indices = @transform_0, window_bounds = array<i64: 16, 128>}, {pipeline_mode = #tpu.pipeline_mode<synchronous>, transform_indices = @transform_1, window_bounds = array<i64: 128, 2048>}, {pipeline_mode = #tpu.pipeline_mode<synchronous>, transform_indices = @transform_2, window_bounds = array<i64: 1, 2048>}, {pipeline_mode = #tpu.pipeline_mode<synchronous>, transform_indices = @transform_3, window_bounds = array<i64: 2048, 128>}, {pipeline_mode = #tpu.pipeline_mode<synchronous>, transform_indices = @transform_4, window_bounds = array<i64: 1, 128>}, {pipeline_mode = #tpu.pipeline_mode<synchronous>, transform_indices = @transform_5, window_bounds = array<i64: 1, 128>}, {pipeline_mode = #tpu.pipeline_mode<synchronous>, transform_indices = @transform_6, window_bounds = array<i64: 1, 128>}, {transform_indices = @transform_7, window_bounds = array<i64: 16, 128>}]} {
    %c0 = arith.constant 0 : index
    %c0_0 = arith.constant 0 : index
    %0 = vector.load %arg1[%c0, %c0_0] : memref<16x128xf32, #tpu.memory_space<vmem>>, vector<16x128xf32>
    %1 = arith.truncf %0 : vector<16x128xf32> to vector<16x128xbf16>
    %c0_1 = arith.constant 0 : index
    %c0_2 = arith.constant 0 : index
    %2 = vector.load %arg3[%c0_1, %c0_2] : memref<1x2048xf32, #tpu.memory_space<vmem>>, vector<1x2048xf32>
    %c0_3 = arith.constant 0 : index
    %c0_4 = arith.constant 0 : index
    %3 = vector.load %arg5[%c0_3, %c0_4] : memref<1x128xf32, #tpu.memory_space<vmem>>, vector<1x128xf32>
    %c0_5 = arith.constant 0 : index
    %c0_6 = arith.constant 0 : index
    %4 = vector.load %arg6[%c0_5, %c0_6] : memref<1x128xf32, #tpu.memory_space<vmem>>, vector<1x128xf32>
    %c0_7 = arith.constant 0 : index
    %c0_8 = arith.constant 0 : index
    %5 = vector.load %arg7[%c0_7, %c0_8] : memref<1x128xf32, #tpu.memory_space<vmem>>, vector<1x128xf32>
    %c0_9 = arith.constant 0 : index
    %c0_10 = arith.constant 0 : index
    %6 = vector.load %arg2[%c0_9, %c0_10] : memref<128x2048xbf16, #tpu.memory_space<vmem>>, vector<128x2048xbf16>
    %cst = arith.constant dense<0.000000e+00> : vector<16x2048xf32>
    %7 = tpu.matmul %1, %6, %cst {dimension_numbers = #tpu.dot_dimension_numbers<[1], [0], [0], [1], [0, 0, 1, 1], [], []>} : vector<16x128xbf16>, vector<128x2048xbf16>, vector<16x2048xf32> -> vector<16x2048xf32>
    %8 = vector.broadcast %2 : vector<1x2048xf32> to vector<16x2048xf32>
    %9 = arith.addf %7, %8 : vector<16x2048xf32>
    %cst_11 = arith.constant 0.000000e+00 : f32
    %10 = vector.broadcast %cst_11 : f32 to vector<16x2048xf32>
    %11 = arith.maximumf %9, %10 : vector<16x2048xf32>
    %12 = arith.truncf %11 : vector<16x2048xf32> to vector<16x2048xbf16>
    %c0_12 = arith.constant 0 : index
    %c0_13 = arith.constant 0 : index
    %13 = vector.load %arg4[%c0_12, %c0_13] : memref<2048x128xbf16, #tpu.memory_space<vmem>>, vector<2048x128xbf16>
    %cst_14 = arith.constant dense<0.000000e+00> : vector<16x128xf32>
    %14 = tpu.matmul %12, %13, %cst_14 {dimension_numbers = #tpu.dot_dimension_numbers<[1], [0], [0], [1], [0, 0, 1, 1], [], []>} : vector<16x2048xbf16>, vector<2048x128xbf16>, vector<16x128xf32> -> vector<16x128xf32>
    %15 = vector.broadcast %3 : vector<1x128xf32> to vector<16x128xf32>
    %16 = arith.addf %14, %15 : vector<16x128xf32>
    %17 = arith.addf %16, %0 : vector<16x128xf32>
    %cst_15 = arith.constant dense<0.000000e+00> : vector<16xf32>
    %18 = vector.multi_reduction <add>, %17, %cst_15 [1] : vector<16x128xf32> to vector<16xf32>
    %19 = vector.shape_cast %18 : vector<16xf32> to vector<16x1xf32>
    %cst_16 = arith.constant 1.280000e+02 : f32
    %20 = vector.broadcast %cst_16 : f32 to vector<16x1xf32>
    %21 = arith.divf %19, %20 : vector<16x1xf32>
    %22 = vector.broadcast %21 : vector<16x1xf32> to vector<16x128xf32>
    %23 = arith.subf %17, %22 : vector<16x128xf32>
    %24 = arith.mulf %23, %23 : vector<16x128xf32>
    %cst_17 = arith.constant dense<0.000000e+00> : vector<16xf32>
    %25 = vector.multi_reduction <add>, %24, %cst_17 [1] : vector<16x128xf32> to vector<16xf32>
    %26 = vector.shape_cast %25 : vector<16xf32> to vector<16x1xf32>
    %cst_18 = arith.constant 1.280000e+02 : f32
    %27 = vector.broadcast %cst_18 : f32 to vector<16x1xf32>
    %28 = arith.divf %26, %27 : vector<16x1xf32>
    %cst_19 = arith.constant 9.99999974E-6 : f32
    %29 = vector.broadcast %cst_19 : f32 to vector<16x1xf32>
    %30 = arith.addf %28, %29 : vector<16x1xf32>
    %31 = math.rsqrt %30 : vector<16x1xf32>
    %32 = vector.broadcast %31 : vector<16x1xf32> to vector<16x128xf32>
    %33 = arith.mulf %23, %32 : vector<16x128xf32>
    %34 = vector.broadcast %4 : vector<1x128xf32> to vector<16x128xf32>
    %35 = arith.mulf %33, %34 : vector<16x128xf32>
    %36 = vector.broadcast %5 : vector<1x128xf32> to vector<16x128xf32>
    %37 = arith.addf %35, %36 : vector<16x128xf32>
    %c0_20 = arith.constant 0 : index
    %c0_21 = arith.constant 0 : index
    %38 = vector.load %arg8[%c0_20, %c0_21] : memref<16x128xf32, #tpu.memory_space<vmem>>, vector<16x128xf32>
    tpu.vector_store %arg8[%c0_20, %c0_21], %37 {strides = array<i32>} : memref<16x128xf32, #tpu.memory_space<vmem>>, vector<16x128xf32>,
    return
  }
  func.func @transform_0(%arg0: i32) -> (i32, i32) {
    %c0_i32 = arith.constant 0 : i32
    %c0_i32_0 = arith.constant 0 : i32
    return %arg0, %c0_i32 : i32, i32
  }
  func.func @transform_1(%arg0: i32) -> (i32, i32) {
    %c0_i32 = arith.constant 0 : i32
    %c0_i32_0 = arith.constant 0 : i32
    %c0_i32_1 = arith.constant 0 : i32
    return %c0_i32, %c0_i32_0 : i32, i32
  }
  func.func @transform_2(%arg0: i32) -> (i32, i32) {
    %c0_i32 = arith.constant 0 : i32
    %c0_i32_0 = arith.constant 0 : i32
    %c0_i32_1 = arith.constant 0 : i32
    return %c0_i32, %c0_i32_0 : i32, i32
  }
  func.func @transform_3(%arg0: i32) -> (i32, i32) {
    %c0_i32 = arith.constant 0 : i32
    %c0_i32_0 = arith.constant 0 : i32
    %c0_i32_1 = arith.constant 0 : i32
    return %c0_i32, %c0_i32_0 : i32, i32
  }
  func.func @transform_4(%arg0: i32) -> (i32, i32) {
    %c0_i32 = arith.constant 0 : i32
    %c0_i32_0 = arith.constant 0 : i32
    %c0_i32_1 = arith.constant 0 : i32
    return %c0_i32, %c0_i32_0 : i32, i32
  }
  func.func @transform_5(%arg0: i32) -> (i32, i32) {
    %c0_i32 = arith.constant 0 : i32
    %c0_i32_0 = arith.constant 0 : i32
    %c0_i32_1 = arith.constant 0 : i32
    return %c0_i32, %c0_i32_0 : i32, i32
  }
  func.func @transform_6(%arg0: i32) -> (i32, i32) {
    %c0_i32 = arith.constant 0 : i32
    %c0_i32_0 = arith.constant 0 : i32
    %c0_i32_1 = arith.constant 0 : i32
    return %c0_i32, %c0_i32_0 : i32, i32
  }
  func.func @transform_7(%arg0: i32) -> (i32, i32) {
    %c0_i32 = arith.constant 0 : i32
    %c0_i32_0 = arith.constant 0 : i32
    return %arg0, %c0_i32 : i32, i32
  }
}

</mosaic_0001>

<bundles_post_ra>
// kernel: poswise_ffn.1
= control target key start
LH: loop header
LB: loop body
LE: loop exit
PB: predicated region body
PF: predicated region fallthrough
CT: control target
= control target key end

     0   :  { %v3292_v8 = vmov 0   ;;  %s4223_s0 = inlined_call_operand.vmem [shape: f32[16,128], index: 0, kind: input, shape index: {}]   ;;  %s4224_s1 = inlined_call_operand.vmem [shape: bf16[128,2048], index: 1, kind: input, shape index: {}]   ;;  %s4225_s2 = inlined_call_operand.vmem [shape: f32[1,2048], index: 2, kind: input, shape index: {}]   ;;  %s4226_s3 = inlined_call_operand.vmem [shape: bf16[2048,128], index: 3, kind: input, shape index: {}]   ;;  %s4227_s4 = inlined_call_operand.vmem [shape: f32[1,128], index: 4, kind: input, shape index: {}]   ;;  %s4228_s5 = inlined_call_operand.vmem [shape: f32[1,128], index: 5, kind: input, shape index: {}]   ;;  %s4229_s6 = inlined_call_operand.vmem [shape: f32[1,128], index: 6, kind: input, shape index: {}]   ;;  %s4230_s7 = inlined_call_operand.hbm [shape: f32[16,128], index: 7, kind: output, shape index: {}]  }
   0x1   :  { %v36_v0 = vld [vmem:[%s4224_s1] sm:$0xff]  ;;  %v37_v2 = vld [vmem:[%s4224_s1 + $0x8] sm:$0xff]  ;;  %918 = vmatprep.mubr.bf16.mxu0 %v3292_v8  ;;  %961 = vmatprep.mubr.bf16.mxu1 %v3292_v8  ;;  %v38_v63 = vld [vmem:[%s4224_s1 + $0x10] sm:$0xff] }
   0x2   :  { %v44_v1 = vld [vmem:[%s4224_s1 + $0x40] sm:$0xff]  ;;  %v45_v4 = vld [vmem:[%s4224_s1 + $0x48] sm:$0xff] }
   0x3   :  { %v2696_v3 = vcombine.high %v36_v0, %v44_v1  ;;  %v2695_v5 = vcombine.low %v36_v0, %v44_v1  ;;  %v52_v6 = vld [vmem:[%s4224_s1 + $0x80] sm:$0xff]  ;;  %v2698_v9 = vcombine.high %v37_v2, %v45_v4  ;;  %v2697_v10 = vcombine.low %v37_v2, %v45_v4  ;;  %v53_v12 = vld [vmem:[%s4224_s1 + $0x88] sm:$0xff]  ;;  %v46_v0 = vld [vmem:[%s4224_s1 + $0x50] sm:$0xff] }
   0x4   :  { %v60_v7 = vld [vmem:[%s4224_s1 + $0xc0] sm:$0xff]  ;;  %v61_v13 = vld [vmem:[%s4224_s1 + $0xc8] sm:$0xff]  ;;  %v39_v1 = vld [vmem:[%s4224_s1 + $0x18] sm:$0xff] }
   0x5   :  { %v2712_v11 = vcombine.high %v52_v6, %v60_v7  ;;  %v68_v14 = vld [vmem:[%s4224_s1 + $0x100] sm:$0xff]  ;;  %886 = vmatprep.subr.bf16.mxu0 %v2696_v3  ;;  %v2714_v15 = vcombine.high %v53_v12, %v61_v13  ;;  %v69_v17 = vld [vmem:[%s4224_s1 + $0x108] sm:$0xff]  ;;  %929 = vmatprep.subr.bf16.mxu1 %v2698_v9  ;;  %v2711_v19 = vcombine.low %v52_v6, %v60_v7  ;;  %v47_v2 = vld [vmem:[%s4224_s1 + $0x58] sm:$0xff] }
   0x6   :  { %v76_v16 = vld [vmem:[%s4224_s1 + $0x140] sm:$0xff]  ;;  %v77_v18 = vld [vmem:[%s4224_s1 + $0x148] sm:$0xff]  ;;  %887 = vmatpush1.bf16.msra.mxu0 %v2695_v5  ;;  %930 = vmatpush1.bf16.msra.mxu1 %v2697_v10  ;;  %v2713_v20 = vcombine.low %v53_v12, %v61_v13  ;;  %v2700_v7 = vcombine.high %v38_v63, %v46_v0  ;;  %v2702_v9 = vcombine.high %v39_v1, %v47_v2  ;;  %v54_v10 = vld [vmem:[%s4224_s1 + $0x90] sm:$0xff] }
   0x7   :  { %888 = vmatprep.subr.bf16.mxu0 %v2712_v11  ;;  %v2728_v21 = vcombine.high %v68_v14, %v76_v16  ;;  %931 = vmatprep.subr.bf16.mxu1 %v2714_v15  ;;  %v2730_v22 = vcombine.high %v69_v17, %v77_v18  ;;  %v84_v23 = vld [vmem:[%s4224_s1 + $0x180] sm:$0xff]  ;;  %v85_v25 = vld [vmem:[%s4224_s1 + $0x188] sm:$0xff]  ;;  %v2727_v27 = vcombine.low %v68_v14, %v76_v16  ;;  %v62_v11 = vld [vmem:[%s4224_s1 + $0xd0] sm:$0xff] }
   0x8   :  { %v92_v24 = vld [vmem:[%s4224_s1 + $0x1c0] sm:$0xff]  ;;  %v93_v26 = vld [vmem:[%s4224_s1 + $0x1c8] sm:$0xff]  ;;  %v2729_v28 = vcombine.low %v69_v17, %v77_v18  ;;  %v55_v13 = vld [vmem:[%s4224_s1 + $0x98] sm:$0xff]  ;;  %v2699_v15 = vcombine.low %v38_v63, %v46_v0  ;;  %v2701_v16 = vcombine.low %v39_v1, %v47_v2  ;;  %v2716_v17 = vcombine.high %v54_v10, %v62_v11 }
   0x9   :  { %v2744_v29 = vcombine.high %v84_v23, %v92_v24  ;;  %v2746_v30 = vcombine.high %v85_v25, %v93_v26  ;;  %v100_v31 = vld [vmem:[%s4224_s1 + $0x200] sm:$0xff]  ;;  %v101_v33 = vld [vmem:[%s4224_s1 + $0x208] sm:$0xff]  ;;  %v2743_v35 = vcombine.low %v84_v23, %v92_v24  ;;  %v2745_v36 = vcombine.low %v85_v25, %v93_v26  ;;  %v63_v14 = vld [vmem:[%s4224_s1 + $0xd8] sm:$0xff] }
   0xa   :  { %889 = vmatpush1.bf16.msra.mxu0 %v2711_v19  ;;  %932 = vmatpush1.bf16.msra.mxu1 %v2713_v20  ;;  %v108_v32 = vld [vmem:[%s4224_s1 + $0x240] sm:$0xff]  ;;  %v109_v34 = vld [vmem:[%s4224_s1 + $0x248] sm:$0xff]  ;;  %v2718_v18 = vcombine.high %v55_v13, %v63_v14  ;;  %v70_v19 = vld [vmem:[%s4224_s1 + $0x110] sm:$0xff]  ;;  %v2715_v23 = vcombine.low %v54_v10, %v62_v11  ;;  %v2717_v24 = vcombine.low %v55_v13, %v63_v14 }
   0xb   :  { %890 = vmatprep.subr.bf16.mxu0 %v2728_v21  ;;  %933 = vmatprep.subr.bf16.mxu1 %v2730_v22  ;;  %v2760_v37 = vcombine.high %v100_v31, %v108_v32  ;;  %v2762_v38 = vcombine.high %v101_v33, %v109_v34  ;;  %v116_v39 = vld [vmem:[%s4224_s1 + $0x280] sm:$0xff]  ;;  %v117_v41 = vld [vmem:[%s4224_s1 + $0x288] sm:$0xff]  ;;  %v2759_v43 = vcombine.low %v100_v31, %v108_v32  ;;  %v78_v20 = vld [vmem:[%s4224_s1 + $0x150] sm:$0xff] }
   0xc   :  { %v124_v40 = vld [vmem:[%s4224_s1 + $0x2c0] sm:$0xff]  ;;  %v125_v42 = vld [vmem:[%s4224_s1 + $0x2c8] sm:$0xff]  ;;  %v2761_v44 = vcombine.low %v101_v33, %v109_v34  ;;  %v71_v21 = vld [vmem:[%s4224_s1 + $0x118] sm:$0xff]  ;;  %v2732_v25 = vcombine.high %v70_v19, %v78_v20  ;;  %v2731_v31 = vcombine.low %v70_v19, %v78_v20 }
   0xd   :  { %v2776_v45 = vcombine.high %v116_v39, %v124_v40  ;;  %v2778_v46 = vcombine.high %v117_v41, %v125_v42  ;;  %v132_v47 = vld [vmem:[%s4224_s1 + $0x300] sm:$0xff]  ;;  %v133_v49 = vld [vmem:[%s4224_s1 + $0x308] sm:$0xff]  ;;  %v2775_v51 = vcombine.low %v116_v39, %v124_v40  ;;  %v2777_v52 = vcombine.low %v117_v41, %v125_v42  ;;  %v79_v22 = vld [vmem:[%s4224_s1 + $0x158] sm:$0xff] }
   0xe   :  { %891 = vmatpush1.bf16.msra.mxu0 %v2727_v27  ;;  %934 = vmatpush1.bf16.msra.mxu1 %v2729_v28  ;;  %v140_v48 = vld [vmem:[%s4224_s1 + $0x340] sm:$0xff]  ;;  %v141_v50 = vld [vmem:[%s4224_s1 + $0x348] sm:$0xff]  ;;  %v2734_v26 = vcombine.high %v71_v21, %v79_v22  ;;  %v86_v27 = vld [vmem:[%s4224_s1 + $0x190] sm:$0xff]  ;;  %v2733_v32 = vcombine.low %v71_v21, %v79_v22 }
   0xf   :  { %892 = vmatprep.subr.bf16.mxu0 %v2744_v29  ;;  %935 = vmatprep.subr.bf16.mxu1 %v2746_v30  ;;  %v2792_v53 = vcombine.high %v132_v47, %v140_v48  ;;  %v2794_v54 = vcombine.high %v133_v49, %v141_v50  ;;  %v148_v55 = vld [vmem:[%s4224_s1 + $0x380] sm:$0xff]  ;;  %v149_v57 = vld [vmem:[%s4224_s1 + $0x388] sm:$0xff]  ;;  %v2791_v59 = vcombine.low %v132_v47, %v140_v48  ;;  %v94_v28 = vld [vmem:[%s4224_s1 + $0x1d0] sm:$0xff] }
  0x10   :  { %v156_v56 = vld [vmem:[%s4224_s1 + $0x3c0] sm:$0xff]  ;;  %v157_v58 = vld [vmem:[%s4224_s1 + $0x3c8] sm:$0xff]  ;;  %v2793_v60 = vcombine.low %v133_v49, %v141_v50  ;;  %v87_v29 = vld [vmem:[%s4224_s1 + $0x198] sm:$0xff]  ;;  %v2748_v33 = vcombine.high %v86_v27, %v94_v28  ;;  %v2747_v39 = vcombine.low %v86_v27, %v94_v28 }
  0x11   :  { %v2808_v61 = vcombine.high %v148_v55, %v156_v56  ;;  %v2810_v62 = vcombine.high %v149_v57, %v157_v58  ;;  %v2807_v3 = vcombine.low %v148_v55, %v156_v56  ;;  %v28_v4 = vld [vmem:[%s4223_s0] sm:$0xff]  ;;  %v29_v5 = vld [vmem:[%s4223_s0 + $0x8] sm:$0xff]  ;;  %v2809_v6 = vcombine.low %v149_v57, %v157_v58  ;;  %v95_v30 = vld [vmem:[%s4224_s1 + $0x1d8] sm:$0xff] }
  0x12   :  { %893 = vmatpush1.bf16.msra.mxu0 %v2743_v35  ;;  %936 = vmatpush1.bf16.msra.mxu1 %v2745_v36  ;;  %v3458_v12 = vpack.c.bf16 %v29_v5, %v28_v4  ;;  %v2750_v34 = vcombine.high %v87_v29, %v95_v30  ;;  %v102_v35 = vld [vmem:[%s4224_s1 + $0x210] sm:$0xff]  ;;  %v2749_v41 = vcombine.low %v87_v29, %v95_v30  ;;  %v40_v0 = vld [vmem:[%s4224_s1 + $0x20] sm:$0xff]  ;;  %v41_v5 = vld [vmem:[%s4224_s1 + $0x28] sm:$0xff] }
  0x13   :  { %894 = vmatprep.subr.bf16.mxu0 %v2760_v37  ;;  %937 = vmatprep.subr.bf16.mxu1 %v2762_v38  ;;  %v110_v36 = vld [vmem:[%s4224_s1 + $0x250] sm:$0xff]  ;;  %v103_v37 = vld [vmem:[%s4224_s1 + $0x218] sm:$0xff]  ;;  %v64_v13 = vld [vmem:[%s4224_s1 + $0xe0] sm:$0xff] }
  0x14   :  { %v111_v38 = vld [vmem:[%s4224_s1 + $0x258] sm:$0xff]  ;;  %v118_v40 = vld [vmem:[%s4224_s1 + $0x290] sm:$0xff]  ;;  %v2764_v42 = vcombine.high %v102_v35, %v110_v36  ;;  %v2763_v47 = vcombine.low %v102_v35, %v110_v36  ;;  %v80_v19 = vld [vmem:[%s4224_s1 + $0x160] sm:$0xff] }
  0x15   :  { %v134_v48 = vld [vmem:[%s4224_s1 + $0x310] sm:$0xff]  ;;  %v2765_v49 = vcombine.low %v103_v37, %v111_v38  ;;  %v73_v22 = vld [vmem:[%s4224_s1 + $0x128] sm:$0xff]  ;;  %v96_v27 = vld [vmem:[%s4224_s1 + $0x1e0] sm:$0xff] }
  0x16   :  { %895 = vmatpush1.bf16.msra.mxu0 %v2759_v43  ;;  %938 = vmatpush1.bf16.msra.mxu1 %v2761_v44  ;;  %v126_v43 = vld [vmem:[%s4224_s1 + $0x2d0] sm:$0xff]  ;;  %v2766_v44 = vcombine.high %v103_v37, %v111_v38  ;;  %v89_v30 = vld [vmem:[%s4224_s1 + $0x1a8] sm:$0xff]  ;;  %v112_v35 = vld [vmem:[%s4224_s1 + $0x260] sm:$0xff] }
  0x17   :  { %896 = vmatprep.subr.bf16.mxu0 %v2776_v45  ;;  %939 = vmatprep.subr.bf16.mxu1 %v2778_v46  ;;  %v119_v45 = vld [vmem:[%s4224_s1 + $0x298] sm:$0xff]  ;;  %v2780_v50 = vcombine.high %v118_v40, %v126_v43  ;;  %v2779_v55 = vcombine.low %v118_v40, %v126_v43  ;;  %v150_v56 = vld [vmem:[%s4224_s1 + $0x390] sm:$0xff]  ;;  %v105_v38 = vld [vmem:[%s4224_s1 + $0x228] sm:$0xff] }
  0x18   :  { %v127_v46 = vld [vmem:[%s4224_s1 + $0x2d8] sm:$0xff]  ;;  %v128_v43 = vld [vmem:[%s4224_s1 + $0x2e0] sm:$0xff] }
  0x19   :  { %v2781_v57 = vcombine.low %v119_v45, %v127_v46 }
  0x1a   :  { %897 = vmatpush1.bf16.msra.mxu0 %v2775_v51  ;;  %940 = vmatpush1.bf16.msra.mxu1 %v2777_v52  ;;  %v142_v51 = vld [vmem:[%s4224_s1 + $0x350] sm:$0xff]  ;;  %v2782_v52 = vcombine.high %v119_v45, %v127_v46  ;;  %v121_v46 = vld [vmem:[%s4224_s1 + $0x2a8] sm:$0xff] }
  0x1b   :  { %898 = vmatprep.subr.bf16.mxu0 %v2792_v53  ;;  %941 = vmatprep.subr.bf16.mxu1 %v2794_v54  ;;  %v135_v53 = vld [vmem:[%s4224_s1 + $0x318] sm:$0xff]  ;;  %v2796_v58 = vcombine.high %v134_v48, %v142_v51  ;;  %v2795_v63 = vcombine.low %v134_v48, %v142_v51  ;;  %v144_v51 = vld [vmem:[%s4224_s1 + $0x360] sm:$0xff] }
  0x1c   :  { %v143_v54 = vld [vmem:[%s4224_s1 + $0x358] sm:$0xff] }
  0x1d   :  { %v2797_v1 = vcombine.low %v135_v53, %v143_v54 }
  0x1e   :  { %899 = vmatpush1.bf16.msra.mxu0 %v2791_v59  ;;  %942 = vmatpush1.bf16.msra.mxu1 %v2793_v60  ;;  %v158_v59 = vld [vmem:[%s4224_s1 + $0x3d0] sm:$0xff]  ;;  %v2798_v60 = vcombine.high %v135_v53, %v143_v54  ;;  %v137_v54 = vld [vmem:[%s4224_s1 + $0x328] sm:$0xff] }
  0x1f   :  { %900 = vmatprep.subr.bf16.mxu0 %v2808_v61  ;;  %943 = vmatprep.subr.bf16.mxu1 %v2810_v62  ;;  %v151_v61 = vld [vmem:[%s4224_s1 + $0x398] sm:$0xff]  ;;  %v2812_v2 = vcombine.high %v150_v56, %v158_v59 }
  0x20   :  { %v159_v62 = vld [vmem:[%s4224_s1 + $0x3d8] sm:$0xff] }
  0x21   :  { %v2814_v4 = vcombine.high %v151_v61, %v159_v62  ;;  %v2813_v10 = vcombine.low %v151_v61, %v159_v62  ;;  %v153_v62 = vld [vmem:[%s4224_s1 + $0x3a8] sm:$0xff] }
  0x22   :  { %901 = vmatpush1.bf16.msra.mxu0 %v2807_v3  ;;  %944 = vmatpush1.bf16.msra.mxu1 %v2809_v6  ;;  %v48_v3 = vld [vmem:[%s4224_s1 + $0x60] sm:$0xff]  ;;  %v49_v6 = vld [vmem:[%s4224_s1 + $0x68] sm:$0xff] }
  0x23   :  { %972 = vmatprep.subr.bf16.mxu0 %v2700_v7  ;;  %1015 = vmatprep.subr.bf16.mxu1 %v2702_v9  ;;  %v2811_v7 = vcombine.low %v150_v56, %v158_v59  ;;  %v56_v9 = vld [vmem:[%s4224_s1 + $0xa0] sm:$0xff]  ;;  %v2704_v11 = vcombine.high %v40_v0, %v48_v3  ;;  %v2706_v14 = vcombine.high %v41_v5, %v49_v6 }
  0x24   :  { %v2705_v20 = vcombine.low %v41_v5, %v49_v6  ;;  %v2720_v21 = vcombine.high %v56_v9, %v64_v13  ;;  %v160_v59 = vld [vmem:[%s4224_s1 + $0x3e0] sm:$0xff]  ;;  %v43_v6 = vld [vmem:[%s4224_s1 + $0x38] sm:$0xff] }
  0x25   :  { %919 = vmatmul.mubr.bf16.vlgmr.msra.gmra.mrb[0].mxu0 %v3458_v12  ;;  %962 = vmatmul.mubr.bf16.vlgmr.msra.gmra.mrb[0].mxu1 %v3458_v12 }
  0x26   :  { %973 = vmatpush1.bf16.msra.mxu0 %v2699_v15  ;;  %1016 = vmatpush1.bf16.msra.mxu1 %v2701_v16  ;;  %v57_v15 = vld [vmem:[%s4224_s1 + $0xa8] sm:$0xff] }
  0x27   :  { %974 = vmatprep.subr.bf16.mxu0 %v2716_v17  ;;  %1017 = vmatprep.subr.bf16.mxu1 %v2718_v18  ;;  %v65_v16 = vld [vmem:[%s4224_s1 + $0xe8] sm:$0xff]  ;;  %v2703_v17 = vcombine.low %v40_v0, %v48_v3  ;;  %v72_v18 = vld [vmem:[%s4224_s1 + $0x120] sm:$0xff]  ;;  %v50_v3 = vld [vmem:[%s4224_s1 + $0x70] sm:$0xff] }
  0x28   :  { %1004 = vmatprep.mubr.bf16.mxu0 %v3292_v8  ;;  %1047 = vmatprep.mubr.bf16.mxu1 %v3292_v8  ;;  %v2721_v28 = vcombine.low %v57_v15, %v65_v16  ;;  %v2736_v29 = vcombine.high %v72_v18, %v80_v19 }
  0x2a   :  { %975 = vmatpush1.bf16.msra.mxu0 %v2715_v23  ;;  %1018 = vmatpush1.bf16.msra.mxu1 %v2717_v24  ;;  %v81_v23 = vld [vmem:[%s4224_s1 + $0x168] sm:$0xff]  ;;  %v2722_v24 = vcombine.high %v57_v15, %v65_v16  ;;  %v59_v16 = vld [vmem:[%s4224_s1 + $0xb8] sm:$0xff] }
  0x2b   :  { %976 = vmatprep.subr.bf16.mxu0 %v2732_v25  ;;  %1019 = vmatprep.subr.bf16.mxu1 %v2734_v26  ;;  %v2719_v25 = vcombine.low %v56_v9, %v64_v13  ;;  %v88_v26 = vld [vmem:[%s4224_s1 + $0x1a0] sm:$0xff]  ;;  %v2737_v36 = vcombine.low %v73_v22, %v81_v23  ;;  %v66_v13 = vld [vmem:[%s4224_s1 + $0xf0] sm:$0xff] }
  0x2c   :  { %v2752_v37 = vcombine.high %v88_v26, %v96_v27 }
  0x2e   :  { %977 = vmatpush1.bf16.msra.mxu0 %v2731_v31  ;;  %1020 = vmatpush1.bf16.msra.mxu1 %v2733_v32  ;;  %v97_v31 = vld [vmem:[%s4224_s1 + $0x1e8] sm:$0xff]  ;;  %v2738_v32 = vcombine.high %v73_v22, %v81_v23 }
  0x2f   :  { %978 = vmatprep.subr.bf16.mxu0 %v2748_v33  ;;  %1021 = vmatprep.subr.bf16.mxu1 %v2750_v34  ;;  %v2735_v33 = vcombine.low %v72_v18, %v80_v19  ;;  %v104_v34 = vld [vmem:[%s4224_s1 + $0x220] sm:$0xff]  ;;  %v2754_v40 = vcombine.high %v89_v30, %v97_v31 }
  0x30   :  { %v2768_v45 = vcombine.high %v104_v34, %v112_v35 }
  0x32   :  { %979 = vmatpush1.bf16.msra.mxu0 %v2747_v39  ;;  %1022 = vmatpush1.bf16.msra.mxu1 %v2749_v41  ;;  %v113_v39 = vld [vmem:[%s4224_s1 + $0x268] sm:$0xff]  ;;  %v2751_v41 = vcombine.low %v88_v26, %v96_v27 }
  0x33   :  { %980 = vmatprep.subr.bf16.mxu0 %v2764_v42  ;;  %1023 = vmatprep.subr.bf16.mxu1 %v2766_v44  ;;  %v120_v42 = vld [vmem:[%s4224_s1 + $0x2a0] sm:$0xff]  ;;  %v2753_v44 = vcombine.low %v89_v30, %v97_v31  ;;  %v2770_v48 = vcombine.high %v105_v38, %v113_v39 }
  0x34   :  { %v2784_v53 = vcombine.high %v120_v42, %v128_v43 }
  0x36   :  { %981 = vmatpush1.bf16.msra.mxu0 %v2763_v47  ;;  %1024 = vmatpush1.bf16.msra.mxu1 %v2765_v49  ;;  %v129_v47 = vld [vmem:[%s4224_s1 + $0x2e8] sm:$0xff]  ;;  %v2767_v49 = vcombine.low %v104_v34, %v112_v35 }
  0x37   :  { %982 = vmatprep.subr.bf16.mxu0 %v2780_v50  ;;  %1025 = vmatprep.subr.bf16.mxu1 %v2782_v52  ;;  %v136_v50 = vld [vmem:[%s4224_s1 + $0x320] sm:$0xff]  ;;  %v2769_v52 = vcombine.low %v105_v38, %v113_v39  ;;  %v2786_v56 = vcombine.high %v121_v46, %v129_v47 }
  0x38   :  { %v2800_v61 = vcombine.high %v136_v50, %v144_v51 }
  0x3a   :  { %983 = vmatpush1.bf16.msra.mxu0 %v2779_v55  ;;  %1026 = vmatpush1.bf16.msra.mxu1 %v2781_v57  ;;  %v145_v55 = vld [vmem:[%s4224_s1 + $0x368] sm:$0xff]  ;;  %v2783_v57 = vcombine.low %v120_v42, %v128_v43  ;;  %v122_v43 = vld [vmem:[%s4224_s1 + $0x2b0] sm:$0xff] }
  0x3b   :  { %984 = vmatprep.subr.bf16.mxu0 %v2796_v58  ;;  %1027 = vmatprep.subr.bf16.mxu1 %v2798_v60  ;;  %v152_v58 = vld [vmem:[%s4224_s1 + $0x3a0] sm:$0xff]  ;;  %v2785_v60 = vcombine.low %v121_v46, %v129_v47  ;;  %v2802_v0 = vcombine.high %v137_v54, %v145_v55  ;;  %v123_v47 = vld [vmem:[%s4224_s1 + $0x2b8] sm:$0xff] }
  0x3c   :  { %v2816_v5 = vcombine.high %v152_v58, %v160_v59 }
  0x3e   :  { %985 = vmatpush1.bf16.msra.mxu0 %v2795_v63  ;;  %1028 = vmatpush1.bf16.msra.mxu1 %v2797_v1  ;;  %v161_v63 = vld [vmem:[%s4224_s1 + $0x3e8] sm:$0xff]  ;;  %v2799_v1 = vcombine.low %v136_v50, %v144_v51  ;;  %v138_v51 = vld [vmem:[%s4224_s1 + $0x330] sm:$0xff] }
  0x3f   :  { %986 = vmatprep.subr.bf16.mxu0 %v2812_v2  ;;  %1029 = vmatprep.subr.bf16.mxu1 %v2814_v4  ;;  %v42_v2 = vld [vmem:[%s4224_s1 + $0x30] sm:$0xff]  ;;  %v2801_v4 = vcombine.low %v137_v54, %v145_v55  ;;  %v2818_v9 = vcombine.high %v153_v62, %v161_v63  ;;  %v139_v55 = vld [vmem:[%s4224_s1 + $0x338] sm:$0xff] }
  0x40   :  { %v2708_v15 = vcombine.high %v42_v2, %v50_v3  ;;  %v2707_v19 = vcombine.low %v42_v2, %v50_v3 }
  0x42   :  { %987 = vmatpush1.bf16.msra.mxu0 %v2811_v7  ;;  %1030 = vmatpush1.bf16.msra.mxu1 %v2813_v10  ;;  %v51_v7 = vld [vmem:[%s4224_s1 + $0x78] sm:$0xff]  ;;  %v2815_v10 = vcombine.low %v152_v58, %v160_v59  ;;  %v154_v59 = vld [vmem:[%s4224_s1 + $0x3b0] sm:$0xff] }
  0x43   :  { %1058 = vmatprep.subr.bf16.mxu0 %v2704_v11  ;;  %1101 = vmatprep.subr.bf16.mxu1 %v2706_v14  ;;  %v58_v11 = vld [vmem:[%s4224_s1 + $0xb0] sm:$0xff]  ;;  %v2817_v14 = vcombine.low %v153_v62, %v161_v63  ;;  %v2710_v18 = vcombine.high %v43_v6, %v51_v7  ;;  %v2709_v22 = vcombine.low %v43_v6, %v51_v7  ;;  %v155_v63 = vld [vmem:[%s4224_s1 + $0x3b8] sm:$0xff] }
  0x44   :  { %v2724_v23 = vcombine.high %v58_v11, %v66_v13  ;;  %v2723_v27 = vcombine.low %v58_v11, %v66_v13  ;;  %v162_v62 = vld [vmem:[%s4224_s1 + $0x3f0] sm:$0xff]  ;;  %v3136_v11 = vld [vmem:[%s4226_s3] sm:$0xff]  }
  0x45   :  { %1005 = vmatmul.mubr.bf16.vlgmr.msra.gmra.mrb[4].mxu0 %v3458_v12  ;;  %1048 = vmatmul.mubr.bf16.vlgmr.msra.gmra.mrb[4].mxu1 %v3458_v12  ;;  %v2819_v6 = vcombine.low %v154_v59, %v162_v62  ;;  %v3137_v13 = vld [vmem:[%s4226_s3 + $0x80] sm:$0xff]  }
  0x46   :  { %1059 = vmatpush1.bf16.msra.mxu0 %v2703_v17  ;;  %1102 = vmatpush1.bf16.msra.mxu1 %v2705_v20  ;;  %v67_v17 = vld [vmem:[%s4224_s1 + $0xf8] sm:$0xff]  ;;  %v74_v20 = vld [vmem:[%s4224_s1 + $0x130] sm:$0xff] }
  0x47   :  { %1060 = vmatprep.subr.bf16.mxu0 %v2720_v21  ;;  %1103 = vmatprep.subr.bf16.mxu1 %v2722_v24  ;;  %v82_v21 = vld [vmem:[%s4224_s1 + $0x170] sm:$0xff]  ;;  %v75_v24 = vld [vmem:[%s4224_s1 + $0x138] sm:$0xff]  ;;  %v2726_v26 = vcombine.high %v59_v16, %v67_v17  ;;  %v2725_v30 = vcombine.low %v59_v16, %v67_v17  ;;  %v3140_v16 = vld [vmem:[%s4226_s3 + $0x8] sm:$0xff]  }
  0x48   :  { %1090 = vmatprep.mubr.bf16.mxu0 %v3292_v8  ;;  %1133 = vmatprep.mubr.bf16.mxu1 %v3292_v8  ;;  %v2740_v31 = vcombine.high %v74_v20, %v82_v21  ;;  %v2739_v35 = vcombine.low %v74_v20, %v82_v21  ;;  %v3141_v17 = vld [vmem:[%s4226_s3 + $0x88] sm:$0xff]   ;;  %v3144_v20 = vld [vmem:[%s4226_s3 + $0x10] sm:$0xff]   ;;  %v3146_v21 = vld [vmem:[%s4226_s3 + $0x58] sm:$0xff]  }
  0x4a   :  { %1061 = vmatpush1.bf16.msra.mxu0 %v2719_v25  ;;  %1104 = vmatpush1.bf16.msra.mxu1 %v2721_v28  ;;  %v83_v25 = vld [vmem:[%s4224_s1 + $0x178] sm:$0xff]  ;;  %v90_v28 = vld [vmem:[%s4224_s1 + $0x1b0] sm:$0xff] }
  0x4b   :  { %1062 = vmatprep.subr.bf16.mxu0 %v2736_v29  ;;  %1105 = vmatprep.subr.bf16.mxu1 %v2738_v32  ;;  %v98_v29 = vld [vmem:[%s4224_s1 + $0x1f0] sm:$0xff]  ;;  %v91_v32 = vld [vmem:[%s4224_s1 + $0x1b8] sm:$0xff]  ;;  %v2742_v34 = vcombine.high %v75_v24, %v83_v25  ;;  %v2741_v38 = vcombine.low %v75_v24, %v83_v25  ;;  %v3150_v25 = vld [vmem:[%s4226_s3 + $0x60] sm:$0xff]  }
  0x4c   :  { %v2756_v39 = vcombine.high %v90_v28, %v98_v29  ;;  %v2755_v42 = vcombine.low %v90_v28, %v98_v29  ;;  %v3149_v24 = vld [vmem:[%s4226_s3 + $0x98] sm:$0xff]   ;;  %v3153_v28 = vld [vmem:[%s4226_s3 + $0xa0] sm:$0xff]   ;;  %v3154_v29 = vld [vmem:[%s4226_s3 + $0x68] sm:$0xff]  }
  0x4e   :  { %1063 = vmatpush1.bf16.msra.mxu0 %v2735_v33  ;;  %1106 = vmatpush1.bf16.msra.mxu1 %v2737_v36  ;;  %v99_v33 = vld [vmem:[%s4224_s1 + $0x1f8] sm:$0xff]  ;;  %v106_v36 = vld [vmem:[%s4224_s1 + $0x230] sm:$0xff] }
  0x4f   :  { %1064 = vmatprep.subr.bf16.mxu0 %v2752_v37  ;;  %1107 = vmatprep.subr.bf16.mxu1 %v2754_v40  ;;  %v114_v37 = vld [vmem:[%s4224_s1 + $0x270] sm:$0xff]  ;;  %v107_v40 = vld [vmem:[%s4224_s1 + $0x238] sm:$0xff] }
  0x50   :  { %v2772_v46 = vcombine.high %v106_v36, %v114_v37  ;;  %v2771_v50 = vcombine.low %v106_v36, %v114_v37 }
  0x52   :  { %1065 = vmatpush1.bf16.msra.mxu0 %v2751_v41  ;;  %1108 = vmatpush1.bf16.msra.mxu1 %v2753_v44  ;;  %v2758_v41 = vcombine.high %v91_v32, %v99_v33  ;;  %v130_v44 = vld [vmem:[%s4224_s1 + $0x2f0] sm:$0xff] }
  0x53   :  { %1066 = vmatprep.subr.bf16.mxu0 %v2768_v45  ;;  %1109 = vmatprep.subr.bf16.mxu1 %v2770_v48  ;;  %v2757_v45 = vcombine.low %v91_v32, %v99_v33  ;;  %v131_v48 = vld [vmem:[%s4224_s1 + $0x2f8] sm:$0xff]  ;;  %v2788_v54 = vcombine.high %v122_v43, %v130_v44  ;;  %v2787_v58 = vcombine.low %v122_v43, %v130_v44 }
  0x56   :  { %1067 = vmatpush1.bf16.msra.mxu0 %v2767_v49  ;;  %1110 = vmatpush1.bf16.msra.mxu1 %v2769_v52  ;;  %v146_v52 = vld [vmem:[%s4224_s1 + $0x370] sm:$0xff] }
  0x57   :  { %1068 = vmatprep.subr.bf16.mxu0 %v2784_v53  ;;  %1111 = vmatprep.subr.bf16.mxu1 %v2786_v56  ;;  %v147_v56 = vld [vmem:[%s4224_s1 + $0x378] sm:$0xff]  ;;  %v2803_v2 = vcombine.low %v138_v51, %v146_v52 }
  0x58   :  { %v2805_v3 = vcombine.low %v139_v55, %v147_v56 }
  0x5a   :  { %1069 = vmatpush1.bf16.msra.mxu0 %v2783_v57  ;;  %1112 = vmatpush1.bf16.msra.mxu1 %v2785_v60  ;;  %v2790_v57 = vcombine.high %v123_v47, %v131_v48  ;;  %v2789_v60 = vcombine.low %v123_v47, %v131_v48 }
  0x5b   :  { %1070 = vmatprep.subr.bf16.mxu0 %v2800_v61  ;;  %1113 = vmatprep.subr.bf16.mxu1 %v2802_v0  ;;  %v2804_v61 = vcombine.high %v138_v51, %v146_v52  ;;  %v2806_v0 = vcombine.high %v139_v55, %v147_v56 }
  0x5e   :  { %1071 = vmatpush1.bf16.msra.mxu0 %v2799_v1  ;;  %1114 = vmatpush1.bf16.msra.mxu1 %v2801_v4  ;;  %v163_v1 = vld [vmem:[%s4224_s1 + $0x3f8] sm:$0xff]  ;;  %v2820_v4 = vcombine.high %v154_v59, %v162_v62 }
  0x5f   :  { %1072 = vmatprep.subr.bf16.mxu0 %v2816_v5  ;;  %1115 = vmatprep.subr.bf16.mxu1 %v2818_v9  ;;  %v2822_v5 = vcombine.high %v155_v63, %v163_v1  ;;  %v2821_v7 = vcombine.low %v155_v63, %v163_v1  ;;  %v3134_v9 = vld [vmem:[%s4226_s3 + $0x40] sm:$0xff]  }
  0x62   :  { %1073 = vmatpush1.bf16.msra.mxu0 %v2815_v10  ;;  %1116 = vmatpush1.bf16.msra.mxu1 %v2817_v14  ;;  %v3135_v10 = vld [vmem:[%s4226_s3 + $0xc0] sm:$0xff]   ;;  %v3138_v14 = vld [vmem:[%s4226_s3 + $0x48] sm:$0xff]  }
  0x63   :  { %1144 = vmatprep.subr.bf16.mxu0 %v2708_v15  ;;  %1187 = vmatprep.subr.bf16.mxu1 %v2710_v18  ;;  %v3139_v15 = vld [vmem:[%s4226_s3 + $0xc8] sm:$0xff]   ;;  %v3142_v18 = vld [vmem:[%s4226_s3 + $0x50] sm:$0xff]  }
  0x65   :  { %1091 = vmatmul.mubr.bf16.vlgmr.msra.gmra.mrb[8].mxu0 %v3458_v12  ;;  %1134 = vmatmul.mubr.bf16.vlgmr.msra.gmra.mrb[8].mxu1 %v3458_v12 }
  0x66   :  { %1145 = vmatpush1.bf16.msra.mxu0 %v2707_v19  ;;  %1188 = vmatpush1.bf16.msra.mxu1 %v2709_v22  ;;  %v3143_v19 = vld [vmem:[%s4226_s3 + $0xd0] sm:$0xff]   ;;  %v3147_v22 = vld [vmem:[%s4226_s3 + $0xd8] sm:$0xff]  }
  0x67   :  { %1146 = vmatprep.subr.bf16.mxu0 %v2724_v23  ;;  %1189 = vmatprep.subr.bf16.mxu1 %v2726_v26  ;;  %v3148_v23 = vld [vmem:[%s4226_s3 + $0x18] sm:$0xff]   ;;  %v3151_v26 = vld [vmem:[%s4226_s3 + $0xe0] sm:$0xff]  }
  0x68   :  { %1176 = vmatprep.mubr.bf16.mxu0 %v3292_v8  ;;  %1219 = vmatprep.mubr.bf16.mxu1 %v3292_v8  ;;  %v115_v8 = vld [vmem:[%s4224_s1 + $0x278] sm:$0xff] }
  0x69   :  { %v2774_v49 = vcombine.high %v107_v40, %v115_v8  ;;  %v2773_v53 = vcombine.low %v107_v40, %v115_v8 }
  0x6a   :  { %1147 = vmatpush1.bf16.msra.mxu0 %v2723_v27  ;;  %1190 = vmatpush1.bf16.msra.mxu1 %v2725_v30  ;;  %v3152_v27 = vld [vmem:[%s4226_s3 + $0x20] sm:$0xff]   ;;  %v3155_v30 = vld [vmem:[%s4226_s3 + $0xe8] sm:$0xff]  }
  0x6b   :  { %1148 = vmatprep.subr.bf16.mxu0 %v2740_v31  ;;  %1191 = vmatprep.subr.bf16.mxu1 %v2742_v34 }
  0x6e   :  { %1149 = vmatpush1.bf16.msra.mxu0 %v2739_v35  ;;  %1192 = vmatpush1.bf16.msra.mxu1 %v2741_v38 }
  0x6f   :  { %1150 = vmatprep.subr.bf16.mxu0 %v2756_v39  ;;  %1193 = vmatprep.subr.bf16.mxu1 %v2758_v41 }
  0x72   :  { %1151 = vmatpush1.bf16.msra.mxu0 %v2755_v42  ;;  %1194 = vmatpush1.bf16.msra.mxu1 %v2757_v45 }
  0x73   :  { %1152 = vmatprep.subr.bf16.mxu0 %v2772_v46  ;;  %1195 = vmatprep.subr.bf16.mxu1 %v2774_v49 }
  0x76   :  { %1153 = vmatpush1.bf16.msra.mxu0 %v2771_v50  ;;  %1196 = vmatpush1.bf16.msra.mxu1 %v2773_v53 }
  0x77   :  { %1154 = vmatprep.subr.bf16.mxu0 %v2788_v54  ;;  %1197 = vmatprep.subr.bf16.mxu1 %v2790_v57 }
  0x7a   :  { %1155 = vmatpush1.bf16.msra.mxu0 %v2787_v58  ;;  %1198 = vmatpush1.bf16.msra.mxu1 %v2789_v60 }
  0x7b   :  { %1156 = vmatprep.subr.bf16.mxu0 %v2804_v61  ;;  %1199 = vmatprep.subr.bf16.mxu1 %v2806_v0 }
  0x7e   :  { %1157 = vmatpush1.bf16.msra.mxu0 %v2803_v2  ;;  %1200 = vmatpush1.bf16.msra.mxu1 %v2805_v3 }
  0x7f   :  { %1158 = vmatprep.subr.bf16.mxu0 %v2820_v4  ;;  %1201 = vmatprep.subr.bf16.mxu1 %v2822_v5 }
  0x82   :  { %1159 = vmatpush1.bf16.msra.mxu0 %v2819_v6  ;;  %1202 = vmatpush1.bf16.msra.mxu1 %v2821_v7 }
  0x83   :  { %2954 = vmatprep.subr.bf16.mxu0 %v3134_v9  ;;  %2976 = vmatprep.subr.bf16.mxu1 %v3135_v10 }
  0x85   :  { %1177 = vmatmul.mubr.bf16.vlgmr.msra.gmra.mrb[12].mxu0 %v3458_v12  ;;  %1220 = vmatmul.mubr.bf16.vlgmr.msra.gmra.mrb[12].mxu1 %v3458_v12  ;;  %v3145_v12 = vld [vmem:[%s4226_s3 + $0x90] sm:$0xff]  }
  0x86   :  { %2955 = vmatpush3.bf16.msra.mxu0 %v3136_v11  ;;  %2977 = vmatpush3.bf16.msra.mxu1 %v3137_v13 }
  0x87   :  { %2956 = vmatprep.subr.bf16.mxu0 %v3138_v14  ;;  %2978 = vmatprep.subr.bf16.mxu1 %v3139_v15 }
  0x8a   :  { %2957 = vmatpush3.bf16.msra.mxu0 %v3140_v16  ;;  %2979 = vmatpush3.bf16.msra.mxu1 %v3141_v17 }
  0x8b   :  { %2958 = vmatprep.subr.bf16.mxu0 %v3142_v18  ;;  %2980 = vmatprep.subr.bf16.mxu1 %v3143_v19 }
  0x8e   :  { %2959 = vmatpush3.bf16.msra.mxu0 %v3144_v20  ;;  %2981 = vmatpush3.bf16.msra.mxu1 %v3145_v12 }
  0x8f   :  { %2960 = vmatprep.subr.bf16.mxu0 %v3146_v21  ;;  %2982 = vmatprep.subr.bf16.mxu1 %v3147_v22 }
  0x92   :  { %2961 = vmatpush3.bf16.msra.mxu0 %v3148_v23  ;;  %2983 = vmatpush3.bf16.msra.mxu1 %v3149_v24 }
  0x93   :  { %2962 = vmatprep.subr.bf16.mxu0 %v3150_v25  ;;  %2984 = vmatprep.subr.bf16.mxu1 %v3151_v26 }
  0x94   :  { %12 = vsyncpa [#allocation3], 0  ;;  %v3156_v31 = vld [vmem:[%s4226_s3 + $0x28] sm:$0xff]   ;;  %v3158_v33 = vld [vmem:[%s4226_s3 + $0x70] sm:$0xff]   ;;  %v166_v42 = vlaneseq  ;;  %s3293_s30 = smov [#allocation2]  }
  0x95   :  { %v3157_v32 = vld [vmem:[%s4226_s3 + $0xa8] sm:$0xff]   ;;  %v3159_v34 = vld [vmem:[%s4226_s3 + $0xf0] sm:$0xff]   ;;  %v3162_v37 = vld [vmem:[%s4226_s3 + $0x78] sm:$0xff]   ;;  %s2684_s8 = sshll.u32 %s3293_s30, 4  ;;  %s2685_s8 = int_to_ptr.vmem [resolvable:$true] %s2684_s8 }
  0x96   :  { %2963 = vmatpush3.bf16.msra.mxu0 %v3152_v27  ;;  %2985 = vmatpush3.bf16.msra.mxu1 %v3153_v28  ;;  %v3160_v35 = vld [vmem:[%s4226_s3 + $0x30] sm:$0xff]   ;;  %v3163_v38 = vld [vmem:[%s4226_s3 + $0xf8] sm:$0xff]   ;;  %v3166_v8 = vld [vmem:[%s4226_s3 + $0x140] sm:$0xff]   ;;  %v3846_v43 = vshrl.u32 %v166_v42, 7  ;;  %s3268_s9 = scalar_lea.vmem %s2685_s8, 256  ;;  %p3273_p1 = scmp.lt.s32.totalorder %s2685_s8, %s2685_s8 }
  0x97   :  { %2964 = vmatprep.subr.bf16.mxu0 %v3154_v29  ;;  %2986 = vmatprep.subr.bf16.mxu1 %v3155_v30  ;;  %v3161_v36 = vld [vmem:[%s4226_s3 + $0xb0] sm:$0xff]   ;;  %v3164_v39 = vld [vmem:[%s4226_s3 + $0x38] sm:$0xff]   ;;  %v3167_v41 = vld [vmem:[%s4226_s3 + $0x1c0] sm:$0xff]   ;;  %p3269_p0 = scmp.ne.s32.totalorder %s2685_s8, %s3268_s9  ;;  %p3274_p2 = scmp.lt.s32.totalorder %s3268_s9, %s3268_s9 }
  0x98   :  { %v3165_v40 = vld [vmem:[%s4226_s3 + $0xb8] sm:$0xff]   ;;  %v168_v44 = vsub.s32 0, %v3846_v43  ;;  %v3852_v45 = vld [vmem:[%s4225_s2] sm:$0xff]  ;;  %v176_v46 = vsub.s32 2, %v3846_v43  ;;  %v172_v47 = vsub.s32 1, %v3846_v43  ;;  %v180_v48 = vsub.s32 3, %v3846_v43 }
  0x99   :  { %v3168_v18 = vld [vmem:[%s4226_s3 + $0x100] sm:$0xff]   ;;  %v3170_v12 = vld [vmem:[%s4226_s3 + $0x148] sm:$0xff]   ;;  %v3174_v24 = vld [vmem:[%s4226_s3 + $0x150] sm:$0xff]   ;;  %p3275_p3 = por %p3274_p2, %p3273_p1 }
  0x9a   :  { %2965 = vmatpush3.bf16.msra.mxu0 %v3156_v31  ;;  %2987 = vmatpush3.bf16.msra.mxu1 %v3157_v32  ;;  %v169_v49 = vrot.slane %v3852_v45, %v168_v44  ;;  %v177_v50 = vrot.slane %v3852_v45, %v176_v46  ;;  %v173_v51 = vrot.slane %v3852_v45, %v172_v47  ;;  %v3169_v20 = vld [vmem:[%s4226_s3 + $0x180] sm:$0xff]   ;;  %v3171_v21 = vld [vmem:[%s4226_s3 + $0x1c8] sm:$0xff]   ;;  %v3175_v25 = vld [vmem:[%s4226_s3 + $0x1d0] sm:$0xff]  }
  0x9b   :  { %2966 = vmatprep.subr.bf16.mxu0 %v3158_v33  ;;  %2988 = vmatprep.subr.bf16.mxu1 %v3159_v34  ;;  %v181_v52 = vrot.slane %v3852_v45, %v180_v48  ;;  %v3172_v22 = vld [vmem:[%s4226_s3 + $0x108] sm:$0xff]   ;;  %v3176_v26 = vld [vmem:[%s4226_s3 + $0x110] sm:$0xff]   ;;  %v3178_v28 = vld [vmem:[%s4226_s3 + $0x158] sm:$0xff]   ;;  %p3276_p4 = pnand %p3275_p3, %p3269_p0 }
  0x9c   :  { %v3173_v23 = vld [vmem:[%s4226_s3 + $0x188] sm:$0xff]   ;;  %v3177_v27 = vld [vmem:[%s4226_s3 + $0x190] sm:$0xff]   ;;  %v3179_v29 = vld [vmem:[%s4226_s3 + $0x1d8] sm:$0xff]  }
  0x9d   :  { %v3180_v30 = vld [vmem:[%s4226_s3 + $0x118] sm:$0xff]   ;;  %v3182_v32 = vld [vmem:[%s4226_s3 + $0x160] sm:$0xff]  }
  0x9e   :  { %2967 = vmatpush3.bf16.msra.mxu0 %v3160_v35  ;;  %2989 = vmatpush3.bf16.msra.mxu1 %v3161_v36  ;;  %v3181_v31 = vld [vmem:[%s4226_s3 + $0x198] sm:$0xff]   ;;  %v3183_v33 = vld [vmem:[%s4226_s3 + $0x1e0] sm:$0xff]   ;;  %v3186_v36 = vld [vmem:[%s4226_s3 + $0x168] sm:$0xff]  }
  0x9f   :  { %2968 = vmatprep.subr.bf16.mxu0 %v3162_v37  ;;  %2990 = vmatprep.subr.bf16.mxu1 %v3163_v38  ;;  %v3184_v34 = vld [vmem:[%s4226_s3 + $0x120] sm:$0xff]   ;;  %v184_v37 = vsub.s32 4, %v3846_v43  ;;  %v3187_v38 = vld [vmem:[%s4226_s3 + $0x1e8] sm:$0xff]  }
  0xa0   :  { %v3185_v35 = vld [vmem:[%s4226_s3 + $0x1a0] sm:$0xff]  }
  0xa1   :  { %v185_v42 = vrot.slane %v3852_v45, %v184_v37 }
  0xa2   :  { %2969 = vmatpush3.bf16.msra.mxu0 %v3164_v39  ;;  %2991 = vmatpush3.bf16.msra.mxu1 %v3165_v40  ;;  %v192_v39 = vsub.s32 6, %v3846_v43  ;;  %v188_v40 = vsub.s32 5, %v3846_v43 }
  0xa3   :  { %2998 = vmatprep.subr.bf16.mxu0 %v3166_v8  ;;  %3020 = vmatprep.subr.bf16.mxu1 %v3167_v41  ;;  %v196_v8 = vsub.s32 7, %v3846_v43  ;;  %v3188_v41 = vld [vmem:[%s4226_s3 + $0x128] sm:$0xff]   ;;  %v3258_v43 = vld [vmem:[%s4226_s3 + $0x378] sm:$0xff]  }
  0xf8   :  { %v920_v53 = vpop.f32.mrb[0].mxu0  ;;  %v963_v55 = vpop.f32.mrb[0].mxu1 }
  0xf9   :  { %v921_v54 = vadd.f32 %v920_v53, %v169_v49  ;;  %v922_v56 = vpop.f32.mrb[1].mxu0  ;;  %v964_v57 = vadd.f32 %v963_v55, %v177_v50  ;;  %v965_v59 = vpop.f32.mrb[1].mxu1  ;;  %v3191_v53 = vld [vmem:[%s4226_s3 + $0x1f0] sm:$0xff]  }
  0xfa   :  { %v923_v58 = vadd.f32 %v922_v56, %v173_v51  ;;  %v924_v60 = vpop.f32.mrb[2].mxu0  ;;  %v966_v62 = vadd.f32 %v965_v59, %v181_v52  ;;  %v967_v0 = vpop.f32.mrb[2].mxu1  ;;  %v3192_v56 = vld [vmem:[%s4226_s3 + $0x130] sm:$0xff]  }
  0xfb   :  { %v1230_v61 = vmax.f32 %v921_v54, 0.0  ;;  %v925_v63 = vadd.f32 %v924_v60, %v169_v49  ;;  %v926_v1 = vpop.f32.mrb[3].mxu0  ;;  %v1232_v2 = vmax.f32 %v964_v57, 0.0  ;;  %v968_v3 = vadd.f32 %v967_v0, %v177_v50  ;;  %v969_v5 = vpop.f32.mrb[3].mxu1  ;;  %v3189_v49 = vld [vmem:[%s4226_s3 + $0x1a8] sm:$0xff]   ;;  %v3190_v50 = vld [vmem:[%s4226_s3 + $0x170] sm:$0xff]  }
  0xfc   :  { %v927_v4 = vadd.f32 %v926_v1, %v173_v51  ;;  %v1233_v6 = vmax.f32 %v966_v62, 0.0  ;;  %v970_v9 = vadd.f32 %v969_v5, %v181_v52  ;;  %v1231_v10 = vmax.f32 %v923_v58, 0.0  ;;  %v3193_v60 = vld [vmem:[%s4226_s3 + $0x1b0] sm:$0xff]   ;;  %v3195_v1 = vld [vmem:[%s4226_s3 + $0x1f8] sm:$0xff]  }
  0xfd   :  { %v1246_v7 = vmax.f32 %v925_v63, 0.0  ;;  %v1248_v11 = vmax.f32 %v968_v3, 0.0  ;;  %v193_v51 = vrot.slane %v3852_v45, %v192_v39  ;;  %v189_v52 = vrot.slane %v3852_v45, %v188_v40 }
  0xfe   :  { %v1247_v13 = vmax.f32 %v927_v4, 0.0  ;;  %v1249_v15 = vmax.f32 %v970_v9, 0.0  ;;  %v197_v54 = vrot.slane %v3852_v45, %v196_v8 }
  0xff   :  { %v1262_v14 = vpack.c.bf16 %v1246_v7, %v1230_v61  ;;  %v1264_v16 = vpack.c.bf16 %v1248_v11, %v1232_v2  ;;  %v3194_v61 = vld [vmem:[%s4226_s3 + $0x178] sm:$0xff]  }
 0x100   :  { %v1263_v17 = vpack.c.bf16 %v1247_v13, %v1231_v10  ;;  %v1265_v19 = vpack.c.bf16 %v1249_v15, %v1233_v6  ;;  %v3196_v13 = vld [vmem:[%s4226_s3 + $0x138] sm:$0xff]  }
 0x102   :  { %2340 = vmatprep.mubr.bf16.mxu0 %v1263_v17  ;;  %2381 = vmatprep.mubr.bf16.mxu1 %v1265_v19  ;;  %v3197_v17 = vld [vmem:[%s4226_s3 + $0x1b8] sm:$0xff]  }
 0x103   :  { %2341 = vmatmul.mubr.bf16.vlgmr.msra.gmra.mrb[16].mxu0 %v1262_v14  ;;  %2382 = vmatmul.mubr.bf16.vlgmr.msra.gmra.mrb[16].mxu1 %v1264_v16 }
 0x104   :  { %2999 = vmatpush3.bf16.msra.mxu0 %v3168_v18  ;;  %3021 = vmatpush3.bf16.msra.mxu1 %v3169_v20  ;;  %v3198_v18 = vld [vmem:[%s4226_s3 + $0x240] sm:$0xff]  }
 0x105   :  { %3000 = vmatprep.subr.bf16.mxu0 %v3170_v12  ;;  %3022 = vmatprep.subr.bf16.mxu1 %v3171_v21  ;;  %v3199_v21 = vld [vmem:[%s4226_s3 + $0x2c0] sm:$0xff]  }
 0x108   :  { %3001 = vmatpush3.bf16.msra.mxu0 %v3172_v22  ;;  %3023 = vmatpush3.bf16.msra.mxu1 %v3173_v23 }
 0x109   :  { %3002 = vmatprep.subr.bf16.mxu0 %v3174_v24  ;;  %3024 = vmatprep.subr.bf16.mxu1 %v3175_v25 }
 0x10c   :  { %3003 = vmatpush3.bf16.msra.mxu0 %v3176_v26  ;;  %3025 = vmatpush3.bf16.msra.mxu1 %v3177_v27  ;;  %v3200_v26 = vld [vmem:[%s4226_s3 + $0x200] sm:$0xff]  }
 0x10d   :  { %3004 = vmatprep.subr.bf16.mxu0 %v3178_v28  ;;  %3026 = vmatprep.subr.bf16.mxu1 %v3179_v29  ;;  %v3201_v28 = vld [vmem:[%s4226_s3 + $0x280] sm:$0xff]   ;;  %v3202_v29 = vld [vmem:[%s4226_s3 + $0x248] sm:$0xff]  }
 0x110   :  { %3005 = vmatpush3.bf16.msra.mxu0 %v3180_v30  ;;  %3027 = vmatpush3.bf16.msra.mxu1 %v3181_v31  ;;  %v3203_v30 = vld [vmem:[%s4226_s3 + $0x2c8] sm:$0xff]  }
 0x111   :  { %3006 = vmatprep.subr.bf16.mxu0 %v3182_v32  ;;  %3028 = vmatprep.subr.bf16.mxu1 %v3183_v33  ;;  %v3204_v31 = vld [vmem:[%s4226_s3 + $0x208] sm:$0xff]   ;;  %v3206_v33 = vld [vmem:[%s4226_s3 + $0x250] sm:$0xff]  }
 0x112   :  { %v3205_v32 = vld [vmem:[%s4226_s3 + $0x288] sm:$0xff]  }
 0x114   :  { %3007 = vmatpush3.bf16.msra.mxu0 %v3184_v34  ;;  %3029 = vmatpush3.bf16.msra.mxu1 %v3185_v35  ;;  %v3207_v34 = vld [vmem:[%s4226_s3 + $0x2d0] sm:$0xff]  }
 0x115   :  { %3008 = vmatprep.subr.bf16.mxu0 %v3186_v36  ;;  %3030 = vmatprep.subr.bf16.mxu1 %v3187_v38  ;;  %v3208_v35 = vld [vmem:[%s4226_s3 + $0x210] sm:$0xff]   ;;  %v3210_v38 = vld [vmem:[%s4226_s3 + $0x258] sm:$0xff]  }
 0x116   :  { %v3209_v36 = vld [vmem:[%s4226_s3 + $0x290] sm:$0xff]  }
 0x118   :  { %v1006_v55 = vpop.f32.mrb[4].mxu0  ;;  %3009 = vmatpush3.bf16.msra.mxu0 %v3188_v41  ;;  %v1049_v58 = vpop.f32.mrb[4].mxu1  ;;  %3031 = vmatpush3.bf16.msra.mxu1 %v3189_v49  ;;  %v3211_v41 = vld [vmem:[%s4226_s3 + $0x2d8] sm:$0xff]  }
 0x119   :  { %v1007_v57 = vadd.f32 %v1006_v55, %v185_v42  ;;  %v1008_v59 = vpop.f32.mrb[5].mxu0  ;;  %3010 = vmatprep.subr.bf16.mxu0 %v3190_v50  ;;  %v1050_v45 = vadd.f32 %v1049_v58, %v193_v51  ;;  %v1051_v63 = vpop.f32.mrb[5].mxu1  ;;  %3032 = vmatprep.subr.bf16.mxu1 %v3191_v53  ;;  %v3213_v49 = vld [vmem:[%s4226_s3 + $0x298] sm:$0xff]   ;;  %v3214_v50 = vld [vmem:[%s4226_s3 + $0x260] sm:$0xff]   ;;  %v3219_v55 = vld [vmem:[%s4226_s3 + $0x2e8] sm:$0xff]  }
 0x11a   :  { %v1009_v62 = vadd.f32 %v1008_v59, %v189_v52  ;;  %v1010_v0 = vpop.f32.mrb[6].mxu0  ;;  %v1052_v3 = vadd.f32 %v1051_v63, %v197_v54  ;;  %v1053_v5 = vpop.f32.mrb[6].mxu1  ;;  %v3217_v53 = vld [vmem:[%s4226_s3 + $0x2a0] sm:$0xff]   ;;  %v3221_v59 = vld [vmem:[%s4226_s3 + $0x2a8] sm:$0xff]  }
 0x11b   :  { %v1234_v2 = vmax.f32 %v1007_v57, 0.0  ;;  %v1011_v4 = vadd.f32 %v1010_v0, %v185_v42  ;;  %v1012_v6 = vpop.f32.mrb[7].mxu0  ;;  %v1236_v7 = vmax.f32 %v1050_v45, 0.0  ;;  %v1054_v9 = vadd.f32 %v1053_v5, %v193_v51  ;;  %v1055_v11 = vpop.f32.mrb[7].mxu1  ;;  %v3212_v42 = vld [vmem:[%s4226_s3 + $0x218] sm:$0xff]   ;;  %v3215_v51 = vld [vmem:[%s4226_s3 + $0x2e0] sm:$0xff]  }
 0x11c   :  { %v1013_v10 = vadd.f32 %v1012_v6, %v189_v52  ;;  %3011 = vmatpush3.bf16.msra.mxu0 %v3192_v56  ;;  %v1237_v14 = vmax.f32 %v1052_v3, 0.0  ;;  %v1056_v16 = vadd.f32 %v1055_v11, %v197_v54  ;;  %3033 = vmatpush3.bf16.msra.mxu1 %v3193_v60  ;;  %v1235_v19 = vmax.f32 %v1009_v62, 0.0  ;;  %v3216_v52 = vld [vmem:[%s4226_s3 + $0x220] sm:$0xff]   ;;  %v3218_v54 = vld [vmem:[%s4226_s3 + $0x268] sm:$0xff]   ;;  %v3222_v60 = vld [vmem:[%s4226_s3 + $0x270] sm:$0xff]  }
 0x11d   :  { %v1250_v15 = vmax.f32 %v1011_v4, 0.0  ;;  %3012 = vmatprep.subr.bf16.mxu0 %v3194_v61  ;;  %v1252_v20 = vmax.f32 %v1054_v9, 0.0  ;;  %3034 = vmatprep.subr.bf16.mxu1 %v3195_v1  ;;  %v4044_v56 = vld [vmem:[%s4225_s2 + $0x8] sm:$0xff]  ;;  %v3224_v0 = vld [vmem:[%s4226_s3 + $0x230] sm:$0xff]   ;;  %v3226_v3 = vld [vmem:[%s4226_s3 + $0x278] sm:$0xff]  }
 0x11e   :  { %v1251_v12 = vmax.f32 %v1013_v10, 0.0  ;;  %v1253_v23 = vmax.f32 %v1056_v16, 0.0  ;;  %v3220_v57 = vld [vmem:[%s4226_s3 + $0x228] sm:$0xff]   ;;  %v201_v58 = vrot.slane %v4044_v56, %v168_v44  ;;  %v209_v61 = vrot.slane %v4044_v56, %v176_v46  ;;  %v3223_v44 = vld [vmem:[%s4226_s3 + $0x2f0] sm:$0xff]  }
 0x11f   :  { %v1266_v22 = vpack.c.bf16 %v1250_v15, %v1234_v2  ;;  %v1268_v24 = vpack.c.bf16 %v1252_v20, %v1236_v7  ;;  %v205_v45 = vrot.slane %v4044_v56, %v172_v47  ;;  %v213_v62 = vrot.slane %v4044_v56, %v180_v48  ;;  %v3225_v47 = vld [vmem:[%s4226_s3 + $0x2b0] sm:$0xff]   ;;  %v3227_v7 = vld [vmem:[%s4226_s3 + $0x2f8] sm:$0xff]  }
 0x120   :  { %v1267_v25 = vpack.c.bf16 %v1251_v12, %v1235_v19  ;;  %3013 = vmatpush3.bf16.msra.mxu0 %v3196_v13  ;;  %v1269_v27 = vpack.c.bf16 %v1253_v23, %v1237_v14  ;;  %3035 = vmatpush3.bf16.msra.mxu1 %v3197_v17  ;;  %v3228_v19 = vld [vmem:[%s4226_s3 + $0x238] sm:$0xff]   ;;  %v3230_v23 = vld [vmem:[%s4226_s3 + $0x340] sm:$0xff]  }
 0x121   :  { %3042 = vmatprep.subr.bf16.mxu0 %v3198_v18  ;;  %3064 = vmatprep.subr.bf16.mxu1 %v3199_v21 }
 0x122   :  { %2422 = vmatprep.mubr.bf16.mxu0 %v1267_v25  ;;  %2463 = vmatprep.mubr.bf16.mxu1 %v1269_v27  ;;  %v3231_v27 = vld [vmem:[%s4226_s3 + $0x3c0] sm:$0xff]  }
 0x123   :  { %2423 = vmatmul.mubr.bf16.vlgmr.msra.gmra.mrb[20].mxu0 %v1266_v22  ;;  %2464 = vmatmul.mubr.bf16.vlgmr.msra.gmra.mrb[20].mxu1 %v1268_v24  ;;  %v3229_v22 = vld [vmem:[%s4226_s3 + $0x2b8] sm:$0xff]  }
 0x124   :  { %3043 = vmatpush3.bf16.msra.mxu0 %v3200_v26  ;;  %3065 = vmatpush3.bf16.msra.mxu1 %v3201_v28 }
 0x125   :  { %3044 = vmatprep.subr.bf16.mxu0 %v3202_v29  ;;  %3066 = vmatprep.subr.bf16.mxu1 %v3203_v30 }
 0x128   :  { %3045 = vmatpush3.bf16.msra.mxu0 %v3204_v31  ;;  %3067 = vmatpush3.bf16.msra.mxu1 %v3205_v32  ;;  %v3232_v32 = vld [vmem:[%s4226_s3 + $0x300] sm:$0xff]  }
 0x129   :  { %3046 = vmatprep.subr.bf16.mxu0 %v3206_v33  ;;  %3068 = vmatprep.subr.bf16.mxu1 %v3207_v34  ;;  %v3233_v34 = vld [vmem:[%s4226_s3 + $0x380] sm:$0xff]  }
 0x12c   :  { %3047 = vmatpush3.bf16.msra.mxu0 %v3208_v35  ;;  %3069 = vmatpush3.bf16.msra.mxu1 %v3209_v36  ;;  %v3234_v35 = vld [vmem:[%s4226_s3 + $0x348] sm:$0xff]  }
 0x12d   :  { %3048 = vmatprep.subr.bf16.mxu0 %v3210_v38  ;;  %3070 = vmatprep.subr.bf16.mxu1 %v3211_v41  ;;  %v3235_v36 = vld [vmem:[%s4226_s3 + $0x3c8] sm:$0xff]  }
 0x12e   :  { %v3236_v38 = vld [vmem:[%s4226_s3 + $0x308] sm:$0xff]  }
 0x12f   :  { %v3237_v41 = vld [vmem:[%s4226_s3 + $0x388] sm:$0xff]  }
 0x130   :  { %3049 = vmatpush3.bf16.msra.mxu0 %v3212_v42  ;;  %3071 = vmatpush3.bf16.msra.mxu1 %v3213_v49  ;;  %v3238_v42 = vld [vmem:[%s4226_s3 + $0x350] sm:$0xff]  }
 0x131   :  { %3050 = vmatprep.subr.bf16.mxu0 %v3214_v50  ;;  %3072 = vmatprep.subr.bf16.mxu1 %v3215_v51  ;;  %v3239_v49 = vld [vmem:[%s4226_s3 + $0x3d0] sm:$0xff]  }
 0x132   :  { %v3240_v50 = vld [vmem:[%s4226_s3 + $0x310] sm:$0xff]  }
 0x133   :  { %v3241_v51 = vld [vmem:[%s4226_s3 + $0x390] sm:$0xff]  }
 0x134   :  { %3051 = vmatpush3.bf16.msra.mxu0 %v3216_v52  ;;  %3073 = vmatpush3.bf16.msra.mxu1 %v3217_v53  ;;  %v3242_v52 = vld [vmem:[%s4226_s3 + $0x358] sm:$0xff]  }
 0x135   :  { %3052 = vmatprep.subr.bf16.mxu0 %v3218_v54  ;;  %3074 = vmatprep.subr.bf16.mxu1 %v3219_v55  ;;  %v3243_v53 = vld [vmem:[%s4226_s3 + $0x3d8] sm:$0xff]  }
 0x136   :  { %v3244_v54 = vld [vmem:[%s4226_s3 + $0x318] sm:$0xff]  }
 0x137   :  { %v3245_v55 = vld [vmem:[%s4226_s3 + $0x398] sm:$0xff]  }
 0x138   :  { %v1092_v63 = vpop.f32.mrb[8].mxu0  ;;  %3053 = vmatpush3.bf16.msra.mxu0 %v3220_v57  ;;  %v1135_v46 = vpop.f32.mrb[8].mxu1  ;;  %3075 = vmatpush3.bf16.msra.mxu1 %v3221_v59  ;;  %v3246_v57 = vld [vmem:[%s4226_s3 + $0x360] sm:$0xff]  }
 0x139   :  { %v1093_v1 = vadd.f32 %v1092_v63, %v201_v58  ;;  %v1094_v2 = vpop.f32.mrb[9].mxu0  ;;  %3054 = vmatprep.subr.bf16.mxu0 %v3222_v60  ;;  %v1136_v48 = vadd.f32 %v1135_v46, %v209_v61  ;;  %v1137_v5 = vpop.f32.mrb[9].mxu1  ;;  %3076 = vmatprep.subr.bf16.mxu1 %v3223_v44  ;;  %v3248_v59 = vld [vmem:[%s4226_s3 + $0x320] sm:$0xff]   ;;  %v3252_v44 = vld [vmem:[%s4226_s3 + $0x328] sm:$0xff]   ;;  %v221_v46 = vrot.slane %v4044_v56, %v188_v40  ;;  %v3257_v40 = vld [vmem:[%s4226_s3 + $0x3b0] sm:$0xff]  }
 0x13a   :  { %v1095_v4 = vadd.f32 %v1094_v2, %v205_v45  ;;  %v1096_v6 = vpop.f32.mrb[10].mxu0  ;;  %v1138_v10 = vadd.f32 %v1137_v5, %v213_v62  ;;  %v1139_v13 = vpop.f32.mrb[10].mxu1  ;;  %v3249_v60 = vld [vmem:[%s4226_s3 + $0x3a0] sm:$0xff]   ;;  %v3253_v63 = vld [vmem:[%s4226_s3 + $0x3a8] sm:$0xff]   ;;  %v229_v2 = vrot.slane %v4044_v56, %v196_v8 }
 0x13b   :  { %v1238_v9 = vmax.f32 %v1093_v1, 0.0  ;;  %v1097_v11 = vadd.f32 %v1096_v6, %v201_v58  ;;  %v1098_v14 = vpop.f32.mrb[11].mxu0  ;;  %v1240_v15 = vmax.f32 %v1136_v48, 0.0  ;;  %v1140_v16 = vadd.f32 %v1139_v13, %v209_v61  ;;  %v1141_v18 = vpop.f32.mrb[11].mxu1  ;;  %v3247_v58 = vld [vmem:[%s4226_s3 + $0x3e0] sm:$0xff]   ;;  %v3250_v61 = vld [vmem:[%s4226_s3 + $0x368] sm:$0xff]  }
 0x13c   :  { %v1099_v17 = vadd.f32 %v1098_v14, %v205_v45  ;;  %3055 = vmatpush3.bf16.msra.mxu0 %v3224_v0  ;;  %v1241_v20 = vmax.f32 %v1138_v10, 0.0  ;;  %v1142_v21 = vadd.f32 %v1141_v18, %v213_v62  ;;  %3077 = vmatpush3.bf16.msra.mxu1 %v3225_v47  ;;  %v1239_v24 = vmax.f32 %v1095_v4, 0.0  ;;  %v3251_v45 = vld [vmem:[%s4226_s3 + $0x3e8] sm:$0xff]   ;;  %v3254_v0 = vld [vmem:[%s4226_s3 + $0x370] sm:$0xff]   ;;  %v3260_v18 = vld [vmem:[%s4226_s3 + $0x338] sm:$0xff]  }
 0x13d   :  { %v1254_v12 = vmax.f32 %v1097_v11, 0.0  ;;  %3056 = vmatprep.subr.bf16.mxu0 %v3226_v3  ;;  %v1256_v25 = vmax.f32 %v1140_v16, 0.0  ;;  %3078 = vmatprep.subr.bf16.mxu1 %v3227_v7  ;;  %v217_v62 = vrot.slane %v4044_v56, %v184_v37  ;;  %v225_v1 = vrot.slane %v4044_v56, %v192_v39  ;;  %v3255_v37 = vld [vmem:[%s4226_s3 + $0x3f0] sm:$0xff]   ;;  %v3259_v7 = vld [vmem:[%s4226_s3 + $0x3f8] sm:$0xff]  }
 0x13e   :  { %v1255_v26 = vmax.f32 %v1099_v17, 0.0  ;;  %v1257_v29 = vmax.f32 %v1142_v21, 0.0  ;;  %v3256_v3 = vld [vmem:[%s4226_s3 + $0x330] sm:$0xff]  }
 0x13f   :  { %v1270_v28 = vpack.c.bf16 %v1254_v12, %v1238_v9  ;;  %v1272_v30 = vpack.c.bf16 %v1256_v25, %v1240_v15 }
 0x140   :  { %v1271_v31 = vpack.c.bf16 %v1255_v26, %v1239_v24  ;;  %3057 = vmatpush3.bf16.msra.mxu0 %v3228_v19  ;;  %v1273_v33 = vpack.c.bf16 %v1257_v29, %v1241_v20  ;;  %3079 = vmatpush3.bf16.msra.mxu1 %v3229_v22  ;;  %v3261_v22 = vld [vmem:[%s4226_s3 + $0x3b8] sm:$0xff]  }
 0x141   :  { %3086 = vmatprep.subr.bf16.mxu0 %v3230_v23  ;;  %3108 = vmatprep.subr.bf16.mxu1 %v3231_v27 }
 0x142   :  { %2504 = vmatprep.mubr.bf16.mxu0 %v1271_v31  ;;  %2545 = vmatprep.mubr.bf16.mxu1 %v1273_v33  ;;  %v2823_v33 = vld [vmem:[%s4227_s4] ss:$0 sm:$0xff] }
 0x143   :  { %2505 = vmatmul.mubr.bf16.vlgmr.msra.gmra.mrb[24].mxu0 %v1270_v28  ;;  %2546 = vmatmul.mubr.bf16.vlgmr.msra.gmra.mrb[24].mxu1 %v1272_v30 }
 0x144   :  { %3087 = vmatpush3.bf16.msra.mxu0 %v3232_v32  ;;  %3109 = vmatpush3.bf16.msra.mxu1 %v3233_v34 }
 0x145   :  { %3088 = vmatprep.subr.bf16.mxu0 %v3234_v35  ;;  %3110 = vmatprep.subr.bf16.mxu1 %v3235_v36 }
 0x148   :  { %3089 = vmatpush3.bf16.msra.mxu0 %v3236_v38  ;;  %3111 = vmatpush3.bf16.msra.mxu1 %v3237_v41 }
 0x149   :  { %3090 = vmatprep.subr.bf16.mxu0 %v3238_v42  ;;  %3112 = vmatprep.subr.bf16.mxu1 %v3239_v49 }
 0x14c   :  { %3091 = vmatpush3.bf16.msra.mxu0 %v3240_v50  ;;  %3113 = vmatpush3.bf16.msra.mxu1 %v3241_v51 }
 0x14d   :  { %3092 = vmatprep.subr.bf16.mxu0 %v3242_v52  ;;  %3114 = vmatprep.subr.bf16.mxu1 %v3243_v53 }
 0x150   :  { %3093 = vmatpush3.bf16.msra.mxu0 %v3244_v54  ;;  %3115 = vmatpush3.bf16.msra.mxu1 %v3245_v55 }
 0x151   :  { %3094 = vmatprep.subr.bf16.mxu0 %v3246_v57  ;;  %3116 = vmatprep.subr.bf16.mxu1 %v3247_v58 }
 0x154   :  { %3095 = vmatpush3.bf16.msra.mxu0 %v3248_v59  ;;  %3117 = vmatpush3.bf16.msra.mxu1 %v3249_v60 }
 0x155   :  { %3096 = vmatprep.subr.bf16.mxu0 %v3250_v61  ;;  %3118 = vmatprep.subr.bf16.mxu1 %v3251_v45 }
 0x158   :  { %v1178_v47 = vpop.f32.mrb[12].mxu0  ;;  %3097 = vmatpush3.bf16.msra.mxu0 %v3252_v44  ;;  %v1221_v39 = vpop.f32.mrb[12].mxu1  ;;  %3119 = vmatpush3.bf16.msra.mxu1 %v3253_v63 }
 0x159   :  { %v1179_v48 = vadd.f32 %v1178_v47, %v217_v62  ;;  %v1180_v4 = vpop.f32.mrb[13].mxu0  ;;  %3098 = vmatprep.subr.bf16.mxu0 %v3254_v0  ;;  %v1222_v8 = vadd.f32 %v1221_v39, %v225_v1  ;;  %v1223_v5 = vpop.f32.mrb[13].mxu1  ;;  %3120 = vmatprep.subr.bf16.mxu1 %v3255_v37 }
 0x15a   :  { %v1181_v56 = vadd.f32 %v1180_v4, %v221_v46  ;;  %v1182_v6 = vpop.f32.mrb[14].mxu0  ;;  %v1224_v9 = vadd.f32 %v1223_v5, %v229_v2  ;;  %v1225_v11 = vpop.f32.mrb[14].mxu1 }
 0x15b   :  { %v1183_v10 = vadd.f32 %v1182_v6, %v217_v62  ;;  %v1184_v13 = vpop.f32.mrb[15].mxu0  ;;  %v1244_v14 = vmax.f32 %v1222_v8, 0.0  ;;  %v1226_v15 = vadd.f32 %v1225_v11, %v225_v1  ;;  %v1227_v17 = vpop.f32.mrb[15].mxu1  ;;  %v1242_v19 = vmax.f32 %v1179_v48, 0.0 }
 0x15c   :  { %v1185_v16 = vadd.f32 %v1184_v13, %v221_v46  ;;  %3099 = vmatpush3.bf16.msra.mxu0 %v3256_v3  ;;  %v1245_v20 = vmax.f32 %v1224_v9, 0.0  ;;  %v1228_v21 = vadd.f32 %v1227_v17, %v229_v2  ;;  %3121 = vmatpush3.bf16.msra.mxu1 %v3257_v40  ;;  %v1243_v23 = vmax.f32 %v1181_v56, 0.0 }
 0x15d   :  { %v1258_v12 = vmax.f32 %v1183_v10, 0.0  ;;  %3100 = vmatprep.subr.bf16.mxu0 %v3258_v43  ;;  %v1260_v24 = vmax.f32 %v1226_v15, 0.0  ;;  %3122 = vmatprep.subr.bf16.mxu1 %v3259_v7 }
 0x15e   :  { %v1259_v25 = vmax.f32 %v1185_v16, 0.0  ;;  %v1261_v27 = vmax.f32 %v1228_v21, 0.0 }
 0x15f   :  { %v1274_v26 = vpack.c.bf16 %v1258_v12, %v1242_v19  ;;  %v1276_v28 = vpack.c.bf16 %v1260_v24, %v1244_v14 }
 0x160   :  { %v1275_v29 = vpack.c.bf16 %v1259_v25, %v1243_v23  ;;  %3101 = vmatpush3.bf16.msra.mxu0 %v3260_v18  ;;  %v1277_v30 = vpack.c.bf16 %v1261_v27, %v1245_v20  ;;  %3123 = vmatpush3.bf16.msra.mxu1 %v3261_v22 }
 0x162   :  { %2586 = vmatprep.mubr.bf16.mxu0 %v1275_v29  ;;  %2627 = vmatprep.mubr.bf16.mxu1 %v1277_v30 }
 0x163   :  { %2587 = vmatmul.mubr.bf16.vlgmr.msra.gmra.mrb[28].mxu0 %v1274_v26  ;;  %2628 = vmatmul.mubr.bf16.vlgmr.msra.gmra.mrb[28].mxu1 %v1276_v28 }
 0x1d6   :  { %v2970_v31 = vpop.f32.mrb[16].mxu0  ;;  %v2992_v32 = vpop.f32.mrb[16].mxu1 }
 0x1d7   :  { %v2971_v34 = vpop.f32.mrb[17].mxu0  ;;  %v2993_v36 = vpop.f32.mrb[17].mxu1 }
 0x1d8   :  { %v2972_v35 = vadd.f32 %v2971_v34, %v2970_v31  ;;  %v2973_v38 = vpop.f32.mrb[18].mxu0  ;;  %v2994_v41 = vadd.f32 %v2993_v36, %v2992_v32  ;;  %v2995_v42 = vpop.f32.mrb[18].mxu1  ;;  %v3266_v32 = vld [vmem:[%s4223_s0] sm:$0xff]  ;;  %v3267_v34 = vld [vmem:[%s4223_s0 + $0x8] sm:$0xff] }
 0x1d9   :  { %v2974_v49 = vpop.f32.mrb[19].mxu0  ;;  %v2996_v52 = vpop.f32.mrb[19].mxu1 }
 0x1da   :  { %v2343_v50 = vadd.f32 %v2972_v35, %v2823_v33  ;;  %v2975_v51 = vadd.f32 %v2974_v49, %v2973_v38  ;;  %v2997_v53 = vadd.f32 %v2996_v52, %v2995_v42 }
 0x1dc   :  { %v2384_v54 = vadd.f32 %v2994_v41, %v2343_v50  ;;  %v2346_v55 = vadd.f32 %v2975_v51, %v2823_v33 }
 0x1de   :  { %v2387_v57 = vadd.f32 %v2997_v53, %v2346_v55 }
 0x1f6   :  { %v3014_v58 = vpop.f32.mrb[20].mxu0  ;;  %v3036_v59 = vpop.f32.mrb[20].mxu1 }
 0x1f7   :  { %v3015_v60 = vpop.f32.mrb[21].mxu0  ;;  %v3037_v45 = vpop.f32.mrb[21].mxu1 }
 0x1f8   :  { %v3016_v61 = vadd.f32 %v3015_v60, %v3014_v58  ;;  %v3017_v44 = vpop.f32.mrb[22].mxu0  ;;  %v3038_v62 = vadd.f32 %v3037_v45, %v3036_v59  ;;  %v3039_v63 = vpop.f32.mrb[22].mxu1 }
 0x1f9   :  { %v3018_v0 = vpop.f32.mrb[23].mxu0  ;;  %v3040_v37 = vpop.f32.mrb[23].mxu1 }
 0x1fa   :  { %v2425_v1 = vadd.f32 %v3016_v61, %v2384_v54  ;;  %v3019_v46 = vadd.f32 %v3018_v0, %v3017_v44  ;;  %v3041_v2 = vadd.f32 %v3040_v37, %v3039_v63  ;;  %v2952_v61 = vld [vmem:[%s4228_s5] ss:$0 sm:$0xff] }
 0x1fb   :  { %v2953_v44 = vld [vmem:[%s4229_s6] ss:$0 sm:$0xff] }
 0x1fc   :  { %v2466_v47 = vadd.f32 %v3038_v62, %v2425_v1  ;;  %v2428_v3 = vadd.f32 %v3019_v46, %v2387_v57 }
 0x1fe   :  { %v2469_v48 = vadd.f32 %v3041_v2, %v2428_v3 }
 0x216   :  { %v3058_v39 = vpop.f32.mrb[24].mxu0  ;;  %v3080_v4 = vpop.f32.mrb[24].mxu1 }
 0x217   :  { %v3059_v40 = vpop.f32.mrb[25].mxu0  ;;  %v3081_v8 = vpop.f32.mrb[25].mxu1 }
 0x218   :  { %v3060_v43 = vadd.f32 %v3059_v40, %v3058_v39  ;;  %v3061_v56 = vpop.f32.mrb[26].mxu0  ;;  %v3082_v5 = vadd.f32 %v3081_v8, %v3080_v4  ;;  %v3083_v6 = vpop.f32.mrb[26].mxu1 }
 0x219   :  { %v3062_v7 = vpop.f32.mrb[27].mxu0  ;;  %v3084_v11 = vpop.f32.mrb[27].mxu1 }
 0x21a   :  { %v2507_v9 = vadd.f32 %v3060_v43, %v2466_v47  ;;  %v3063_v10 = vadd.f32 %v3062_v7, %v3061_v56  ;;  %v3085_v13 = vadd.f32 %v3084_v11, %v3083_v6 }
 0x21c   :  { %v2548_v14 = vadd.f32 %v3082_v5, %v2507_v9  ;;  %v2510_v15 = vadd.f32 %v3063_v10, %v2469_v48 }
 0x21e   :  { %v2551_v16 = vadd.f32 %v3085_v13, %v2510_v15 }
 0x236   :  { %v3102_v17 = vpop.f32.mrb[28].mxu0  ;;  %v3124_v18 = vpop.f32.mrb[28].mxu1 }
 0x237   :  { %v3103_v19 = vpop.f32.mrb[29].mxu0  ;;  %v3125_v12 = vpop.f32.mrb[29].mxu1 }
 0x238   :  { %v3104_v20 = vadd.f32 %v3103_v19, %v3102_v17  ;;  %v3105_v21 = vpop.f32.mrb[30].mxu0  ;;  %v3126_v22 = vadd.f32 %v3125_v12, %v3124_v18  ;;  %v3127_v23 = vpop.f32.mrb[30].mxu1 }
 0x239   :  { %v3106_v24 = vpop.f32.mrb[31].mxu0  ;;  %v3128_v27 = vpop.f32.mrb[31].mxu1 }
 0x23a   :  { %v2589_v25 = vadd.f32 %v3104_v20, %v2548_v14  ;;  %v3107_v26 = vadd.f32 %v3106_v24, %v3105_v21  ;;  %v3129_v28 = vadd.f32 %v3128_v27, %v3127_v23 }
 0x23c   :  { %v2630_v29 = vadd.f32 %v3126_v22, %v2589_v25  ;;  %v2592_v30 = vadd.f32 %v3107_v26, %v2551_v16 }
 0x23e   :  { %v2633_v31 = vadd.f32 %v3129_v28, %v2592_v30  ;;  %v2636_v33 = vadd.f32 %v3266_v32, %v2630_v29 }
 0x240   :  { %2638 = vadd.xlane.f32.xlu0 %v2636_v33  ;;  %v2637_v35 = vadd.f32 %v3267_v34, %v2633_v31 }
 0x244   :  { %2640 = vadd.xlane.f32.xlu0 %v2637_v35 }
 0x2cd   :  { %v2639_v36 = vpop.xlane.xlu0 %2638 }
 0x2ce   :  { %v2643_v38 = vmul.f32 0.0078125, %v2639_v36 }
 0x2d0   :  { %v2645_v41 = vsub.f32 %v2636_v33, %v2643_v38 }
 0x2d1   :  { %v2641_v42 = vpop.xlane.xlu0 %2640 }
 0x2d2   :  { %v2644_v49 = vmul.f32 0.0078125, %v2641_v42  ;;  %v2647_v50 = vmul.f32 %v2645_v41, %v2645_v41 }
 0x2d4   :  { %v2646_v51 = vsub.f32 %v2637_v35, %v2644_v49  ;;  %2649 = vadd.xlane.f32.xlu1 %v2647_v50 }
 0x2d6   :  { %v2648_v52 = vmul.f32 %v2646_v51, %v2646_v51 }
 0x2d8   :  { %2651 = vadd.xlane.f32.xlu1 %v2648_v52 }
 0x361   :  { %v2650_v53 = vpop.xlane.xlu1 %2649 }
 0x362   :  { %v2653_v54 = vmul.f32 0.0078125, %v2650_v53 }
 0x364   :  { %v2655_v55 = vadd.f32 1e-05, %v2653_v54 }
 0x365   :  { %v2652_v57 = vpop.xlane.xlu1 %2651 }
 0x366   :  { %3262 = vrsqrt.f32 %v2655_v55  ;;  %v2654_v58 = vmul.f32 0.0078125, %v2652_v57 }
 0x368   :  { %v2656_v59 = vadd.f32 1e-05, %v2654_v58 }
 0x36a   :  { %3264 = vrsqrt.f32 %v2656_v59 }
 0x370   :  { %v3263_v60 = vpop.eup %3262 }
 0x371   :  { %v2659_v45 = vmul.f32 %v3263_v60, %v2645_v41 }
 0x373   :  { %v2667_v62 = vmul.f32 %v2952_v61, %v2659_v45 }
 0x374   :  { %v3265_v63 = vpop.eup %3264 }
 0x375   :  { %v2660_v0 = vmul.f32 %v3265_v63, %v2646_v51  ;;  %v2675_v1 = vadd.f32 %v2953_v44, %v2667_v62 }
 0x377   :  { %v2668_v46 = vmul.f32 %v2952_v61, %v2660_v0  ;;  %2677 = vst [vmem:[#allocation2] sm:$0xff] %v2675_v1 }
 0x379   :  { %v2676_v37 = vadd.f32 %v2953_v44, %v2668_v46 }
 0x37b   :  { %2678 = vst [vmem:[#allocation2 + $0x8] sm:$0xff] %v2676_v37 }
 0x37c   :  { %3279 = shalt.err (!%p3276_p4)
}
 0x37d   :  { %s3280_s10 = scalar_lea.hbm %s4230_s7, 256 }
 0x37e   :  { %p3281_p5 = scmp.ne.s32.totalorder %s4230_s7, %s3280_s10  ;;  %p3284_p6 = scmp.lt.u32.totalorder %s3280_s10, %s4230_s7 }
 0x380   :  { %p3286_p7 = pnand %p3284_p6, %p3281_p5 }
 0x382   :  { %3289 = shalt.err (!%p3286_p7)
}
 0x383   :  { %s3294_s14 = smov 128   ;;  %s3295_s15 = smov 8  }
 0x384   :  { %2690 = dma.vmem_to_hbm [thread:$0]  %s2685_s8, 256, %s4230_s7, [#allocation3], %s3294_s14, %s3294_s14, %s3295_s15  }
 0x385   :  { %3290 = dma.done.wait [#allocation3], 256  }
 0x386   :  { %3291 = vsyncadd [#allocation3], 4294967040 }
 0x387   :  { %2694 = vsyncpa [#allocation3], 1 }

// kernel: poswise_ffn.1
= control target key start
LH: loop header
LB: loop body
LE: loop exit
PB: predicated region body
PF: predicated region fallthrough
CT: control target
= control target key end

     0   :  { %v3292_v8 = vmov 0   ;;  %s4223_s0 = inlined_call_operand.vmem [shape: f32[16,128], index: 0, kind: input, shape index: {}]   ;;  %s4224_s1 = inlined_call_operand.vmem [shape: bf16[128,2048], index: 1, kind: input, shape index: {}]   ;;  %s4225_s2 = inlined_call_operand.vmem [shape: f32[1,2048], index: 2, kind: input, shape index: {}]   ;;  %s4226_s3 = inlined_call_operand.vmem [shape: bf16[2048,128], index: 3, kind: input, shape index: {}]   ;;  %s4227_s4 = inlined_call_operand.vmem [shape: f32[1,128], index: 4, kind: input, shape index: {}]   ;;  %s4228_s5 = inlined_call_operand.vmem [shape: f32[1,128], index: 5, kind: input, shape index: {}]   ;;  %s4229_s6 = inlined_call_operand.vmem [shape: f32[1,128], index: 6, kind: input, shape index: {}]   ;;  %s4230_s7 = inlined_call_operand.hbm [shape: f32[16,128], index: 7, kind: output, shape index: {}]  }
   0x1   :  { %v36_v0 = vld [vmem:[%s4224_s1] sm:$0xff]  ;;  %v37_v2 = vld [vmem:[%s4224_s1 + $0x8] sm:$0xff]  ;;  %918 = vmatprep.mubr.bf16.mxu0 %v3292_v8  ;;  %961 = vmatprep.mubr.bf16.mxu1 %v3292_v8  ;;  %v38_v63 = vld [vmem:[%s4224_s1 + $0x10] sm:$0xff] }
   0x2   :  { %v44_v1 = vld [vmem:[%s4224_s1 + $0x40] sm:$0xff]  ;;  %v45_v4 = vld [vmem:[%s4224_s1 + $0x48] sm:$0xff] }
   0x3   :  { %v2696_v3 = vcombine.high %v36_v0, %v44_v1  ;;  %v2695_v5 = vcombine.low %v36_v0, %v44_v1  ;;  %v52_v6 = vld [vmem:[%s4224_s1 + $0x80] sm:$0xff]  ;;  %v2698_v9 = vcombine.high %v37_v2, %v45_v4  ;;  %v2697_v10 = vcombine.low %v37_v2, %v45_v4  ;;  %v53_v12 = vld [vmem:[%s4224_s1 + $0x88] sm:$0xff]  ;;  %v46_v0 = vld [vmem:[%s4224_s1 + $0x50] sm:$0xff] }
   0x4   :  { %v60_v7 = vld [vmem:[%s4224_s1 + $0xc0] sm:$0xff]  ;;  %v61_v13 = vld [vmem:[%s4224_s1 + $0xc8] sm:$0xff]  ;;  %v39_v1 = vld [vmem:[%s4224_s1 + $0x18] sm:$0xff] }
   0x5   :  { %v2712_v11 = vcombine.high %v52_v6, %v60_v7  ;;  %v68_v14 = vld [vmem:[%s4224_s1 + $0x100] sm:$0xff]  ;;  %886 = vmatprep.subr.bf16.mxu0 %v2696_v3  ;;  %v2714_v15 = vcombine.high %v53_v12, %v61_v13  ;;  %v69_v17 = vld [vmem:[%s4224_s1 + $0x108] sm:$0xff]  ;;  %929 = vmatprep.subr.bf16.mxu1 %v2698_v9  ;;  %v2711_v19 = vcombine.low %v52_v6, %v60_v7  ;;  %v47_v2 = vld [vmem:[%s4224_s1 + $0x58] sm:$0xff] }
   0x6   :  { %v76_v16 = vld [vmem:[%s4224_s1 + $0x140] sm:$0xff]  ;;  %v77_v18 = vld [vmem:[%s4224_s1 + $0x148] sm:$0xff]  ;;  %887 = vmatpush1.bf16.msra.mxu0 %v2695_v5  ;;  %930 = vmatpush1.bf16.msra.mxu1 %v2697_v10  ;;  %v2713_v20 = vcombine.low %v53_v12, %v61_v13  ;;  %v2700_v7 = vcombine.high %v38_v63, %v46_v0  ;;  %v2702_v9 = vcombine.high %v39_v1, %v47_v2  ;;  %v54_v10 = vld [vmem:[%s4224_s1 + $0x90] sm:$0xff] }
   0x7   :  { %888 = vmatprep.subr.bf16.mxu0 %v2712_v11  ;;  %v2728_v21 = vcombine.high %v68_v14, %v76_v16  ;;  %931 = vmatprep.subr.bf16.mxu1 %v2714_v15  ;;  %v2730_v22 = vcombine.high %v69_v17, %v77_v18  ;;  %v84_v23 = vld [vmem:[%s4224_s1 + $0x180] sm:$0xff]  ;;  %v85_v25 = vld [vmem:[%s4224_s1 + $0x188] sm:$0xff]  ;;  %v2727_v27 = vcombine.low %v68_v14, %v76_v16  ;;  %v62_v11 = vld [vmem:[%s4224_s1 + $0xd0] sm:$0xff] }
   0x8   :  { %v92_v24 = vld [vmem:[%s4224_s1 + $0x1c0] sm:$0xff]  ;;  %v93_v26 = vld [vmem:[%s4224_s1 + $0x1c8] sm:$0xff]  ;;  %v2729_v28 = vcombine.low %v69_v17, %v77_v18  ;;  %v55_v13 = vld [vmem:[%s4224_s1 + $0x98] sm:$0xff]  ;;  %v2699_v15 = vcombine.low %v38_v63, %v46_v0  ;;  %v2701_v16 = vcombine.low %v39_v1, %v47_v2  ;;  %v2716_v17 = vcombine.high %v54_v10, %v62_v11 }
   0x9   :  { %v2744_v29 = vcombine.high %v84_v23, %v92_v24  ;;  %v2746_v30 = vcombine.high %v85_v25, %v93_v26  ;;  %v100_v31 = vld [vmem:[%s4224_s1 + $0x200] sm:$0xff]  ;;  %v101_v33 = vld [vmem:[%s4224_s1 + $0x208] sm:$0xff]  ;;  %v2743_v35 = vcombine.low %v84_v23, %v92_v24  ;;  %v2745_v36 = vcombine.low %v85_v25, %v93_v26  ;;  %v63_v14 = vld [vmem:[%s4224_s1 + $0xd8] sm:$0xff] }
   0xa   :  { %889 = vmatpush1.bf16.msra.mxu0 %v2711_v19  ;;  %932 = vmatpush1.bf16.msra.mxu1 %v2713_v20  ;;  %v108_v32 = vld [vmem:[%s4224_s1 + $0x240] sm:$0xff]  ;;  %v109_v34 = vld [vmem:[%s4224_s1 + $0x248] sm:$0xff]  ;;  %v2718_v18 = vcombine.high %v55_v13, %v63_v14  ;;  %v70_v19 = vld [vmem:[%s4224_s1 + $0x110] sm:$0xff]  ;;  %v2715_v23 = vcombine.low %v54_v10, %v62_v11  ;;  %v2717_v24 = vcombine.low %v55_v13, %v63_v14 }
   0xb   :  { %890 = vmatprep.subr.bf16.mxu0 %v2728_v21  ;;  %933 = vmatprep.subr.bf16.mxu1 %v2730_v22  ;;  %v2760_v37 = vcombine.high %v100_v31, %v108_v32  ;;  %v2762_v38 = vcombine.high %v101_v33, %v109_v34  ;;  %v116_v39 = vld [vmem:[%s4224_s1 + $0x280] sm:$0xff]  ;;  %v117_v41 = vld [vmem:[%s4224_s1 + $0x288] sm:$0xff]  ;;  %v2759_v43 = vcombine.low %v100_v31, %v108_v32  ;;  %v78_v20 = vld [vmem:[%s4224_s1 + $0x150] sm:$0xff] }
   0xc   :  { %v124_v40 = vld [vmem:[%s4224_s1 + $0x2c0] sm:$0xff]  ;;  %v125_v42 = vld [vmem:[%s4224_s1 + $0x2c8] sm:$0xff]  ;;  %v2761_v44 = vcombine.low %v101_v33, %v109_v34  ;;  %v71_v21 = vld [vmem:[%s4224_s1 + $0x118] sm:$0xff]  ;;  %v2732_v25 = vcombine.high %v70_v19, %v78_v20  ;;  %v2731_v31 = vcombine.low %v70_v19, %v78_v20 }
   0xd   :  { %v2776_v45 = vcombine.high %v116_v39, %v124_v40  ;;  %v2778_v46 = vcombine.high %v117_v41, %v125_v42  ;;  %v132_v47 = vld [vmem:[%s4224_s1 + $0x300] sm:$0xff]  ;;  %v133_v49 = vld [vmem:[%s4224_s1 + $0x308] sm:$0xff]  ;;  %v2775_v51 = vcombine.low %v116_v39, %v124_v40  ;;  %v2777_v52 = vcombine.low %v117_v41, %v125_v42  ;;  %v79_v22 = vld [vmem:[%s4224_s1 + $0x158] sm:$0xff] }
   0xe   :  { %891 = vmatpush1.bf16.msra.mxu0 %v2727_v27  ;;  %934 = vmatpush1.bf16.msra.mxu1 %v2729_v28  ;;  %v140_v48 = vld [vmem:[%s4224_s1 + $0x340] sm:$0xff]  ;;  %v141_v50 = vld [vmem:[%s4224_s1 + $0x348] sm:$0xff]  ;;  %v2734_v26 = vcombine.high %v71_v21, %v79_v22  ;;  %v86_v27 = vld [vmem:[%s4224_s1 + $0x190] sm:$0xff]  ;;  %v2733_v32 = vcombine.low %v71_v21, %v79_v22 }
   0xf   :  { %892 = vmatprep.subr.bf16.mxu0 %v2744_v29  ;;  %935 = vmatprep.subr.bf16.mxu1 %v2746_v30  ;;  %v2792_v53 = vcombine.high %v132_v47, %v140_v48  ;;  %v2794_v54 = vcombine.high %v133_v49, %v141_v50  ;;  %v148_v55 = vld [vmem:[%s4224_s1 + $0x380] sm:$0xff]  ;;  %v149_v57 = vld [vmem:[%s4224_s1 + $0x388] sm:$0xff]  ;;  %v2791_v59 = vcombine.low %v132_v47, %v140_v48  ;;  %v94_v28 = vld [vmem:[%s4224_s1 + $0x1d0] sm:$0xff] }
  0x10   :  { %v156_v56 = vld [vmem:[%s4224_s1 + $0x3c0] sm:$0xff]  ;;  %v157_v58 = vld [vmem:[%s4224_s1 + $0x3c8] sm:$0xff]  ;;  %v2793_v60 = vcombine.low %v133_v49, %v141_v50  ;;  %v87_v29 = vld [vmem:[%s4224_s1 + $0x198] sm:$0xff]  ;;  %v2748_v33 = vcombine.high %v86_v27, %v94_v28  ;;  %v2747_v39 = vcombine.low %v86_v27, %v94_v28 }
  0x11   :  { %v2808_v61 = vcombine.high %v148_v55, %v156_v56  ;;  %v2810_v62 = vcombine.high %v149_v57, %v157_v58  ;;  %v2807_v3 = vcombine.low %v148_v55, %v156_v56  ;;  %v28_v4 = vld [vmem:[%s4223_s0] sm:$0xff]  ;;  %v29_v5 = vld [vmem:[%s4223_s0 + $0x8] sm:$0xff]  ;;  %v2809_v6 = vcombine.low %v149_v57, %v157_v58  ;;  %v95_v30 = vld [vmem:[%s4224_s1 + $0x1d8] sm:$0xff] }
  0x12   :  { %893 = vmatpush1.bf16.msra.mxu0 %v2743_v35  ;;  %936 = vmatpush1.bf16.msra.mxu1 %v2745_v36  ;;  %v3458_v12 = vpack.c.bf16 %v29_v5, %v28_v4  ;;  %v2750_v34 = vcombine.high %v87_v29, %v95_v30  ;;  %v102_v35 = vld [vmem:[%s4224_s1 + $0x210] sm:$0xff]  ;;  %v2749_v41 = vcombine.low %v87_v29, %v95_v30  ;;  %v40_v0 = vld [vmem:[%s4224_s1 + $0x20] sm:$0xff]  ;;  %v41_v5 = vld [vmem:[%s4224_s1 + $0x28] sm:$0xff] }
  0x13   :  { %894 = vmatprep.subr.bf16.mxu0 %v2760_v37  ;;  %937 = vmatprep.subr.bf16.mxu1 %v2762_v38  ;;  %v110_v36 = vld [vmem:[%s4224_s1 + $0x250] sm:$0xff]  ;;  %v103_v37 = vld [vmem:[%s4224_s1 + $0x218] sm:$0xff]  ;;  %v64_v13 = vld [vmem:[%s4224_s1 + $0xe0] sm:$0xff] }
  0x14   :  { %v111_v38 = vld [vmem:[%s4224_s1 + $0x258] sm:$0xff]  ;;  %v118_v40 = vld [vmem:[%s4224_s1 + $0x290] sm:$0xff]  ;;  %v2764_v42 = vcombine.high %v102_v35, %v110_v36  ;;  %v2763_v47 = vcombine.low %v102_v35, %v110_v36  ;;  %v80_v19 = vld [vmem:[%s4224_s1 + $0x160] sm:$0xff] }
  0x15   :  { %v134_v48 = vld [vmem:[%s4224_s1 + $0x310] sm:$0xff]  ;;  %v2765_v49 = vcombine.low %v103_v37, %v111_v38  ;;  %v73_v22 = vld [vmem:[%s4224_s1 + $0x128] sm:$0xff]  ;;  %v96_v27 = vld [vmem:[%s4224_s1 + $0x1e0] sm:$0xff] }
  0x16   :  { %895 = vmatpush1.bf16.msra.mxu0 %v2759_v43  ;;  %938 = vmatpush1.bf16.msra.mxu1 %v2761_v44  ;;  %v126_v43 = vld [vmem:[%s4224_s1 + $0x2d0] sm:$0xff]  ;;  %v2766_v44 = vcombine.high %v103_v37, %v111_v38  ;;  %v89_v30 = vld [vmem:[%s4224_s1 + $0x1a8] sm:$0xff]  ;;  %v112_v35 = vld [vmem:[%s4224_s1 + $0x260] sm:$0xff] }
  0x17   :  { %896 = vmatprep.subr.bf16.mxu0 %v2776_v45  ;;  %939 = vmatprep.subr.bf16.mxu1 %v2778_v46  ;;  %v119_v45 = vld [vmem:[%s4224_s1 + $0x298] sm:$0xff]  ;;  %v2780_v50 = vcombine.high %v118_v40, %v126_v43  ;;  %v2779_v55 = vcombine.low %v118_v40, %v126_v43  ;;  %v150_v56 = vld [vmem:[%s4224_s1 + $0x390] sm:$0xff]  ;;  %v105_v38 = vld [vmem:[%s4224_s1 + $0x228] sm:$0xff] }
  0x18   :  { %v127_v46 = vld [vmem:[%s4224_s1 + $0x2d8] sm:$0xff]  ;;  %v128_v43 = vld [vmem:[%s4224_s1 + $0x2e0] sm:$0xff] }
  0x19   :  { %v2781_v57 = vcombine.low %v119_v45, %v127_v46 }
  0x1a   :  { %897 = vmatpush1.bf16.msra.mxu0 %v2775_v51  ;;  %940 = vmatpush1.bf16.msra.mxu1 %v2777_v52  ;;  %v142_v51 = vld [vmem:[%s4224_s1 + $0x350] sm:$0xff]  ;;  %v2782_v52 = vcombine.high %v119_v45, %v127_v46  ;;  %v121_v46 = vld [vmem:[%s4224_s1 + $0x2a8] sm:$0xff] }
  0x1b   :  { %898 = vmatprep.subr.bf16.mxu0 %v2792_v53  ;;  %941 = vmatprep.subr.bf16.mxu1 %v2794_v54  ;;  %v135_v53 = vld [vmem:[%s4224_s1 + $0x318] sm:$0xff]  ;;  %v2796_v58 = vcombine.high %v134_v48, %v142_v51  ;;  %v2795_v63 = vcombine.low %v134_v48, %v142_v51  ;;  %v144_v51 = vld [vmem:[%s4224_s1 + $0x360] sm:$0xff] }
  0x1c   :  { %v143_v54 = vld [vmem:[%s4224_s1 + $0x358] sm:$0xff] }
  0x1d   :  { %v2797_v1 = vcombine.low %v135_v53, %v143_v54 }
  0x1e   :  { %899 = vmatpush1.bf16.msra.mxu0 %v2791_v59  ;;  %942 = vmatpush1.bf16.msra.mxu1 %v2793_v60  ;;  %v158_v59 = vld [vmem:[%s4224_s1 + $0x3d0] sm:$0xff]  ;;  %v2798_v60 = vcombine.high %v135_v53, %v143_v54  ;;  %v137_v54 = vld [vmem:[%s4224_s1 + $0x328] sm:$0xff] }
  0x1f   :  { %900 = vmatprep.subr.bf16.mxu0 %v2808_v61  ;;  %943 = vmatprep.subr.bf16.mxu1 %v2810_v62  ;;  %v151_v61 = vld [vmem:[%s4224_s1 + $0x398] sm:$0xff]  ;;  %v2812_v2 = vcombine.high %v150_v56, %v158_v59 }
  0x20   :  { %v159_v62 = vld [vmem:[%s4224_s1 + $0x3d8] sm:$0xff] }
  0x21   :  { %v2814_v4 = vcombine.high %v151_v61, %v159_v62  ;;  %v2813_v10 = vcombine.low %v151_v61, %v159_v62  ;;  %v153_v62 = vld [vmem:[%s4224_s1 + $0x3a8] sm:$0xff] }
  0x22   :  { %901 = vmatpush1.bf16.msra.mxu0 %v2807_v3  ;;  %944 = vmatpush1.bf16.msra.mxu1 %v2809_v6  ;;  %v48_v3 = vld [vmem:[%s4224_s1 + $0x60] sm:$0xff]  ;;  %v49_v6 = vld [vmem:[%s4224_s1 + $0x68] sm:$0xff] }
  0x23   :  { %972 = vmatprep.subr.bf16.mxu0 %v2700_v7  ;;  %1015 = vmatprep.subr.bf16.mxu1 %v2702_v9  ;;  %v2811_v7 = vcombine.low %v150_v56, %v158_v59  ;;  %v56_v9 = vld [vmem:[%s4224_s1 + $0xa0] sm:$0xff]  ;;  %v2704_v11 = vcombine.high %v40_v0, %v48_v3  ;;  %v2706_v14 = vcombine.high %v41_v5, %v49_v6 }
  0x24   :  { %v2705_v20 = vcombine.low %v41_v5, %v49_v6  ;;  %v2720_v21 = vcombine.high %v56_v9, %v64_v13  ;;  %v160_v59 = vld [vmem:[%s4224_s1 + $0x3e0] sm:$0xff]  ;;  %v43_v6 = vld [vmem:[%s4224_s1 + $0x38] sm:$0xff] }
  0x25   :  { %919 = vmatmul.mubr.bf16.vlgmr.msra.gmra.mrb[0].mxu0 %v3458_v12  ;;  %962 = vmatmul.mubr.bf16.vlgmr.msra.gmra.mrb[0].mxu1 %v3458_v12 }
  0x26   :  { %973 = vmatpush1.bf16.msra.mxu0 %v2699_v15  ;;  %1016 = vmatpush1.bf16.msra.mxu1 %v2701_v16  ;;  %v57_v15 = vld [vmem:[%s4224_s1 + $0xa8] sm:$0xff] }
  0x27   :  { %974 = vmatprep.subr.bf16.mxu0 %v2716_v17  ;;  %1017 = vmatprep.subr.bf16.mxu1 %v2718_v18  ;;  %v65_v16 = vld [vmem:[%s4224_s1 + $0xe8] sm:$0xff]  ;;  %v2703_v17 = vcombine.low %v40_v0, %v48_v3  ;;  %v72_v18 = vld [vmem:[%s4224_s1 + $0x120] sm:$0xff]  ;;  %v50_v3 = vld [vmem:[%s4224_s1 + $0x70] sm:$0xff] }
  0x28   :  { %1004 = vmatprep.mubr.bf16.mxu0 %v3292_v8  ;;  %1047 = vmatprep.mubr.bf16.mxu1 %v3292_v8  ;;  %v2721_v28 = vcombine.low %v57_v15, %v65_v16  ;;  %v2736_v29 = vcombine.high %v72_v18, %v80_v19 }
  0x2a   :  { %975 = vmatpush1.bf16.msra.mxu0 %v2715_v23  ;;  %1018 = vmatpush1.bf16.msra.mxu1 %v2717_v24  ;;  %v81_v23 = vld [vmem:[%s4224_s1 + $0x168] sm:$0xff]  ;;  %v2722_v24 = vcombine.high %v57_v15, %v65_v16  ;;  %v59_v16 = vld [vmem:[%s4224_s1 + $0xb8] sm:$0xff] }
  0x2b   :  { %976 = vmatprep.subr.bf16.mxu0 %v2732_v25  ;;  %1019 = vmatprep.subr.bf16.mxu1 %v2734_v26  ;;  %v2719_v25 = vcombine.low %v56_v9, %v64_v13  ;;  %v88_v26 = vld [vmem:[%s4224_s1 + $0x1a0] sm:$0xff]  ;;  %v2737_v36 = vcombine.low %v73_v22, %v81_v23  ;;  %v66_v13 = vld [vmem:[%s4224_s1 + $0xf0] sm:$0xff] }
  0x2c   :  { %v2752_v37 = vcombine.high %v88_v26, %v96_v27 }
  0x2e   :  { %977 = vmatpush1.bf16.msra.mxu0 %v2731_v31  ;;  %1020 = vmatpush1.bf16.msra.mxu1 %v2733_v32  ;;  %v97_v31 = vld [vmem:[%s4224_s1 + $0x1e8] sm:$0xff]  ;;  %v2738_v32 = vcombine.high %v73_v22, %v81_v23 }
  0x2f   :  { %978 = vmatprep.subr.bf16.mxu0 %v2748_v33  ;;  %1021 = vmatprep.subr.bf16.mxu1 %v2750_v34  ;;  %v2735_v33 = vcombine.low %v72_v18, %v80_v19  ;;  %v104_v34 = vld [vmem:[%s4224_s1 + $0x220] sm:$0xff]  ;;  %v2754_v40 = vcombine.high %v89_v30, %v97_v31 }
  0x30   :  { %v2768_v45 = vcombine.high %v104_v34, %v112_v35 }
  0x32   :  { %979 = vmatpush1.bf16.msra.mxu0 %v2747_v39  ;;  %1022 = vmatpush1.bf16.msra.mxu1 %v2749_v41  ;;  %v113_v39 = vld [vmem:[%s4224_s1 + $0x268] sm:$0xff]  ;;  %v2751_v41 = vcombine.low %v88_v26, %v96_v27 }
  0x33   :  { %980 = vmatprep.subr.bf16.mxu0 %v2764_v42  ;;  %1023 = vmatprep.subr.bf16.mxu1 %v2766_v44  ;;  %v120_v42 = vld [vmem:[%s4224_s1 + $0x2a0] sm:$0xff]  ;;  %v2753_v44 = vcombine.low %v89_v30, %v97_v31  ;;  %v2770_v48 = vcombine.high %v105_v38, %v113_v39 }
  0x34   :  { %v2784_v53 = vcombine.high %v120_v42, %v128_v43 }
  0x36   :  { %981 = vmatpush1.bf16.msra.mxu0 %v2763_v47  ;;  %1024 = vmatpush1.bf16.msra.mxu1 %v2765_v49  ;;  %v129_v47 = vld [vmem:[%s4224_s1 + $0x2e8] sm:$0xff]  ;;  %v2767_v49 = vcombine.low %v104_v34, %v112_v35 }
  0x37   :  { %982 = vmatprep.subr.bf16.mxu0 %v2780_v50  ;;  %1025 = vmatprep.subr.bf16.mxu1 %v2782_v52  ;;  %v136_v50 = vld [vmem:[%s4224_s1 + $0x320] sm:$0xff]  ;;  %v2769_v52 = vcombine.low %v105_v38, %v113_v39  ;;  %v2786_v56 = vcombine.high %v121_v46, %v129_v47 }
  0x38   :  { %v2800_v61 = vcombine.high %v136_v50, %v144_v51 }
  0x3a   :  { %983 = vmatpush1.bf16.msra.mxu0 %v2779_v55  ;;  %1026 = vmatpush1.bf16.msra.mxu1 %v2781_v57  ;;  %v145_v55 = vld [vmem:[%s4224_s1 + $0x368] sm:$0xff]  ;;  %v2783_v57 = vcombine.low %v120_v42, %v128_v43  ;;  %v122_v43 = vld [vmem:[%s4224_s1 + $0x2b0] sm:$0xff] }
  0x3b   :  { %984 = vmatprep.subr.bf16.mxu0 %v2796_v58  ;;  %1027 = vmatprep.subr.bf16.mxu1 %v2798_v60  ;;  %v152_v58 = vld [vmem:[%s4224_s1 + $0x3a0] sm:$0xff]  ;;  %v2785_v60 = vcombine.low %v121_v46, %v129_v47  ;;  %v2802_v0 = vcombine.high %v137_v54, %v145_v55  ;;  %v123_v47 = vld [vmem:[%s4224_s1 + $0x2b8] sm:$0xff] }
  0x3c   :  { %v2816_v5 = vcombine.high %v152_v58, %v160_v59 }
  0x3e   :  { %985 = vmatpush1.bf16.msra.mxu0 %v2795_v63  ;;  %1028 = vmatpush1.bf16.msra.mxu1 %v2797_v1  ;;  %v161_v63 = vld [vmem:[%s4224_s1 + $0x3e8] sm:$0xff]  ;;  %v2799_v1 = vcombine.low %v136_v50, %v144_v51  ;;  %v138_v51 = vld [vmem:[%s4224_s1 + $0x330] sm:$0xff] }
  0x3f   :  { %986 = vmatprep.subr.bf16.mxu0 %v2812_v2  ;;  %1029 = vmatprep.subr.bf16.mxu1 %v2814_v4  ;;  %v42_v2 = vld [vmem:[%s4224_s1 + $0x30] sm:$0xff]  ;;  %v2801_v4 = vcombine.low %v137_v54, %v145_v55  ;;  %v2818_v9 = vcombine.high %v153_v62, %v161_v63  ;;  %v139_v55 = vld [vmem:[%s4224_s1 + $0x338] sm:$0xff] }
  0x40   :  { %v2708_v15 = vcombine.high %v42_v2, %v50_v3  ;;  %v2707_v19 = vcombine.low %v42_v2, %v50_v3 }
  0x42   :  { %987 = vmatpush1.bf16.msra.mxu0 %v2811_v7  ;;  %1030 = vmatpush1.bf16.msra.mxu1 %v2813_v10  ;;  %v51_v7 = vld [vmem:[%s4224_s1 + $0x78] sm:$0xff]  ;;  %v2815_v10 = vcombine.low %v152_v58, %v160_v59  ;;  %v154_v59 = vld [vmem:[%s4224_s1 + $0x3b0] sm:$0xff] }
  0x43   :  { %1058 = vmatprep.subr.bf16.mxu0 %v2704_v11  ;;  %1101 = vmatprep.subr.bf16.mxu1 %v2706_v14  ;;  %v58_v11 = vld [vmem:[%s4224_s1 + $0xb0] sm:$0xff]  ;;  %v2817_v14 = vcombine.low %v153_v62, %v161_v63  ;;  %v2710_v18 = vcombine.high %v43_v6, %v51_v7  ;;  %v2709_v22 = vcombine.low %v43_v6, %v51_v7  ;;  %v155_v63 = vld [vmem:[%s4224_s1 + $0x3b8] sm:$0xff] }
  0x44   :  { %v2724_v23 = vcombine.high %v58_v11, %v66_v13  ;;  %v2723_v27 = vcombine.low %v58_v11, %v66_v13  ;;  %v162_v62 = vld [vmem:[%s4224_s1 + $0x3f0] sm:$0xff]  ;;  %v3136_v11 = vld [vmem:[%s4226_s3] sm:$0xff]  }
  0x45   :  { %1005 = vmatmul.mubr.bf16.vlgmr.msra.gmra.mrb[4].mxu0 %v3458_v12  ;;  %1048 = vmatmul.mubr.bf16.vlgmr.msra.gmra.mrb[4].mxu1 %v3458_v12  ;;  %v2819_v6 = vcombine.low %v154_v59, %v162_v62  ;;  %v3137_v13 = vld [vmem:[%s4226_s3 + $0x80] sm:$0xff]  }
  0x46   :  { %1059 = vmatpush1.bf16.msra.mxu0 %v2703_v17  ;;  %1102 = vmatpush1.bf16.msra.mxu1 %v2705_v20  ;;  %v67_v17 = vld [vmem:[%s4224_s1 + $0xf8] sm:$0xff]  ;;  %v74_v20 = vld [vmem:[%s4224_s1 + $0x130] sm:$0xff] }
  0x47   :  { %1060 = vmatprep.subr.bf16.mxu0 %v2720_v21  ;;  %1103 = vmatprep.subr.bf16.mxu1 %v2722_v24  ;;  %v82_v21 = vld [vmem:[%s4224_s1 + $0x170] sm:$0xff]  ;;  %v75_v24 = vld [vmem:[%s4224_s1 + $0x138] sm:$0xff]  ;;  %v2726_v26 = vcombine.high %v59_v16, %v67_v17  ;;  %v2725_v30 = vcombine.low %v59_v16, %v67_v17  ;;  %v3140_v16 = vld [vmem:[%s4226_s3 + $0x8] sm:$0xff]  }
  0x48   :  { %1090 = vmatprep.mubr.bf16.mxu0 %v3292_v8  ;;  %1133 = vmatprep.mubr.bf16.mxu1 %v3292_v8  ;;  %v2740_v31 = vcombine.high %v74_v20, %v82_v21  ;;  %v2739_v35 = vcombine.low %v74_v20, %v82_v21  ;;  %v3141_v17 = vld [vmem:[%s4226_s3 + $0x88] sm:$0xff]   ;;  %v3144_v20 = vld [vmem:[%s4226_s3 + $0x10] sm:$0xff]   ;;  %v3146_v21 = vld [vmem:[%s4226_s3 + $0x58] sm:$0xff]  }
  0x4a   :  { %1061 = vmatpush1.bf16.msra.mxu0 %v2719_v25  ;;  %1104 = vmatpush1.bf16.msra.mxu1 %v2721_v28  ;;  %v83_v25 = vld [vmem:[%s4224_s1 + $0x178] sm:$0xff]  ;;  %v90_v28 = vld [vmem:[%s4224_s1 + $0x1b0] sm:$0xff] }
  0x4b   :  { %1062 = vmatprep.subr.bf16.mxu0 %v2736_v29  ;;  %1105 = vmatprep.subr.bf16.mxu1 %v2738_v32  ;;  %v98_v29 = vld [vmem:[%s4224_s1 + $0x1f0] sm:$0xff]  ;;  %v91_v32 = vld [vmem:[%s4224_s1 + $0x1b8] sm:$0xff]  ;;  %v2742_v34 = vcombine.high %v75_v24, %v83_v25  ;;  %v2741_v38 = vcombine.low %v75_v24, %v83_v25  ;;  %v3150_v25 = vld [vmem:[%s4226_s3 + $0x60] sm:$0xff]  }
  0x4c   :  { %v2756_v39 = vcombine.high %v90_v28, %v98_v29  ;;  %v2755_v42 = vcombine.low %v90_v28, %v98_v29  ;;  %v3149_v24 = vld [vmem:[%s4226_s3 + $0x98] sm:$0xff]   ;;  %v3153_v28 = vld [vmem:[%s4226_s3 + $0xa0] sm:$0xff]   ;;  %v3154_v29 = vld [vmem:[%s4226_s3 + $0x68] sm:$0xff]  }
  0x4e   :  { %1063 = vmatpush1.bf16.msra.mxu0 %v2735_v33  ;;  %1106 = vmatpush1.bf16.msra.mxu1 %v2737_v36  ;;  %v99_v33 = vld [vmem:[%s4224_s1 + $0x1f8] sm:$0xff]  ;;  %v106_v36 = vld [vmem:[%s4224_s1 + $0x230] sm:$0xff] }
  0x4f   :  { %1064 = vmatprep.subr.bf16.mxu0 %v2752_v37  ;;  %1107 = vmatprep.subr.bf16.mxu1 %v2754_v40  ;;  %v114_v37 = vld [vmem:[%s4224_s1 + $0x270] sm:$0xff]  ;;  %v107_v40 = vld [vmem:[%s4224_s1 + $0x238] sm:$0xff] }
  0x50   :  { %v2772_v46 = vcombine.high %v106_v36, %v114_v37  ;;  %v2771_v50 = vcombine.low %v106_v36, %v114_v37 }
  0x52   :  { %1065 = vmatpush1.bf16.msra.mxu0 %v2751_v41  ;;  %1108 = vmatpush1.bf16.msra.mxu1 %v2753_v44  ;;  %v2758_v41 = vcombine.high %v91_v32, %v99_v33  ;;  %v130_v44 = vld [vmem:[%s4224_s1 + $0x2f0] sm:$0xff] }
  0x53   :  { %1066 = vmatprep.subr.bf16.mxu0 %v2768_v45  ;;  %1109 = vmatprep.subr.bf16.mxu1 %v2770_v48  ;;  %v2757_v45 = vcombine.low %v91_v32, %v99_v33  ;;  %v131_v48 = vld [vmem:[%s4224_s1 + $0x2f8] sm:$0xff]  ;;  %v2788_v54 = vcombine.high %v122_v43, %v130_v44  ;;  %v2787_v58 = vcombine.low %v122_v43, %v130_v44 }
  0x56   :  { %1067 = vmatpush1.bf16.msra.mxu0 %v2767_v49  ;;  %1110 = vmatpush1.bf16.msra.mxu1 %v2769_v52  ;;  %v146_v52 = vld [vmem:[%s4224_s1 + $0x370] sm:$0xff] }
  0x57   :  { %1068 = vmatprep.subr.bf16.mxu0 %v2784_v53  ;;  %1111 = vmatprep.subr.bf16.mxu1 %v2786_v56  ;;  %v147_v56 = vld [vmem:[%s4224_s1 + $0x378] sm:$0xff]  ;;  %v2803_v2 = vcombine.low %v138_v51, %v146_v52 }
  0x58   :  { %v2805_v3 = vcombine.low %v139_v55, %v147_v56 }
  0x5a   :  { %1069 = vmatpush1.bf16.msra.mxu0 %v2783_v57  ;;  %1112 = vmatpush1.bf16.msra.mxu1 %v2785_v60  ;;  %v2790_v57 = vcombine.high %v123_v47, %v131_v48  ;;  %v2789_v60 = vcombine.low %v123_v47, %v131_v48 }
  0x5b   :  { %1070 = vmatprep.subr.bf16.mxu0 %v2800_v61  ;;  %1113 = vmatprep.subr.bf16.mxu1 %v2802_v0  ;;  %v2804_v61 = vcombine.high %v138_v51, %v146_v52  ;;  %v2806_v0 = vcombine.high %v139_v55, %v147_v56 }
  0x5e   :  { %1071 = vmatpush1.bf16.msra.mxu0 %v2799_v1  ;;  %1114 = vmatpush1.bf16.msra.mxu1 %v2801_v4  ;;  %v163_v1 = vld [vmem:[%s4224_s1 + $0x3f8] sm:$0xff]  ;;  %v2820_v4 = vcombine.high %v154_v59, %v162_v62 }
  0x5f   :  { %1072 = vmatprep.subr.bf16.mxu0 %v2816_v5  ;;  %1115 = vmatprep.subr.bf16.mxu1 %v2818_v9  ;;  %v2822_v5 = vcombine.high %v155_v63, %v163_v1  ;;  %v2821_v7 = vcombine.low %v155_v63, %v163_v1  ;;  %v3134_v9 = vld [vmem:[%s4226_s3 + $0x40] sm:$0xff]  }
  0x62   :  { %1073 = vmatpush1.bf16.msra.mxu0 %v2815_v10  ;;  %1116 = vmatpush1.bf16.msra.mxu1 %v2817_v14  ;;  %v3135_v10 = vld [vmem:[%s4226_s3 + $0xc0] sm:$0xff]   ;;  %v3138_v14 = vld [vmem:[%s4226_s3 + $0x48] sm:$0xff]  }
  0x63   :  { %1144 = vmatprep.subr.bf16.mxu0 %v2708_v15  ;;  %1187 = vmatprep.subr.bf16.mxu1 %v2710_v18  ;;  %v3139_v15 = vld [vmem:[%s4226_s3 + $0xc8] sm:$0xff]   ;;  %v3142_v18 = vld [vmem:[%s4226_s3 + $0x50] sm:$0xff]  }
  0x65   :  { %1091 = vmatmul.mubr.bf16.vlgmr.msra.gmra.mrb[8].mxu0 %v3458_v12  ;;  %1134 = vmatmul.mubr.bf16.vlgmr.msra.gmra.mrb[8].mxu1 %v3458_v12 }
  0x66   :  { %1145 = vmatpush1.bf16.msra.mxu0 %v2707_v19  ;;  %1188 = vmatpush1.bf16.msra.mxu1 %v2709_v22  ;;  %v3143_v19 = vld [vmem:[%s4226_s3 + $0xd0] sm:$0xff]   ;;  %v3147_v22 = vld [vmem:[%s4226_s3 + $0xd8] sm:$0xff]  }
  0x67   :  { %1146 = vmatprep.subr.bf16.mxu0 %v2724_v23  ;;  %1189 = vmatprep.subr.bf16.mxu1 %v2726_v26  ;;  %v3148_v23 = vld [vmem:[%s4226_s3 + $0x18] sm:$0xff]   ;;  %v3151_v26 = vld [vmem:[%s4226_s3 + $0xe0] sm:$0xff]  }
  0x68   :  { %1176 = vmatprep.mubr.bf16.mxu0 %v3292_v8  ;;  %1219 = vmatprep.mubr.bf16.mxu1 %v3292_v8  ;;  %v115_v8 = vld [vmem:[%s4224_s1 + $0x278] sm:$0xff] }
  0x69   :  { %v2774_v49 = vcombine.high %v107_v40, %v115_v8  ;;  %v2773_v53 = vcombine.low %v107_v40, %v115_v8 }
  0x6a   :  { %1147 = vmatpush1.bf16.msra.mxu0 %v2723_v27  ;;  %1190 = vmatpush1.bf16.msra.mxu1 %v2725_v30  ;;  %v3152_v27 = vld [vmem:[%s4226_s3 + $0x20] sm:$0xff]   ;;  %v3155_v30 = vld [vmem:[%s4226_s3 + $0xe8] sm:$0xff]  }
  0x6b   :  { %1148 = vmatprep.subr.bf16.mxu0 %v2740_v31  ;;  %1191 = vmatprep.subr.bf16.mxu1 %v2742_v34 }
  0x6e   :  { %1149 = vmatpush1.bf16.msra.mxu0 %v2739_v35  ;;  %1192 = vmatpush1.bf16.msra.mxu1 %v2741_v38 }
  0x6f   :  { %1150 = vmatprep.subr.bf16.mxu0 %v2756_v39  ;;  %1193 = vmatprep.subr.bf16.mxu1 %v2758_v41 }
  0x72   :  { %1151 = vmatpush1.bf16.msra.mxu0 %v2755_v42  ;;  %1194 = vmatpush1.bf16.msra.mxu1 %v2757_v45 }
  0x73   :  { %1152 = vmatprep.subr.bf16.mxu0 %v2772_v46  ;;  %1195 = vmatprep.subr.bf16.mxu1 %v2774_v49 }
  0x76   :  { %1153 = vmatpush1.bf16.msra.mxu0 %v2771_v50  ;;  %1196 = vmatpush1.bf16.msra.mxu1 %v2773_v53 }
  0x77   :  { %1154 = vmatprep.subr.bf16.mxu0 %v2788_v54  ;;  %1197 = vmatprep.subr.bf16.mxu1 %v2790_v57 }
  0x7a   :  { %1155 = vmatpush1.bf16.msra.mxu0 %v2787_v58  ;;  %1198 = vmatpush1.bf16.msra.mxu1 %v2789_v60 }
  0x7b   :  { %1156 = vmatprep.subr.bf16.mxu0 %v2804_v61  ;;  %1199 = vmatprep.subr.bf16.mxu1 %v2806_v0 }
  0x7e   :  { %1157 = vmatpush1.bf16.msra.mxu0 %v2803_v2  ;;  %1200 = vmatpush1.bf16.msra.mxu1 %v2805_v3 }
  0x7f   :  { %1158 = vmatprep.subr.bf16.mxu0 %v2820_v4  ;;  %1201 = vmatprep.subr.bf16.mxu1 %v2822_v5 }
  0x82   :  { %1159 = vmatpush1.bf16.msra.mxu0 %v2819_v6  ;;  %1202 = vmatpush1.bf16.msra.mxu1 %v2821_v7 }
  0x83   :  { %2954 = vmatprep.subr.bf16.mxu0 %v3134_v9  ;;  %2976 = vmatprep.subr.bf16.mxu1 %v3135_v10 }
  0x85   :  { %1177 = vmatmul.mubr.bf16.vlgmr.msra.gmra.mrb[12].mxu0 %v3458_v12  ;;  %1220 = vmatmul.mubr.bf16.vlgmr.msra.gmra.mrb[12].mxu1 %v3458_v12  ;;  %v3145_v12 = vld [vmem:[%s4226_s3 + $0x90] sm:$0xff]  }
  0x86   :  { %2955 = vmatpush3.bf16.msra.mxu0 %v3136_v11  ;;  %2977 = vmatpush3.bf16.msra.mxu1 %v3137_v13 }
  0x87   :  { %2956 = vmatprep.subr.bf16.mxu0 %v3138_v14  ;;  %2978 = vmatprep.subr.bf16.mxu1 %v3139_v15 }
  0x8a   :  { %2957 = vmatpush3.bf16.msra.mxu0 %v3140_v16  ;;  %2979 = vmatpush3.bf16.msra.mxu1 %v3141_v17 }
  0x8b   :  { %2958 = vmatprep.subr.bf16.mxu0 %v3142_v18  ;;  %2980 = vmatprep.subr.bf16.mxu1 %v3143_v19 }
  0x8e   :  { %2959 = vmatpush3.bf16.msra.mxu0 %v3144_v20  ;;  %2981 = vmatpush3.bf16.msra.mxu1 %v3145_v12 }
  0x8f   :  { %2960 = vmatprep.subr.bf16.mxu0 %v3146_v21  ;;  %2982 = vmatprep.subr.bf16.mxu1 %v3147_v22 }
  0x92   :  { %2961 = vmatpush3.bf16.msra.mxu0 %v3148_v23  ;;  %2983 = vmatpush3.bf16.msra.mxu1 %v3149_v24 }
  0x93   :  { %2962 = vmatprep.subr.bf16.mxu0 %v3150_v25  ;;  %2984 = vmatprep.subr.bf16.mxu1 %v3151_v26 }
  0x94   :  { %12 = vsyncpa [#allocation3], 0  ;;  %v3156_v31 = vld [vmem:[%s4226_s3 + $0x28] sm:$0xff]   ;;  %v3158_v33 = vld [vmem:[%s4226_s3 + $0x70] sm:$0xff]   ;;  %v166_v42 = vlaneseq  ;;  %s3293_s30 = smov [#allocation2]  }
  0x95   :  { %v3157_v32 = vld [vmem:[%s4226_s3 + $0xa8] sm:$0xff]   ;;  %v3159_v34 = vld [vmem:[%s4226_s3 + $0xf0] sm:$0xff]   ;;  %v3162_v37 = vld [vmem:[%s4226_s3 + $0x78] sm:$0xff]   ;;  %s2684_s8 = sshll.u32 %s3293_s30, 4  ;;  %s2685_s8 = int_to_ptr.vmem [resolvable:$true] %s2684_s8 }
  0x96   :  { %2963 = vmatpush3.bf16.msra.mxu0 %v3152_v27  ;;  %2985 = vmatpush3.bf16.msra.mxu1 %v3153_v28  ;;  %v3160_v35 = vld [vmem:[%s4226_s3 + $0x30] sm:$0xff]   ;;  %v3163_v38 = vld [vmem:[%s4226_s3 + $0xf8] sm:$0xff]   ;;  %v3166_v8 = vld [vmem:[%s4226_s3 + $0x140] sm:$0xff]   ;;  %v3846_v43 = vshrl.u32 %v166_v42, 7  ;;  %s3268_s9 = scalar_lea.vmem %s2685_s8, 256  ;;  %p3273_p1 = scmp.lt.s32.totalorder %s2685_s8, %s2685_s8 }
  0x97   :  { %2964 = vmatprep.subr.bf16.mxu0 %v3154_v29  ;;  %2986 = vmatprep.subr.bf16.mxu1 %v3155_v30  ;;  %v3161_v36 = vld [vmem:[%s4226_s3 + $0xb0] sm:$0xff]   ;;  %v3164_v39 = vld [vmem:[%s4226_s3 + $0x38] sm:$0xff]   ;;  %v3167_v41 = vld [vmem:[%s4226_s3 + $0x1c0] sm:$0xff]   ;;  %p3269_p0 = scmp.ne.s32.totalorder %s2685_s8, %s3268_s9  ;;  %p3274_p2 = scmp.lt.s32.totalorder %s3268_s9, %s3268_s9 }
  0x98   :  { %v3165_v40 = vld [vmem:[%s4226_s3 + $0xb8] sm:$0xff]   ;;  %v168_v44 = vsub.s32 0, %v3846_v43  ;;  %v3852_v45 = vld [vmem:[%s4225_s2] sm:$0xff]  ;;  %v176_v46 = vsub.s32 2, %v3846_v43  ;;  %v172_v47 = vsub.s32 1, %v3846_v43  ;;  %v180_v48 = vsub.s32 3, %v3846_v43 }
  0x99   :  { %v3168_v18 = vld [vmem:[%s4226_s3 + $0x100] sm:$0xff]   ;;  %v3170_v12 = vld [vmem:[%s4226_s3 + $0x148] sm:$0xff]   ;;  %v3174_v24 = vld [vmem:[%s4226_s3 + $0x150] sm:$0xff]   ;;  %p3275_p3 = por %p3274_p2, %p3273_p1 }
  0x9a   :  { %2965 = vmatpush3.bf16.msra.mxu0 %v3156_v31  ;;  %2987 = vmatpush3.bf16.msra.mxu1 %v3157_v32  ;;  %v169_v49 = vrot.slane %v3852_v45, %v168_v44  ;;  %v177_v50 = vrot.slane %v3852_v45, %v176_v46  ;;  %v173_v51 = vrot.slane %v3852_v45, %v172_v47  ;;  %v3169_v20 = vld [vmem:[%s4226_s3 + $0x180] sm:$0xff]   ;;  %v3171_v21 = vld [vmem:[%s4226_s3 + $0x1c8] sm:$0xff]   ;;  %v3175_v25 = vld [vmem:[%s4226_s3 + $0x1d0] sm:$0xff]  }
  0x9b   :  { %2966 = vmatprep.subr.bf16.mxu0 %v3158_v33  ;;  %2988 = vmatprep.subr.bf16.mxu1 %v3159_v34  ;;  %v181_v52 = vrot.slane %v3852_v45, %v180_v48  ;;  %v3172_v22 = vld [vmem:[%s4226_s3 + $0x108] sm:$0xff]   ;;  %v3176_v26 = vld [vmem:[%s4226_s3 + $0x110] sm:$0xff]   ;;  %v3178_v28 = vld [vmem:[%s4226_s3 + $0x158] sm:$0xff]   ;;  %p3276_p4 = pnand %p3275_p3, %p3269_p0 }
  0x9c   :  { %v3173_v23 = vld [vmem:[%s4226_s3 + $0x188] sm:$0xff]   ;;  %v3177_v27 = vld [vmem:[%s4226_s3 + $0x190] sm:$0xff]   ;;  %v3179_v29 = vld [vmem:[%s4226_s3 + $0x1d8] sm:$0xff]  }
  0x9d   :  { %v3180_v30 = vld [vmem:[%s4226_s3 + $0x118] sm:$0xff]   ;;  %v3182_v32 = vld [vmem:[%s4226_s3 + $0x160] sm:$0xff]  }
  0x9e   :  { %2967 = vmatpush3.bf16.msra.mxu0 %v3160_v35  ;;  %2989 = vmatpush3.bf16.msra.mxu1 %v3161_v36  ;;  %v3181_v31 = vld [vmem:[%s4226_s3 + $0x198] sm:$0xff]   ;;  %v3183_v33 = vld [vmem:[%s4226_s3 + $0x1e0] sm:$0xff]   ;;  %v3186_v36 = vld [vmem:[%s4226_s3 + $0x168] sm:$0xff]  }
  0x9f   :  { %2968 = vmatprep.subr.bf16.mxu0 %v3162_v37  ;;  %2990 = vmatprep.subr.bf16.mxu1 %v3163_v38  ;;  %v3184_v34 = vld [vmem:[%s4226_s3 + $0x120] sm:$0xff]   ;;  %v184_v37 = vsub.s32 4, %v3846_v43  ;;  %v3187_v38 = vld [vmem:[%s4226_s3 + $0x1e8] sm:$0xff]  }
  0xa0   :  { %v3185_v35 = vld [vmem:[%s4226_s3 + $0x1a0] sm:$0xff]  }
  0xa1   :  { %v185_v42 = vrot.slane %v3852_v45, %v184_v37 }
  0xa2   :  { %2969 = vmatpush3.bf16.msra.mxu0 %v3164_v39  ;;  %2991 = vmatpush3.bf16.msra.mxu1 %v3165_v40  ;;  %v192_v39 = vsub.s32 6, %v3846_v43  ;;  %v188_v40 = vsub.s32 5, %v3846_v43 }
  0xa3   :  { %2998 = vmatprep.subr.bf16.mxu0 %v3166_v8  ;;  %3020 = vmatprep.subr.bf16.mxu1 %v3167_v41  ;;  %v196_v8 = vsub.s32 7, %v3846_v43  ;;  %v3188_v41 = vld [vmem:[%s4226_s3 + $0x128] sm:$0xff]   ;;  %v3258_v43 = vld [vmem:[%s4226_s3 + $0x378] sm:$0xff]  }
  0xf8   :  { %v920_v53 = vpop.f32.mrb[0].mxu0  ;;  %v963_v55 = vpop.f32.mrb[0].mxu1 }
  0xf9   :  { %v921_v54 = vadd.f32 %v920_v53, %v169_v49  ;;  %v922_v56 = vpop.f32.mrb[1].mxu0  ;;  %v964_v57 = vadd.f32 %v963_v55, %v177_v50  ;;  %v965_v59 = vpop.f32.mrb[1].mxu1  ;;  %v3191_v53 = vld [vmem:[%s4226_s3 + $0x1f0] sm:$0xff]  }
  0xfa   :  { %v923_v58 = vadd.f32 %v922_v56, %v173_v51  ;;  %v924_v60 = vpop.f32.mrb[2].mxu0  ;;  %v966_v62 = vadd.f32 %v965_v59, %v181_v52  ;;  %v967_v0 = vpop.f32.mrb[2].mxu1  ;;  %v3192_v56 = vld [vmem:[%s4226_s3 + $0x130] sm:$0xff]  }
  0xfb   :  { %v1230_v61 = vmax.f32 %v921_v54, 0.0  ;;  %v925_v63 = vadd.f32 %v924_v60, %v169_v49  ;;  %v926_v1 = vpop.f32.mrb[3].mxu0  ;;  %v1232_v2 = vmax.f32 %v964_v57, 0.0  ;;  %v968_v3 = vadd.f32 %v967_v0, %v177_v50  ;;  %v969_v5 = vpop.f32.mrb[3].mxu1  ;;  %v3189_v49 = vld [vmem:[%s4226_s3 + $0x1a8] sm:$0xff]   ;;  %v3190_v50 = vld [vmem:[%s4226_s3 + $0x170] sm:$0xff]  }
  0xfc   :  { %v927_v4 = vadd.f32 %v926_v1, %v173_v51  ;;  %v1233_v6 = vmax.f32 %v966_v62, 0.0  ;;  %v970_v9 = vadd.f32 %v969_v5, %v181_v52  ;;  %v1231_v10 = vmax.f32 %v923_v58, 0.0  ;;  %v3193_v60 = vld [vmem:[%s4226_s3 + $0x1b0] sm:$0xff]   ;;  %v3195_v1 = vld [vmem:[%s4226_s3 + $0x1f8] sm:$0xff]  }
  0xfd   :  { %v1246_v7 = vmax.f32 %v925_v63, 0.0  ;;  %v1248_v11 = vmax.f32 %v968_v3, 0.0  ;;  %v193_v51 = vrot.slane %v3852_v45, %v192_v39  ;;  %v189_v52 = vrot.slane %v3852_v45, %v188_v40 }
  0xfe   :  { %v1247_v13 = vmax.f32 %v927_v4, 0.0  ;;  %v1249_v15 = vmax.f32 %v970_v9, 0.0  ;;  %v197_v54 = vrot.slane %v3852_v45, %v196_v8 }
  0xff   :  { %v1262_v14 = vpack.c.bf16 %v1246_v7, %v1230_v61  ;;  %v1264_v16 = vpack.c.bf16 %v1248_v11, %v1232_v2  ;;  %v3194_v61 = vld [vmem:[%s4226_s3 + $0x178] sm:$0xff]  }
 0x100   :  { %v1263_v17 = vpack.c.bf16 %v1247_v13, %v1231_v10  ;;  %v1265_v19 = vpack.c.bf16 %v1249_v15, %v1233_v6  ;;  %v3196_v13 = vld [vmem:[%s4226_s3 + $0x138] sm:$0xff]  }
 0x102   :  { %2340 = vmatprep.mubr.bf16.mxu0 %v1263_v17  ;;  %2381 = vmatprep.mubr.bf16.mxu1 %v1265_v19  ;;  %v3197_v17 = vld [vmem:[%s4226_s3 + $0x1b8] sm:$0xff]  }
 0x103   :  { %2341 = vmatmul.mubr.bf16.vlgmr.msra.gmra.mrb[16].mxu0 %v1262_v14  ;;  %2382 = vmatmul.mubr.bf16.vlgmr.msra.gmra.mrb[16].mxu1 %v1264_v16 }
 0x104   :  { %2999 = vmatpush3.bf16.msra.mxu0 %v3168_v18  ;;  %3021 = vmatpush3.bf16.msra.mxu1 %v3169_v20  ;;  %v3198_v18 = vld [vmem:[%s4226_s3 + $0x240] sm:$0xff]  }
 0x105   :  { %3000 = vmatprep.subr.bf16.mxu0 %v3170_v12  ;;  %3022 = vmatprep.subr.bf16.mxu1 %v3171_v21  ;;  %v3199_v21 = vld [vmem:[%s4226_s3 + $0x2c0] sm:$0xff]  }
 0x108   :  { %3001 = vmatpush3.bf16.msra.mxu0 %v3172_v22  ;;  %3023 = vmatpush3.bf16.msra.mxu1 %v3173_v23 }
 0x109   :  { %3002 = vmatprep.subr.bf16.mxu0 %v3174_v24  ;;  %3024 = vmatprep.subr.bf16.mxu1 %v3175_v25 }
 0x10c   :  { %3003 = vmatpush3.bf16.msra.mxu0 %v3176_v26  ;;  %3025 = vmatpush3.bf16.msra.mxu1 %v3177_v27  ;;  %v3200_v26 = vld [vmem:[%s4226_s3 + $0x200] sm:$0xff]  }
 0x10d   :  { %3004 = vmatprep.subr.bf16.mxu0 %v3178_v28  ;;  %3026 = vmatprep.subr.bf16.mxu1 %v3179_v29  ;;  %v3201_v28 = vld [vmem:[%s4226_s3 + $0x280] sm:$0xff]   ;;  %v3202_v29 = vld [vmem:[%s4226_s3 + $0x248] sm:$0xff]  }
 0x110   :  { %3005 = vmatpush3.bf16.msra.mxu0 %v3180_v30  ;;  %3027 = vmatpush3.bf16.msra.mxu1 %v3181_v31  ;;  %v3203_v30 = vld [vmem:[%s4226_s3 + $0x2c8] sm:$0xff]  }
 0x111   :  { %3006 = vmatprep.subr.bf16.mxu0 %v3182_v32  ;;  %3028 = vmatprep.subr.bf16.mxu1 %v3183_v33  ;;  %v3204_v31 = vld [vmem:[%s4226_s3 + $0x208] sm:$0xff]   ;;  %v3206_v33 = vld [vmem:[%s4226_s3 + $0x250] sm:$0xff]  }
 0x112   :  { %v3205_v32 = vld [vmem:[%s4226_s3 + $0x288] sm:$0xff]  }
 0x114   :  { %3007 = vmatpush3.bf16.msra.mxu0 %v3184_v34  ;;  %3029 = vmatpush3.bf16.msra.mxu1 %v3185_v35  ;;  %v3207_v34 = vld [vmem:[%s4226_s3 + $0x2d0] sm:$0xff]  }
 0x115   :  { %3008 = vmatprep.subr.bf16.mxu0 %v3186_v36  ;;  %3030 = vmatprep.subr.bf16.mxu1 %v3187_v38  ;;  %v3208_v35 = vld [vmem:[%s4226_s3 + $0x210] sm:$0xff]   ;;  %v3210_v38 = vld [vmem:[%s4226_s3 + $0x258] sm:$0xff]  }
 0x116   :  { %v3209_v36 = vld [vmem:[%s4226_s3 + $0x290] sm:$0xff]  }
 0x118   :  { %v1006_v55 = vpop.f32.mrb[4].mxu0  ;;  %3009 = vmatpush3.bf16.msra.mxu0 %v3188_v41  ;;  %v1049_v58 = vpop.f32.mrb[4].mxu1  ;;  %3031 = vmatpush3.bf16.msra.mxu1 %v3189_v49  ;;  %v3211_v41 = vld [vmem:[%s4226_s3 + $0x2d8] sm:$0xff]  }
 0x119   :  { %v1007_v57 = vadd.f32 %v1006_v55, %v185_v42  ;;  %v1008_v59 = vpop.f32.mrb[5].mxu0  ;;  %3010 = vmatprep.subr.bf16.mxu0 %v3190_v50  ;;  %v1050_v45 = vadd.f32 %v1049_v58, %v193_v51  ;;  %v1051_v63 = vpop.f32.mrb[5].mxu1  ;;  %3032 = vmatprep.subr.bf16.mxu1 %v3191_v53  ;;  %v3213_v49 = vld [vmem:[%s4226_s3 + $0x298] sm:$0xff]   ;;  %v3214_v50 = vld [vmem:[%s4226_s3 + $0x260] sm:$0xff]   ;;  %v3219_v55 = vld [vmem:[%s4226_s3 + $0x2e8] sm:$0xff]  }
 0x11a   :  { %v1009_v62 = vadd.f32 %v1008_v59, %v189_v52  ;;  %v1010_v0 = vpop.f32.mrb[6].mxu0  ;;  %v1052_v3 = vadd.f32 %v1051_v63, %v197_v54  ;;  %v1053_v5 = vpop.f32.mrb[6].mxu1  ;;  %v3217_v53 = vld [vmem:[%s4226_s3 + $0x2a0] sm:$0xff]   ;;  %v3221_v59 = vld [vmem:[%s4226_s3 + $0x2a8] sm:$0xff]  }
 0x11b   :  { %v1234_v2 = vmax.f32 %v1007_v57, 0.0  ;;  %v1011_v4 = vadd.f32 %v1010_v0, %v185_v42  ;;  %v1012_v6 = vpop.f32.mrb[7].mxu0  ;;  %v1236_v7 = vmax.f32 %v1050_v45, 0.0  ;;  %v1054_v9 = vadd.f32 %v1053_v5, %v193_v51  ;;  %v1055_v11 = vpop.f32.mrb[7].mxu1  ;;  %v3212_v42 = vld [vmem:[%s4226_s3 + $0x218] sm:$0xff]   ;;  %v3215_v51 = vld [vmem:[%s4226_s3 + $0x2e0] sm:$0xff]  }
 0x11c   :  { %v1013_v10 = vadd.f32 %v1012_v6, %v189_v52  ;;  %3011 = vmatpush3.bf16.msra.mxu0 %v3192_v56  ;;  %v1237_v14 = vmax.f32 %v1052_v3, 0.0  ;;  %v1056_v16 = vadd.f32 %v1055_v11, %v197_v54  ;;  %3033 = vmatpush3.bf16.msra.mxu1 %v3193_v60  ;;  %v1235_v19 = vmax.f32 %v1009_v62, 0.0  ;;  %v3216_v52 = vld [vmem:[%s4226_s3 + $0x220] sm:$0xff]   ;;  %v3218_v54 = vld [vmem:[%s4226_s3 + $0x268] sm:$0xff]   ;;  %v3222_v60 = vld [vmem:[%s4226_s3 + $0x270] sm:$0xff]  }
 0x11d   :  { %v1250_v15 = vmax.f32 %v1011_v4, 0.0  ;;  %3012 = vmatprep.subr.bf16.mxu0 %v3194_v61  ;;  %v1252_v20 = vmax.f32 %v1054_v9, 0.0  ;;  %3034 = vmatprep.subr.bf16.mxu1 %v3195_v1  ;;  %v4044_v56 = vld [vmem:[%s4225_s2 + $0x8] sm:$0xff]  ;;  %v3224_v0 = vld [vmem:[%s4226_s3 + $0x230] sm:$0xff]   ;;  %v3226_v3 = vld [vmem:[%s4226_s3 + $0x278] sm:$0xff]  }
 0x11e   :  { %v1251_v12 = vmax.f32 %v1013_v10, 0.0  ;;  %v1253_v23 = vmax.f32 %v1056_v16, 0.0  ;;  %v3220_v57 = vld [vmem:[%s4226_s3 + $0x228] sm:$0xff]   ;;  %v201_v58 = vrot.slane %v4044_v56, %v168_v44  ;;  %v209_v61 = vrot.slane %v4044_v56, %v176_v46  ;;  %v3223_v44 = vld [vmem:[%s4226_s3 + $0x2f0] sm:$0xff]  }
 0x11f   :  { %v1266_v22 = vpack.c.bf16 %v1250_v15, %v1234_v2  ;;  %v1268_v24 = vpack.c.bf16 %v1252_v20, %v1236_v7  ;;  %v205_v45 = vrot.slane %v4044_v56, %v172_v47  ;;  %v213_v62 = vrot.slane %v4044_v56, %v180_v48  ;;  %v3225_v47 = vld [vmem:[%s4226_s3 + $0x2b0] sm:$0xff]   ;;  %v3227_v7 = vld [vmem:[%s4226_s3 + $0x2f8] sm:$0xff]  }
 0x120   :  { %v1267_v25 = vpack.c.bf16 %v1251_v12, %v1235_v19  ;;  %3013 = vmatpush3.bf16.msra.mxu0 %v3196_v13  ;;  %v1269_v27 = vpack.c.bf16 %v1253_v23, %v1237_v14  ;;  %3035 = vmatpush3.bf16.msra.mxu1 %v3197_v17  ;;  %v3228_v19 = vld [vmem:[%s4226_s3 + $0x238] sm:$0xff]   ;;  %v3230_v23 = vld [vmem:[%s4226_s3 + $0x340] sm:$0xff]  }
 0x121   :  { %3042 = vmatprep.subr.bf16.mxu0 %v3198_v18  ;;  %3064 = vmatprep.subr.bf16.mxu1 %v3199_v21 }
 0x122   :  { %2422 = vmatprep.mubr.bf16.mxu0 %v1267_v25  ;;  %2463 = vmatprep.mubr.bf16.mxu1 %v1269_v27  ;;  %v3231_v27 = vld [vmem:[%s4226_s3 + $0x3c0] sm:$0xff]  }
 0x123   :  { %2423 = vmatmul.mubr.bf16.vlgmr.msra.gmra.mrb[20].mxu0 %v1266_v22  ;;  %2464 = vmatmul.mubr.bf16.vlgmr.msra.gmra.mrb[20].mxu1 %v1268_v24  ;;  %v3229_v22 = vld [vmem:[%s4226_s3 + $0x2b8] sm:$0xff]  }
 0x124   :  { %3043 = vmatpush3.bf16.msra.mxu0 %v3200_v26  ;;  %3065 = vmatpush3.bf16.msra.mxu1 %v3201_v28 }
 0x125   :  { %3044 = vmatprep.subr.bf16.mxu0 %v3202_v29  ;;  %3066 = vmatprep.subr.bf16.mxu1 %v3203_v30 }
 0x128   :  { %3045 = vmatpush3.bf16.msra.mxu0 %v3204_v31  ;;  %3067 = vmatpush3.bf16.msra.mxu1 %v3205_v32  ;;  %v3232_v32 = vld [vmem:[%s4226_s3 + $0x300] sm:$0xff]  }
 0x129   :  { %3046 = vmatprep.subr.bf16.mxu0 %v3206_v33  ;;  %3068 = vmatprep.subr.bf16.mxu1 %v3207_v34  ;;  %v3233_v34 = vld [vmem:[%s4226_s3 + $0x380] sm:$0xff]  }
 0x12c   :  { %3047 = vmatpush3.bf16.msra.mxu0 %v3208_v35  ;;  %3069 = vmatpush3.bf16.msra.mxu1 %v3209_v36  ;;  %v3234_v35 = vld [vmem:[%s4226_s3 + $0x348] sm:$0xff]  }
 0x12d   :  { %3048 = vmatprep.subr.bf16.mxu0 %v3210_v38  ;;  %3070 = vmatprep.subr.bf16.mxu1 %v3211_v41  ;;  %v3235_v36 = vld [vmem:[%s4226_s3 + $0x3c8] sm:$0xff]  }
 0x12e   :  { %v3236_v38 = vld [vmem:[%s4226_s3 + $0x308] sm:$0xff]  }
 0x12f   :  { %v3237_v41 = vld [vmem:[%s4226_s3 + $0x388] sm:$0xff]  }
 0x130   :  { %3049 = vmatpush3.bf16.msra.mxu0 %v3212_v42  ;;  %3071 = vmatpush3.bf16.msra.mxu1 %v3213_v49  ;;  %v3238_v42 = vld [vmem:[%s4226_s3 + $0x350] sm:$0xff]  }
 0x131   :  { %3050 = vmatprep.subr.bf16.mxu0 %v3214_v50  ;;  %3072 = vmatprep.subr.bf16.mxu1 %v3215_v51  ;;  %v3239_v49 = vld [vmem:[%s4226_s3 + $0x3d0] sm:$0xff]  }
 0x132   :  { %v3240_v50 = vld [vmem:[%s4226_s3 + $0x310] sm:$0xff]  }
 0x133   :  { %v3241_v51 = vld [vmem:[%s4226_s3 + $0x390] sm:$0xff]  }
 0x134   :  { %3051 = vmatpush3.bf16.msra.mxu0 %v3216_v52  ;;  %3073 = vmatpush3.bf16.msra.mxu1 %v3217_v53  ;;  %v3242_v52 = vld [vmem:[%s4226_s3 + $0x358] sm:$0xff]  }
 0x135   :  { %3052 = vmatprep.subr.bf16.mxu0 %v3218_v54  ;;  %3074 = vmatprep.subr.bf16.mxu1 %v3219_v55  ;;  %v3243_v53 = vld [vmem:[%s4226_s3 + $0x3d8] sm:$0xff]  }
 0x136   :  { %v3244_v54 = vld [vmem:[%s4226_s3 + $0x318] sm:$0xff]  }
 0x137   :  { %v3245_v55 = vld [vmem:[%s4226_s3 + $0x398] sm:$0xff]  }
 0x138   :  { %v1092_v63 = vpop.f32.mrb[8].mxu0  ;;  %3053 = vmatpush3.bf16.msra.mxu0 %v3220_v57  ;;  %v1135_v46 = vpop.f32.mrb[8].mxu1  ;;  %3075 = vmatpush3.bf16.msra.mxu1 %v3221_v59  ;;  %v3246_v57 = vld [vmem:[%s4226_s3 + $0x360] sm:$0xff]  }
 0x139   :  { %v1093_v1 = vadd.f32 %v1092_v63, %v201_v58  ;;  %v1094_v2 = vpop.f32.mrb[9].mxu0  ;;  %3054 = vmatprep.subr.bf16.mxu0 %v3222_v60  ;;  %v1136_v48 = vadd.f32 %v1135_v46, %v209_v61  ;;  %v1137_v5 = vpop.f32.mrb[9].mxu1  ;;  %3076 = vmatprep.subr.bf16.mxu1 %v3223_v44  ;;  %v3248_v59 = vld [vmem:[%s4226_s3 + $0x320] sm:$0xff]   ;;  %v3252_v44 = vld [vmem:[%s4226_s3 + $0x328] sm:$0xff]   ;;  %v221_v46 = vrot.slane %v4044_v56, %v188_v40  ;;  %v3257_v40 = vld [vmem:[%s4226_s3 + $0x3b0] sm:$0xff]  }
 0x13a   :  { %v1095_v4 = vadd.f32 %v1094_v2, %v205_v45  ;;  %v1096_v6 = vpop.f32.mrb[10].mxu0  ;;  %v1138_v10 = vadd.f32 %v1137_v5, %v213_v62  ;;  %v1139_v13 = vpop.f32.mrb[10].mxu1  ;;  %v3249_v60 = vld [vmem:[%s4226_s3 + $0x3a0] sm:$0xff]   ;;  %v3253_v63 = vld [vmem:[%s4226_s3 + $0x3a8] sm:$0xff]   ;;  %v229_v2 = vrot.slane %v4044_v56, %v196_v8 }
 0x13b   :  { %v1238_v9 = vmax.f32 %v1093_v1, 0.0  ;;  %v1097_v11 = vadd.f32 %v1096_v6, %v201_v58  ;;  %v1098_v14 = vpop.f32.mrb[11].mxu0  ;;  %v1240_v15 = vmax.f32 %v1136_v48, 0.0  ;;  %v1140_v16 = vadd.f32 %v1139_v13, %v209_v61  ;;  %v1141_v18 = vpop.f32.mrb[11].mxu1  ;;  %v3247_v58 = vld [vmem:[%s4226_s3 + $0x3e0] sm:$0xff]   ;;  %v3250_v61 = vld [vmem:[%s4226_s3 + $0x368] sm:$0xff]  }
 0x13c   :  { %v1099_v17 = vadd.f32 %v1098_v14, %v205_v45  ;;  %3055 = vmatpush3.bf16.msra.mxu0 %v3224_v0  ;;  %v1241_v20 = vmax.f32 %v1138_v10, 0.0  ;;  %v1142_v21 = vadd.f32 %v1141_v18, %v213_v62  ;;  %3077 = vmatpush3.bf16.msra.mxu1 %v3225_v47  ;;  %v1239_v24 = vmax.f32 %v1095_v4, 0.0  ;;  %v3251_v45 = vld [vmem:[%s4226_s3 + $0x3e8] sm:$0xff]   ;;  %v3254_v0 = vld [vmem:[%s4226_s3 + $0x370] sm:$0xff]   ;;  %v3260_v18 = vld [vmem:[%s4226_s3 + $0x338] sm:$0xff]  }
 0x13d   :  { %v1254_v12 = vmax.f32 %v1097_v11, 0.0  ;;  %3056 = vmatprep.subr.bf16.mxu0 %v3226_v3  ;;  %v1256_v25 = vmax.f32 %v1140_v16, 0.0  ;;  %3078 = vmatprep.subr.bf16.mxu1 %v3227_v7  ;;  %v217_v62 = vrot.slane %v4044_v56, %v184_v37  ;;  %v225_v1 = vrot.slane %v4044_v56, %v192_v39  ;;  %v3255_v37 = vld [vmem:[%s4226_s3 + $0x3f0] sm:$0xff]   ;;  %v3259_v7 = vld [vmem:[%s4226_s3 + $0x3f8] sm:$0xff]  }
 0x13e   :  { %v1255_v26 = vmax.f32 %v1099_v17, 0.0  ;;  %v1257_v29 = vmax.f32 %v1142_v21, 0.0  ;;  %v3256_v3 = vld [vmem:[%s4226_s3 + $0x330] sm:$0xff]  }
 0x13f   :  { %v1270_v28 = vpack.c.bf16 %v1254_v12, %v1238_v9  ;;  %v1272_v30 = vpack.c.bf16 %v1256_v25, %v1240_v15 }
 0x140   :  { %v1271_v31 = vpack.c.bf16 %v1255_v26, %v1239_v24  ;;  %3057 = vmatpush3.bf16.msra.mxu0 %v3228_v19  ;;  %v1273_v33 = vpack.c.bf16 %v1257_v29, %v1241_v20  ;;  %3079 = vmatpush3.bf16.msra.mxu1 %v3229_v22  ;;  %v3261_v22 = vld [vmem:[%s4226_s3 + $0x3b8] sm:$0xff]  }
 0x141   :  { %3086 = vmatprep.subr.bf16.mxu0 %v3230_v23  ;;  %3108 = vmatprep.subr.bf16.mxu1 %v3231_v27 }
 0x142   :  { %2504 = vmatprep.mubr.bf16.mxu0 %v1271_v31  ;;  %2545 = vmatprep.mubr.bf16.mxu1 %v1273_v33  ;;  %v2823_v33 = vld [vmem:[%s4227_s4] ss:$0 sm:$0xff] }
 0x143   :  { %2505 = vmatmul.mubr.bf16.vlgmr.msra.gmra.mrb[24].mxu0 %v1270_v28  ;;  %2546 = vmatmul.mubr.bf16.vlgmr.msra.gmra.mrb[24].mxu1 %v1272_v30 }
 0x144   :  { %3087 = vmatpush3.bf16.msra.mxu0 %v3232_v32  ;;  %3109 = vmatpush3.bf16.msra.mxu1 %v3233_v34 }
 0x145   :  { %3088 = vmatprep.subr.bf16.mxu0 %v3234_v35  ;;  %3110 = vmatprep.subr.bf16.mxu1 %v3235_v36 }
 0x148   :  { %3089 = vmatpush3.bf16.msra.mxu0 %v3236_v38  ;;  %3111 = vmatpush3.bf16.msra.mxu1 %v3237_v41 }
 0x149   :  { %3090 = vmatprep.subr.bf16.mxu0 %v3238_v42  ;;  %3112 = vmatprep.subr.bf16.mxu1 %v3239_v49 }
 0x14c   :  { %3091 = vmatpush3.bf16.msra.mxu0 %v3240_v50  ;;  %3113 = vmatpush3.bf16.msra.mxu1 %v3241_v51 }
 0x14d   :  { %3092 = vmatprep.subr.bf16.mxu0 %v3242_v52  ;;  %3114 = vmatprep.subr.bf16.mxu1 %v3243_v53 }
 0x150   :  { %3093 = vmatpush3.bf16.msra.mxu0 %v3244_v54  ;;  %3115 = vmatpush3.bf16.msra.mxu1 %v3245_v55 }
 0x151   :  { %3094 = vmatprep.subr.bf16.mxu0 %v3246_v57  ;;  %3116 = vmatprep.subr.bf16.mxu1 %v3247_v58 }
 0x154   :  { %3095 = vmatpush3.bf16.msra.mxu0 %v3248_v59  ;;  %3117 = vmatpush3.bf16.msra.mxu1 %v3249_v60 }
 0x155   :  { %3096 = vmatprep.subr.bf16.mxu0 %v3250_v61  ;;  %3118 = vmatprep.subr.bf16.mxu1 %v3251_v45 }
 0x158   :  { %v1178_v47 = vpop.f32.mrb[12].mxu0  ;;  %3097 = vmatpush3.bf16.msra.mxu0 %v3252_v44  ;;  %v1221_v39 = vpop.f32.mrb[12].mxu1  ;;  %3119 = vmatpush3.bf16.msra.mxu1 %v3253_v63 }
 0x159   :  { %v1179_v48 = vadd.f32 %v1178_v47, %v217_v62  ;;  %v1180_v4 = vpop.f32.mrb[13].mxu0  ;;  %3098 = vmatprep.subr.bf16.mxu0 %v3254_v0  ;;  %v1222_v8 = vadd.f32 %v1221_v39, %v225_v1  ;;  %v1223_v5 = vpop.f32.mrb[13].mxu1  ;;  %3120 = vmatprep.subr.bf16.mxu1 %v3255_v37 }
 0x15a   :  { %v1181_v56 = vadd.f32 %v1180_v4, %v221_v46  ;;  %v1182_v6 = vpop.f32.mrb[14].mxu0  ;;  %v1224_v9 = vadd.f32 %v1223_v5, %v229_v2  ;;  %v1225_v11 = vpop.f32.mrb[14].mxu1 }
 0x15b   :  { %v1183_v10 = vadd.f32 %v1182_v6, %v217_v62  ;;  %v1184_v13 = vpop.f32.mrb[15].mxu0  ;;  %v1244_v14 = vmax.f32 %v1222_v8, 0.0  ;;  %v1226_v15 = vadd.f32 %v1225_v11, %v225_v1  ;;  %v1227_v17 = vpop.f32.mrb[15].mxu1  ;;  %v1242_v19 = vmax.f32 %v1179_v48, 0.0 }
 0x15c   :  { %v1185_v16 = vadd.f32 %v1184_v13, %v221_v46  ;;  %3099 = vmatpush3.bf16.msra.mxu0 %v3256_v3  ;;  %v1245_v20 = vmax.f32 %v1224_v9, 0.0  ;;  %v1228_v21 = vadd.f32 %v1227_v17, %v229_v2  ;;  %3121 = vmatpush3.bf16.msra.mxu1 %v3257_v40  ;;  %v1243_v23 = vmax.f32 %v1181_v56, 0.0 }
 0x15d   :  { %v1258_v12 = vmax.f32 %v1183_v10, 0.0  ;;  %3100 = vmatprep.subr.bf16.mxu0 %v3258_v43  ;;  %v1260_v24 = vmax.f32 %v1226_v15, 0.0  ;;  %3122 = vmatprep.subr.bf16.mxu1 %v3259_v7 }
 0x15e   :  { %v1259_v25 = vmax.f32 %v1185_v16, 0.0  ;;  %v1261_v27 = vmax.f32 %v1228_v21, 0.0 }
 0x15f   :  { %v1274_v26 = vpack.c.bf16 %v1258_v12, %v1242_v19  ;;  %v1276_v28 = vpack.c.bf16 %v1260_v24, %v1244_v14 }
 0x160   :  { %v1275_v29 = vpack.c.bf16 %v1259_v25, %v1243_v23  ;;  %3101 = vmatpush3.bf16.msra.mxu0 %v3260_v18  ;;  %v1277_v30 = vpack.c.bf16 %v1261_v27, %v1245_v20  ;;  %3123 = vmatpush3.bf16.msra.mxu1 %v3261_v22 }
 0x162   :  { %2586 = vmatprep.mubr.bf16.mxu0 %v1275_v29  ;;  %2627 = vmatprep.mubr.bf16.mxu1 %v1277_v30 }
 0x163   :  { %2587 = vmatmul.mubr.bf16.vlgmr.msra.gmra.mrb[28].mxu0 %v1274_v26  ;;  %2628 = vmatmul.mubr.bf16.vlgmr.msra.gmra.mrb[28].mxu1 %v1276_v28 }
 0x1d6   :  { %v2970_v31 = vpop.f32.mrb[16].mxu0  ;;  %v2992_v32 = vpop.f32.mrb[16].mxu1 }
 0x1d7   :  { %v2971_v34 = vpop.f32.mrb[17].mxu0  ;;  %v2993_v36 = vpop.f32.mrb[17].mxu1 }
 0x1d8   :  { %v2972_v35 = vadd.f32 %v2971_v34, %v2970_v31  ;;  %v2973_v38 = vpop.f32.mrb[18].mxu0  ;;  %v2994_v41 = vadd.f32 %v2993_v36, %v2992_v32  ;;  %v2995_v42 = vpop.f32.mrb[18].mxu1  ;;  %v3266_v32 = vld [vmem:[%s4223_s0] sm:$0xff]  ;;  %v3267_v34 = vld [vmem:[%s4223_s0 + $0x8] sm:$0xff] }
 0x1d9   :  { %v2974_v49 = vpop.f32.mrb[19].mxu0  ;;  %v2996_v52 = vpop.f32.mrb[19].mxu1 }
 0x1da   :  { %v2343_v50 = vadd.f32 %v2972_v35, %v2823_v33  ;;  %v2975_v51 = vadd.f32 %v2974_v49, %v2973_v38  ;;  %v2997_v53 = vadd.f32 %v2996_v52, %v2995_v42 }
 0x1dc   :  { %v2384_v54 = vadd.f32 %v2994_v41, %v2343_v50  ;;  %v2346_v55 = vadd.f32 %v2975_v51, %v2823_v33 }
 0x1de   :  { %v2387_v57 = vadd.f32 %v2997_v53, %v2346_v55 }
 0x1f6   :  { %v3014_v58 = vpop.f32.mrb[20].mxu0  ;;  %v3036_v59 = vpop.f32.mrb[20].mxu1 }
 0x1f7   :  { %v3015_v60 = vpop.f32.mrb[21].mxu0  ;;  %v3037_v45 = vpop.f32.mrb[21].mxu1 }
 0x1f8   :  { %v3016_v61 = vadd.f32 %v3015_v60, %v3014_v58  ;;  %v3017_v44 = vpop.f32.mrb[22].mxu0  ;;  %v3038_v62 = vadd.f32 %v3037_v45, %v3036_v59  ;;  %v3039_v63 = vpop.f32.mrb[22].mxu1 }
 0x1f9   :  { %v3018_v0 = vpop.f32.mrb[23].mxu0  ;;  %v3040_v37 = vpop.f32.mrb[23].mxu1 }
 0x1fa   :  { %v2425_v1 = vadd.f32 %v3016_v61, %v2384_v54  ;;  %v3019_v46 = vadd.f32 %v3018_v0, %v3017_v44  ;;  %v3041_v2 = vadd.f32 %v3040_v37, %v3039_v63  ;;  %v2952_v61 = vld [vmem:[%s4228_s5] ss:$0 sm:$0xff] }
 0x1fb   :  { %v2953_v44 = vld [vmem:[%s4229_s6] ss:$0 sm:$0xff] }
 0x1fc   :  { %v2466_v47 = vadd.f32 %v3038_v62, %v2425_v1  ;;  %v2428_v3 = vadd.f32 %v3019_v46, %v2387_v57 }
 0x1fe   :  { %v2469_v48 = vadd.f32 %v3041_v2, %v2428_v3 }
 0x216   :  { %v3058_v39 = vpop.f32.mrb[24].mxu0  ;;  %v3080_v4 = vpop.f32.mrb[24].mxu1 }
 0x217   :  { %v3059_v40 = vpop.f32.mrb[25].mxu0  ;;  %v3081_v8 = vpop.f32.mrb[25].mxu1 }
 0x218   :  { %v3060_v43 = vadd.f32 %v3059_v40, %v3058_v39  ;;  %v3061_v56 = vpop.f32.mrb[26].mxu0  ;;  %v3082_v5 = vadd.f32 %v3081_v8, %v3080_v4  ;;  %v3083_v6 = vpop.f32.mrb[26].mxu1 }
 0x219   :  { %v3062_v7 = vpop.f32.mrb[27].mxu0  ;;  %v3084_v11 = vpop.f32.mrb[27].mxu1 }
 0x21a   :  { %v2507_v9 = vadd.f32 %v3060_v43, %v2466_v47  ;;  %v3063_v10 = vadd.f32 %v3062_v7, %v3061_v56  ;;  %v3085_v13 = vadd.f32 %v3084_v11, %v3083_v6 }
 0x21c   :  { %v2548_v14 = vadd.f32 %v3082_v5, %v2507_v9  ;;  %v2510_v15 = vadd.f32 %v3063_v10, %v2469_v48 }
 0x21e   :  { %v2551_v16 = vadd.f32 %v3085_v13, %v2510_v15 }
 0x236   :  { %v3102_v17 = vpop.f32.mrb[28].mxu0  ;;  %v3124_v18 = vpop.f32.mrb[28].mxu1 }
 0x237   :  { %v3103_v19 = vpop.f32.mrb[29].mxu0  ;;  %v3125_v12 = vpop.f32.mrb[29].mxu1 }
 0x238   :  { %v3104_v20 = vadd.f32 %v3103_v19, %v3102_v17  ;;  %v3105_v21 = vpop.f32.mrb[30].mxu0  ;;  %v3126_v22 = vadd.f32 %v3125_v12, %v3124_v18  ;;  %v3127_v23 = vpop.f32.mrb[30].mxu1 }
 0x239   :  { %v3106_v24 = vpop.f32.mrb[31].mxu0  ;;  %v3128_v27 = vpop.f32.mrb[31].mxu1 }
 0x23a   :  { %v2589_v25 = vadd.f32 %v3104_v20, %v2548_v14  ;;  %v3107_v26 = vadd.f32 %v3106_v24, %v3105_v21  ;;  %v3129_v28 = vadd.f32 %v3128_v27, %v3127_v23 }
 0x23c   :  { %v2630_v29 = vadd.f32 %v3126_v22, %v2589_v25  ;;  %v2592_v30 = vadd.f32 %v3107_v26, %v2551_v16 }
 0x23e   :  { %v2633_v31 = vadd.f32 %v3129_v28, %v2592_v30  ;;  %v2636_v33 = vadd.f32 %v3266_v32, %v2630_v29 }
 0x240   :  { %2638 = vadd.xlane.f32.xlu0 %v2636_v33  ;;  %v2637_v35 = vadd.f32 %v3267_v34, %v2633_v31 }
 0x244   :  { %2640 = vadd.xlane.f32.xlu0 %v2637_v35 }
 0x2cd   :  { %v2639_v36 = vpop.xlane.xlu0 %2638 }
 0x2ce   :  { %v2643_v38 = vmul.f32 0.0078125, %v2639_v36 }
 0x2d0   :  { %v2645_v41 = vsub.f32 %v2636_v33, %v2643_v38 }
 0x2d1   :  { %v2641_v42 = vpop.xlane.xlu0 %2640 }
 0x2d2   :  { %v2644_v49 = vmul.f32 0.0078125, %v2641_v42  ;;  %v2647_v50 = vmul.f32 %v2645_v41, %v2645_v41 }
 0x2d4   :  { %v2646_v51 = vsub.f32 %v2637_v35, %v2644_v49  ;;  %2649 = vadd.xlane.f32.xlu1 %v2647_v50 }
 0x2d6   :  { %v2648_v52 = vmul.f32 %v2646_v51, %v2646_v51 }
 0x2d8   :  { %2651 = vadd.xlane.f32.xlu1 %v2648_v52 }
 0x361   :  { %v2650_v53 = vpop.xlane.xlu1 %2649 }
 0x362   :  { %v2653_v54 = vmul.f32 0.0078125, %v2650_v53 }
 0x364   :  { %v2655_v55 = vadd.f32 1e-05, %v2653_v54 }
 0x365   :  { %v2652_v57 = vpop.xlane.xlu1 %2651 }
 0x366   :  { %3262 = vrsqrt.f32 %v2655_v55  ;;  %v2654_v58 = vmul.f32 0.0078125, %v2652_v57 }
 0x368   :  { %v2656_v59 = vadd.f32 1e-05, %v2654_v58 }
 0x36a   :  { %3264 = vrsqrt.f32 %v2656_v59 }
 0x370   :  { %v3263_v60 = vpop.eup %3262 }
 0x371   :  { %v2659_v45 = vmul.f32 %v3263_v60, %v2645_v41 }
 0x373   :  { %v2667_v62 = vmul.f32 %v2952_v61, %v2659_v45 }
 0x374   :  { %v3265_v63 = vpop.eup %3264 }
 0x375   :  { %v2660_v0 = vmul.f32 %v3265_v63, %v2646_v51  ;;  %v2675_v1 = vadd.f32 %v2953_v44, %v2667_v62 }
 0x377   :  { %v2668_v46 = vmul.f32 %v2952_v61, %v2660_v0  ;;  %2677 = vst [vmem:[#allocation2] sm:$0xff] %v2675_v1 }
 0x379   :  { %v2676_v37 = vadd.f32 %v2953_v44, %v2668_v46 }
 0x37b   :  { %2678 = vst [vmem:[#allocation2 + $0x8] sm:$0xff] %v2676_v37 }
 0x37c   :  { %3279 = shalt.err (!%p3276_p4)
}
 0x37d   :  { %s3280_s10 = scalar_lea.hbm %s4230_s7, 256 }
 0x37e   :  { %p3281_p5 = scmp.ne.s32.totalorder %s4230_s7, %s3280_s10  ;;  %p3284_p6 = scmp.lt.u32.totalorder %s3280_s10, %s4230_s7 }
 0x380   :  { %p3286_p7 = pnand %p3284_p6, %p3281_p5 }
 0x382   :  { %3289 = shalt.err (!%p3286_p7)
}
 0x383   :  { %s3294_s14 = smov 128   ;;  %s3295_s15 = smov 8  }
 0x384   :  { %2690 = dma.vmem_to_hbm [thread:$0]  %s2685_s8, 256, %s4230_s7, [#allocation3], %s3294_s14, %s3294_s14, %s3295_s15  }
 0x385   :  { %3290 = dma.done.wait [#allocation3], 256  }
 0x386   :  { %3291 = vsyncadd [#allocation3], 4294967040 }
 0x387   :  { %2694 = vsyncpa [#allocation3], 1 }

</bundles_post_ra>
